<compile_context>
chip_gen: v6e
topology: v6e:2x2x1
jax: 0.10.0
libtpu: 0.0.40
codegen_flags: <defaults>
</compile_context>

<pallas_src>
import numpy as np
import jax
import jax.numpy as jnp
from jax import lax
from jax.experimental import pallas as pl
from jax.experimental.pallas import tpu as pltpu

EPS = 1e-5  # PyTorch BatchNorm2d default eps


# ---------------------------------------------------------------------------
# Single fused kernel: conv1/2/3 (+BN+ReLU) -> avg-pool -> MLP -> softmax.
# ---------------------------------------------------------------------------
def _fused_kernel(x_ref,
                  g1_ref, w1_ref, b1_ref,
                  g2_ref, w2_ref, b2_ref,
                  g3_ref, w3_ref, b3_ref,
                  pm_ref,
                  l1_ref, lb1_ref, l2_ref, lb2_ref, l3_ref, lb3_ref,
                  o_ref):
    f32, bf16 = jnp.float32, jnp.bfloat16

    def conv_bn_relu(act, g_ref, w_ref, b_ref):
        # act   : (R, Cin) f32, rows ordered (n, h, w)
        # g_ref : (9*M, R) bf16 0/1 gather matrix = tap-stacked im2col as a matmul
        # w_ref : (9, Cin, Cout) bf16 tap weights with BN scale folded in
        # b_ref : (1, Cout) f32 folded bias (conv bias + BN shift)
        m = g_ref.shape[0] // 9
        p = jnp.dot(g_ref[...], act.astype(bf16),
                    preferred_element_type=f32)                 # (9M, Cin)
        acc = None
        for t in range(9):                                      # 9 tap GEMMs
            d = jnp.dot(p[t * m:(t + 1) * m, :].astype(bf16), w_ref[t],
                        preferred_element_type=f32)
            acc = d if acc is None else acc + d
        return jnp.maximum(acc + b_ref[...], 0.0)               # (M, Cout) f32

    h = conv_bn_relu(x_ref[...], g1_ref, w1_ref, b1_ref)        # (N*8*8, 32)
    h = conv_bn_relu(h, g2_ref, w2_ref, b2_ref)                 # (N*4*4, 64)
    h = conv_bn_relu(h, g3_ref, w3_ref, b3_ref)                 # (N*2*2, 128)

    # AdaptiveAvgPool2d(1) + Flatten as a tiny matmul (1/HW folded into pm).
    pooled = jnp.dot(pm_ref[...], h.astype(bf16),
                     preferred_element_type=f32)                 # (N, 128)

    # MLP head; Dropout layers are identity at inference (model.eval()).
    h1 = jnp.maximum(jnp.dot(pooled.astype(bf16), l1_ref[...],
                             preferred_element_type=f32) + lb1_ref[...], 0.0)
    h2 = jnp.maximum(jnp.dot(h1.astype(bf16), l2_ref[...],
                             preferred_element_type=f32) + lb2_ref[...], 0.0)
    logits = jnp.dot(h2.astype(bf16), l3_ref[...],
                     preferred_element_type=f32) + lb3_ref[...]

    z = logits - jnp.max(logits, axis=-1, keepdims=True)
    e = jnp.exp(z)
    inv = pl.reciprocal(jnp.sum(e, axis=-1, keepdims=True), approx=True)
    o_ref[...] = (e * inv).astype(o_ref.dtype)


# ---------------------------------------------------------------------------
# Host-side, one-time constant preparation (hoisted out of the jitted forward).
# ---------------------------------------------------------------------------
def _build_gather(n, hi, wi):
    """0/1 matrix mapping flattened (n,h,w) rows -> tap-stacked conv-output rows
    for a 3x3 / stride-2 / pad-1 conv (zero-padding taps give all-zero rows)."""
    ho, wo = (hi - 1) // 2 + 1, (wi - 1) // 2 + 1
    m = n * ho * wo
    g = np.zeros((9 * m, n * hi * wi), np.float32)
    for t in range(9):
        kh, kw = divmod(t, 3)
        for b in range(n):
            for oh in range(ho):
                ih = 2 * oh + kh - 1
                if ih < 0 or ih >= hi:
                    continue
                for ow in range(wo):
                    iw = 2 * ow + kw - 1
                    if iw < 0 or iw >= wi:
                        continue
                    g[t * m + (b * ho + oh) * wo + ow,
                      (b * hi + ih) * wi + iw] = 1.0
    return g, ho, wo


def prepare_constants(params, n, h, w):
    """Convert PyTorch-layout params into GEMM-ready kernel constants, once."""
    consts = []
    hi, wi = h, w
    for conv in params["convs"]:
        g_np, ho, wo = _build_gather(n, hi, wi)
        cout = conv["w"].shape[0]
        scale = conv["gamma"] / jnp.sqrt(conv["var"] + EPS)       # eval-mode BN
        bias = conv["beta"] + (conv["b"] - conv["mean"]) * scale
        # (O,I,Kh,Kw) -> (Kh,Kw,I,O) -> (9,I,O); BN scale folded into columns.
        wtap = (jnp.transpose(conv["w"], (2, 3, 1, 0)).reshape(9, -1, cout)
                * scale[None, None, :]).astype(jnp.bfloat16)
        consts += [jnp.asarray(g_np, jnp.bfloat16), wtap,
                   bias.reshape(1, cout).astype(jnp.float32)]
        hi, wi = ho, wo
    pm = np.zeros((n, n * hi * wi), np.float32)                   # avg-pool matrix
    for b in range(n):
        pm[b, b * hi * wi:(b + 1) * hi * wi] = 1.0 / (hi * wi)
    consts.append(jnp.asarray(pm, jnp.bfloat16))
    for lin in params["linears"]:
        dout = lin["w"].shape[0]
        consts += [lin["w"].T.astype(jnp.bfloat16),
                   lin["b"].reshape(1, dout).astype(jnp.float32)]
    return tuple(consts)


def _whole_spec(a):
    nd = a.ndim
    return pl.BlockSpec(tuple(a.shape), lambda i, _nd=nd: (0,) * _nd)


def model_forward(x_nchw, consts):
    """Forward pass of MODEL_From_Scratch (inference) as one fused Pallas call."""
    n, c, h, w = x_nchw.shape
    x2d = jnp.transpose(x_nchw, (0, 2, 3, 1)).reshape(n * h * w, c).astype(jnp.float32)
    num_classes = consts[-1].shape[1]
    args = (x2d,) + tuple(consts)
    return pl.pallas_call(
        _fused_kernel,
        out_shape=jax.ShapeDtypeStruct((n, num_classes), jnp.float32),
        grid=(1,),
        in_specs=[_whole_spec(a) for a in args],
        out_specs=pl.BlockSpec((n, num_classes), lambda i: (0, 0)),
        compiler_params=pltpu.CompilerParams(
            # Whole model in one grid step; ~3.5 MB of double-buffered inputs
            # fits every generation's VMEM (incl. v7x 64 MiB) with large margin.
            # TODO(synk): for larger batch/resolution, add a leading 'parallel'
            # batch/M grid axis (v7x 2nd TensorCore) and re-derive tile sizes.
            dimension_semantics=("arbitrary",)),
    )(*args)


# ---------------------------------------------------------------------------
# Pure-JAX reference (independent path via lax.conv) for correctness checking.
# ---------------------------------------------------------------------------
def reference_forward(x, params):
    h = x.astype(jnp.float32)
    for conv in params["convs"]:
        h = lax.conv_general_dilated(h, conv["w"], window_strides=(2, 2),
                                     padding=((1, 1), (1, 1)),
                                     dimension_numbers=("NCHW", "OIHW", "NCHW"))
        h = h + conv["b"][None, :, None, None]
        h = (h - conv["mean"][None, :, None, None]) / jnp.sqrt(
            conv["var"][None, :, None, None] + EPS)
        h = h * conv["gamma"][None, :, None, None] + conv["beta"][None, :, None, None]
        h = jnp.maximum(h, 0.0)
    h = jnp.mean(h, axis=(2, 3))
    for i, lin in enumerate(params["linears"]):
        h = h @ lin["w"].T + lin["b"]
        if i < 2:
            h = jnp.maximum(h, 0.0)
    return jax.nn.softmax(h, axis=-1)


# ---------------------------------------------------------------------------
# Deterministic parameter init (PyTorch layouts: conv (O,I,Kh,Kw), linear (O,I)).
# ---------------------------------------------------------------------------
def _init_conv(key, cin, cout):
    kw, kb, kg, kbe, km, kv = jax.random.split(key, 6)
    fan_in = cin * 9
    return dict(
        w=jax.random.normal(kw, (cout, cin, 3, 3), jnp.float32) / jnp.sqrt(fan_in),
        b=0.1 * jax.random.normal(kb, (cout,), jnp.float32),
        gamma=1.0 + 0.1 * jax.random.normal(kg, (cout,), jnp.float32),
        beta=0.1 * jax.random.normal(kbe, (cout,), jnp.float32),
        mean=0.1 * jax.random.normal(km, (cout,), jnp.float32),
        var=1.0 + 0.1 * jax.random.uniform(kv, (cout,), jnp.float32),
    )


def _init_linear(key, din, dout):
    kw, kb = jax.random.split(key)
    return dict(
        w=jax.random.normal(kw, (dout, din), jnp.float32) / jnp.sqrt(din),
        b=0.1 * jax.random.normal(kb, (dout,), jnp.float32),
    )


if __name__ == "__main__":
    key = jax.random.PRNGKey(0)
    k_x, k_p = jax.random.split(key)
    num_classes = 10

    # Small input consistent with the module: NCHW, 3 input channels.
    x = jax.random.normal(k_x, (2, 3, 16, 16), jnp.float32)

    kc1, kc2, kc3, kl1, kl2, kl3 = jax.random.split(k_p, 6)
    params = dict(
        convs=[_init_conv(kc1, 3, 32), _init_conv(kc2, 32, 64), _init_conv(kc3, 64, 128)],
        linears=[_init_linear(kl1, 128, 512), _init_linear(kl2, 512, 64),
                 _init_linear(kl3, 64, num_classes)],
    )

    # One-time parameter/constant preparation (outside the jitted forward).
    consts = prepare_constants(params, n=2, h=16, w=16)

    y = jax.jit(model_forward)(x, consts)
    jax.block_until_ready(y)

    assert y.shape == (2, num_classes)
    assert y.dtype == jnp.float32
    assert bool(jnp.all(jnp.isfinite(y)))
    # approx reciprocal in the softmax denominator -> rows sum to 1 within ~1e-3.
    assert bool(jnp.allclose(jnp.sum(y, axis=-1), 1.0, atol=1e-2))

    y_ref = jax.jit(reference_forward)(x, params)
    jax.block_until_ready(y_ref)
    assert bool(jnp.allclose(y, y_ref, atol=2e-2)), "Pallas forward mismatch vs reference"

    print("KERNEL_OK")
</pallas_src>

<mosaic_0001>
module attributes {stable_mosaic.version = 11 : i64} {
  func.func @_fused_kernel(%arg0: i32, %arg1: memref<512x3xf32, #tpu.memory_space<vmem>>, %arg2: memref<1152x512xbf16, #tpu.memory_space<vmem>>, %arg3: memref<9x3x32xbf16, #tpu.memory_space<vmem>>, %arg4: memref<1x32xf32, #tpu.memory_space<vmem>>, %arg5: memref<288x128xbf16, #tpu.memory_space<vmem>>, %arg6: memref<9x32x64xbf16, #tpu.memory_space<vmem>>, %arg7: memref<1x64xf32, #tpu.memory_space<vmem>>, %arg8: memref<72x32xbf16, #tpu.memory_space<vmem>>, %arg9: memref<9x64x128xbf16, #tpu.memory_space<vmem>>, %arg10: memref<1x128xf32, #tpu.memory_space<vmem>>, %arg11: memref<2x8xbf16, #tpu.memory_space<vmem>>, %arg12: memref<128x512xbf16, #tpu.memory_space<vmem>>, %arg13: memref<1x512xf32, #tpu.memory_space<vmem>>, %arg14: memref<512x64xbf16, #tpu.memory_space<vmem>>, %arg15: memref<1x64xf32, #tpu.memory_space<vmem>>, %arg16: memref<64x10xbf16, #tpu.memory_space<vmem>>, %arg17: memref<1x10xf32, #tpu.memory_space<vmem>>, %arg18: memref<2x10xf32, #tpu.memory_space<vmem>>) attributes {dimension_semantics = [#tpu.dimension_semantics<arbitrary>], iteration_bounds = array<i64: 1>, scalar_prefetch = 0 : i64, scratch_operands = 0 : i64, tpu.core_type = #tpu.core_type<tc>, window_params = [{pipeline_mode = #tpu.pipeline_mode<synchronous>, transform_indices = @transform_0, window_bounds = array<i64: 512, 3>}, {pipeline_mode = #tpu.pipeline_mode<synchronous>, transform_indices = @transform_1, window_bounds = array<i64: 1152, 512>}, {pipeline_mode = #tpu.pipeline_mode<synchronous>, transform_indices = @transform_2, window_bounds = array<i64: 9, 3, 32>}, {pipeline_mode = #tpu.pipeline_mode<synchronous>, transform_indices = @transform_3, window_bounds = array<i64: 1, 32>}, {pipeline_mode = #tpu.pipeline_mode<synchronous>, transform_indices = @transform_4, window_bounds = array<i64: 288, 128>}, {pipeline_mode = #tpu.pipeline_mode<synchronous>, transform_indices = @transform_5, window_bounds = array<i64: 9, 32, 64>}, {pipeline_mode = #tpu.pipeline_mode<synchronous>, transform_indices = @transform_6, window_bounds = array<i64: 1, 64>}, {pipeline_mode = #tpu.pipeline_mode<synchronous>, transform_indices = @transform_7, window_bounds = array<i64: 72, 32>}, {pipeline_mode = #tpu.pipeline_mode<synchronous>, transform_indices = @transform_8, window_bounds = array<i64: 9, 64, 128>}, {pipeline_mode = #tpu.pipeline_mode<synchronous>, transform_indices = @transform_9, window_bounds = array<i64: 1, 128>}, {pipeline_mode = #tpu.pipeline_mode<synchronous>, transform_indices = @transform_10, window_bounds = array<i64: 2, 8>}, {pipeline_mode = #tpu.pipeline_mode<synchronous>, transform_indices = @transform_11, window_bounds = array<i64: 128, 512>}, {pipeline_mode = #tpu.pipeline_mode<synchronous>, transform_indices = @transform_12, window_bounds = array<i64: 1, 512>}, {pipeline_mode = #tpu.pipeline_mode<synchronous>, transform_indices = @transform_13, window_bounds = array<i64: 512, 64>}, {pipeline_mode = #tpu.pipeline_mode<synchronous>, transform_indices = @transform_14, window_bounds = array<i64: 1, 64>}, {pipeline_mode = #tpu.pipeline_mode<synchronous>, transform_indices = @transform_15, window_bounds = array<i64: 64, 10>}, {pipeline_mode = #tpu.pipeline_mode<synchronous>, transform_indices = @transform_16, window_bounds = array<i64: 1, 10>}, {pipeline_mode = #tpu.pipeline_mode<synchronous>, transform_indices = @transform_17, window_bounds = array<i64: 2, 10>}]} {
    %c0 = arith.constant 0 : index
    %c0_0 = arith.constant 0 : index
    %0 = vector.load %arg1[%c0, %c0_0] : memref<512x3xf32, #tpu.memory_space<vmem>>, vector<512x3xf32>
    %c0_1 = arith.constant 0 : index
    %c0_2 = arith.constant 0 : index
    %1 = vector.load %arg2[%c0_1, %c0_2] : memref<1152x512xbf16, #tpu.memory_space<vmem>>, vector<1152x512xbf16>
    %2 = arith.truncf %0 : vector<512x3xf32> to vector<512x3xbf16>
    %cst = arith.constant dense<0.000000e+00> : vector<1152x3xf32>
    %3 = tpu.matmul %1, %2, %cst {dimension_numbers = #tpu.dot_dimension_numbers<[1], [0], [0], [1], [0, 0, 1, 1], [], []>} : vector<1152x512xbf16>, vector<512x3xbf16>, vector<1152x3xf32> -> vector<1152x3xf32>
    %4 = vector.extract_strided_slice %3 {offsets = [0, 0], sizes = [128, 3], strides = [1, 1]} : vector<1152x3xf32> to vector<128x3xf32>
    %5 = arith.truncf %4 : vector<128x3xf32> to vector<128x3xbf16>
    %c0_3 = arith.constant 0 : index
    %c0_4 = arith.constant 0 : index
    %c0_5 = arith.constant 0 : index
    %6 = vector.load %arg3[%c0_3, %c0_4, %c0_5] : memref<9x3x32xbf16, #tpu.memory_space<vmem>>, vector<1x3x32xbf16>
    %7 = vector.shape_cast %6 : vector<1x3x32xbf16> to vector<3x32xbf16>
    %cst_6 = arith.constant dense<0.000000e+00> : vector<128x32xf32>
    %8 = tpu.matmul %5, %7, %cst_6 {dimension_numbers = #tpu.dot_dimension_numbers<[1], [0], [0], [1], [0, 0, 1, 1], [], []>} : vector<128x3xbf16>, vector<3x32xbf16>, vector<128x32xf32> -> vector<128x32xf32>
    %9 = vector.extract_strided_slice %3 {offsets = [128, 0], sizes = [128, 3], strides = [1, 1]} : vector<1152x3xf32> to vector<128x3xf32>
    %10 = arith.truncf %9 : vector<128x3xf32> to vector<128x3xbf16>
    %c1 = arith.constant 1 : index
    %c0_7 = arith.constant 0 : index
    %c0_8 = arith.constant 0 : index
    %11 = vector.load %arg3[%c1, %c0_7, %c0_8] : memref<9x3x32xbf16, #tpu.memory_space<vmem>>, vector<1x3x32xbf16>
    %12 = vector.shape_cast %11 : vector<1x3x32xbf16> to vector<3x32xbf16>
    %cst_9 = arith.constant dense<0.000000e+00> : vector<128x32xf32>
    %13 = tpu.matmul %10, %12, %cst_9 {dimension_numbers = #tpu.dot_dimension_numbers<[1], [0], [0], [1], [0, 0, 1, 1], [], []>} : vector<128x3xbf16>, vector<3x32xbf16>, vector<128x32xf32> -> vector<128x32xf32>
    %14 = arith.addf %8, %13 : vector<128x32xf32>
    %15 = vector.extract_strided_slice %3 {offsets = [256, 0], sizes = [128, 3], strides = [1, 1]} : vector<1152x3xf32> to vector<128x3xf32>
    %16 = arith.truncf %15 : vector<128x3xf32> to vector<128x3xbf16>
    %c2 = arith.constant 2 : index
    %c0_10 = arith.constant 0 : index
    %c0_11 = arith.constant 0 : index
    %17 = vector.load %arg3[%c2, %c0_10, %c0_11] : memref<9x3x32xbf16, #tpu.memory_space<vmem>>, vector<1x3x32xbf16>
    %18 = vector.shape_cast %17 : vector<1x3x32xbf16> to vector<3x32xbf16>
    %cst_12 = arith.constant dense<0.000000e+00> : vector<128x32xf32>
    %19 = tpu.matmul %16, %18, %cst_12 {dimension_numbers = #tpu.dot_dimension_numbers<[1], [0], [0], [1], [0, 0, 1, 1], [], []>} : vector<128x3xbf16>, vector<3x32xbf16>, vector<128x32xf32> -> vector<128x32xf32>
    %20 = arith.addf %14, %19 : vector<128x32xf32>
    %21 = vector.extract_strided_slice %3 {offsets = [384, 0], sizes = [128, 3], strides = [1, 1]} : vector<1152x3xf32> to vector<128x3xf32>
    %22 = arith.truncf %21 : vector<128x3xf32> to vector<128x3xbf16>
    %c3 = arith.constant 3 : index
    %c0_13 = arith.constant 0 : index
    %c0_14 = arith.constant 0 : index
    %23 = vector.load %arg3[%c3, %c0_13, %c0_14] : memref<9x3x32xbf16, #tpu.memory_space<vmem>>, vector<1x3x32xbf16>
    %24 = vector.shape_cast %23 : vector<1x3x32xbf16> to vector<3x32xbf16>
    %cst_15 = arith.constant dense<0.000000e+00> : vector<128x32xf32>
    %25 = tpu.matmul %22, %24, %cst_15 {dimension_numbers = #tpu.dot_dimension_numbers<[1], [0], [0], [1], [0, 0, 1, 1], [], []>} : vector<128x3xbf16>, vector<3x32xbf16>, vector<128x32xf32> -> vector<128x32xf32>
    %26 = arith.addf %20, %25 : vector<128x32xf32>
    %27 = vector.extract_strided_slice %3 {offsets = [512, 0], sizes = [128, 3], strides = [1, 1]} : vector<1152x3xf32> to vector<128x3xf32>
    %28 = arith.truncf %27 : vector<128x3xf32> to vector<128x3xbf16>
    %c4 = arith.constant 4 : index
    %c0_16 = arith.constant 0 : index
    %c0_17 = arith.constant 0 : index
    %29 = vector.load %arg3[%c4, %c0_16, %c0_17] : memref<9x3x32xbf16, #tpu.memory_space<vmem>>, vector<1x3x32xbf16>
    %30 = vector.shape_cast %29 : vector<1x3x32xbf16> to vector<3x32xbf16>
    %cst_18 = arith.constant dense<0.000000e+00> : vector<128x32xf32>
    %31 = tpu.matmul %28, %30, %cst_18 {dimension_numbers = #tpu.dot_dimension_numbers<[1], [0], [0], [1], [0, 0, 1, 1], [], []>} : vector<128x3xbf16>, vector<3x32xbf16>, vector<128x32xf32> -> vector<128x32xf32>
    %32 = arith.addf %26, %31 : vector<128x32xf32>
    %33 = vector.extract_strided_slice %3 {offsets = [640, 0], sizes = [128, 3], strides = [1, 1]} : vector<1152x3xf32> to vector<128x3xf32>
    %34 = arith.truncf %33 : vector<128x3xf32> to vector<128x3xbf16>
    %c5 = arith.constant 5 : index
    %c0_19 = arith.constant 0 : index
    %c0_20 = arith.constant 0 : index
    %35 = vector.load %arg3[%c5, %c0_19, %c0_20] : memref<9x3x32xbf16, #tpu.memory_space<vmem>>, vector<1x3x32xbf16>
    %36 = vector.shape_cast %35 : vector<1x3x32xbf16> to vector<3x32xbf16>
    %cst_21 = arith.constant dense<0.000000e+00> : vector<128x32xf32>
    %37 = tpu.matmul %34, %36, %cst_21 {dimension_numbers = #tpu.dot_dimension_numbers<[1], [0], [0], [1], [0, 0, 1, 1], [], []>} : vector<128x3xbf16>, vector<3x32xbf16>, vector<128x32xf32> -> vector<128x32xf32>
    %38 = arith.addf %32, %37 : vector<128x32xf32>
    %39 = vector.extract_strided_slice %3 {offsets = [768, 0], sizes = [128, 3], strides = [1, 1]} : vector<1152x3xf32> to vector<128x3xf32>
    %40 = arith.truncf %39 : vector<128x3xf32> to vector<128x3xbf16>
    %c6 = arith.constant 6 : index
    %c0_22 = arith.constant 0 : index
    %c0_23 = arith.constant 0 : index
    %41 = vector.load %arg3[%c6, %c0_22, %c0_23] : memref<9x3x32xbf16, #tpu.memory_space<vmem>>, vector<1x3x32xbf16>
    %42 = vector.shape_cast %41 : vector<1x3x32xbf16> to vector<3x32xbf16>
    %cst_24 = arith.constant dense<0.000000e+00> : vector<128x32xf32>
    %43 = tpu.matmul %40, %42, %cst_24 {dimension_numbers = #tpu.dot_dimension_numbers<[1], [0], [0], [1], [0, 0, 1, 1], [], []>} : vector<128x3xbf16>, vector<3x32xbf16>, vector<128x32xf32> -> vector<128x32xf32>
    %44 = arith.addf %38, %43 : vector<128x32xf32>
    %45 = vector.extract_strided_slice %3 {offsets = [896, 0], sizes = [128, 3], strides = [1, 1]} : vector<1152x3xf32> to vector<128x3xf32>
    %46 = arith.truncf %45 : vector<128x3xf32> to vector<128x3xbf16>
    %c7 = arith.constant 7 : index
    %c0_25 = arith.constant 0 : index
    %c0_26 = arith.constant 0 : index
    %47 = vector.load %arg3[%c7, %c0_25, %c0_26] : memref<9x3x32xbf16, #tpu.memory_space<vmem>>, vector<1x3x32xbf16>
    %48 = vector.shape_cast %47 : vector<1x3x32xbf16> to vector<3x32xbf16>
    %cst_27 = arith.constant dense<0.000000e+00> : vector<128x32xf32>
    %49 = tpu.matmul %46, %48, %cst_27 {dimension_numbers = #tpu.dot_dimension_numbers<[1], [0], [0], [1], [0, 0, 1, 1], [], []>} : vector<128x3xbf16>, vector<3x32xbf16>, vector<128x32xf32> -> vector<128x32xf32>
    %50 = arith.addf %44, %49 : vector<128x32xf32>
    %51 = vector.extract_strided_slice %3 {offsets = [1024, 0], sizes = [128, 3], strides = [1, 1]} : vector<1152x3xf32> to vector<128x3xf32>
    %52 = arith.truncf %51 : vector<128x3xf32> to vector<128x3xbf16>
    %c8 = arith.constant 8 : index
    %c0_28 = arith.constant 0 : index
    %c0_29 = arith.constant 0 : index
    %53 = vector.load %arg3[%c8, %c0_28, %c0_29] : memref<9x3x32xbf16, #tpu.memory_space<vmem>>, vector<1x3x32xbf16>
    %54 = vector.shape_cast %53 : vector<1x3x32xbf16> to vector<3x32xbf16>
    %cst_30 = arith.constant dense<0.000000e+00> : vector<128x32xf32>
    %55 = tpu.matmul %52, %54, %cst_30 {dimension_numbers = #tpu.dot_dimension_numbers<[1], [0], [0], [1], [0, 0, 1, 1], [], []>} : vector<128x3xbf16>, vector<3x32xbf16>, vector<128x32xf32> -> vector<128x32xf32>
    %56 = arith.addf %50, %55 : vector<128x32xf32>
    %c0_31 = arith.constant 0 : index
    %c0_32 = arith.constant 0 : index
    %57 = vector.load %arg4[%c0_31, %c0_32] : memref<1x32xf32, #tpu.memory_space<vmem>>, vector<1x32xf32>
    %58 = vector.broadcast %57 : vector<1x32xf32> to vector<128x32xf32>
    %59 = arith.addf %56, %58 : vector<128x32xf32>
    %cst_33 = arith.constant 0.000000e+00 : f32
    %60 = vector.broadcast %cst_33 : f32 to vector<128x32xf32>
    %61 = arith.maximumf %59, %60 : vector<128x32xf32>
    %c0_34 = arith.constant 0 : index
    %c0_35 = arith.constant 0 : index
    %62 = vector.load %arg5[%c0_34, %c0_35] : memref<288x128xbf16, #tpu.memory_space<vmem>>, vector<288x128xbf16>
    %63 = arith.truncf %61 : vector<128x32xf32> to vector<128x32xbf16>
    %cst_36 = arith.constant dense<0.000000e+00> : vector<288x32xf32>
    %64 = tpu.matmul %62, %63, %cst_36 {dimension_numbers = #tpu.dot_dimension_numbers<[1], [0], [0], [1], [0, 0, 1, 1], [], []>} : vector<288x128xbf16>, vector<128x32xbf16>, vector<288x32xf32> -> vector<288x32xf32>
    %65 = vector.extract_strided_slice %64 {offsets = [0, 0], sizes = [32, 32], strides = [1, 1]} : vector<288x32xf32> to vector<32x32xf32>
    %66 = arith.truncf %65 : vector<32x32xf32> to vector<32x32xbf16>
    %c0_37 = arith.constant 0 : index
    %c0_38 = arith.constant 0 : index
    %c0_39 = arith.constant 0 : index
    %67 = vector.load %arg6[%c0_37, %c0_38, %c0_39] : memref<9x32x64xbf16, #tpu.memory_space<vmem>>, vector<1x32x64xbf16>
    %68 = vector.shape_cast %67 : vector<1x32x64xbf16> to vector<32x64xbf16>
    %cst_40 = arith.constant dense<0.000000e+00> : vector<32x64xf32>
    %69 = tpu.matmul %66, %68, %cst_40 {dimension_numbers = #tpu.dot_dimension_numbers<[1], [0], [0], [1], [0, 0, 1, 1], [], []>} : vector<32x32xbf16>, vector<32x64xbf16>, vector<32x64xf32> -> vector<32x64xf32>
    %70 = vector.extract_strided_slice %64 {offsets = [32, 0], sizes = [32, 32], strides = [1, 1]} : vector<288x32xf32> to vector<32x32xf32>
    %71 = arith.truncf %70 : vector<32x32xf32> to vector<32x32xbf16>
    %c1_41 = arith.constant 1 : index
    %c0_42 = arith.constant 0 : index
    %c0_43 = arith.constant 0 : index
    %72 = vector.load %arg6[%c1_41, %c0_42, %c0_43] : memref<9x32x64xbf16, #tpu.memory_space<vmem>>, vector<1x32x64xbf16>
    %73 = vector.shape_cast %72 : vector<1x32x64xbf16> to vector<32x64xbf16>
    %cst_44 = arith.constant dense<0.000000e+00> : vector<32x64xf32>
    %74 = tpu.matmul %71, %73, %cst_44 {dimension_numbers = #tpu.dot_dimension_numbers<[1], [0], [0], [1], [0, 0, 1, 1], [], []>} : vector<32x32xbf16>, vector<32x64xbf16>, vector<32x64xf32> -> vector<32x64xf32>
    %75 = arith.addf %69, %74 : vector<32x64xf32>
    %76 = vector.extract_strided_slice %64 {offsets = [64, 0], sizes = [32, 32], strides = [1, 1]} : vector<288x32xf32> to vector<32x32xf32>
    %77 = arith.truncf %76 : vector<32x32xf32> to vector<32x32xbf16>
    %c2_45 = arith.constant 2 : index
    %c0_46 = arith.constant 0 : index
    %c0_47 = arith.constant 0 : index
    %78 = vector.load %arg6[%c2_45, %c0_46, %c0_47] : memref<9x32x64xbf16, #tpu.memory_space<vmem>>, vector<1x32x64xbf16>
    %79 = vector.shape_cast %78 : vector<1x32x64xbf16> to vector<32x64xbf16>
    %cst_48 = arith.constant dense<0.000000e+00> : vector<32x64xf32>
    %80 = tpu.matmul %77, %79, %cst_48 {dimension_numbers = #tpu.dot_dimension_numbers<[1], [0], [0], [1], [0, 0, 1, 1], [], []>} : vector<32x32xbf16>, vector<32x64xbf16>, vector<32x64xf32> -> vector<32x64xf32>
    %81 = arith.addf %75, %80 : vector<32x64xf32>
    %82 = vector.extract_strided_slice %64 {offsets = [96, 0], sizes = [32, 32], strides = [1, 1]} : vector<288x32xf32> to vector<32x32xf32>
    %83 = arith.truncf %82 : vector<32x32xf32> to vector<32x32xbf16>
    %c3_49 = arith.constant 3 : index
    %c0_50 = arith.constant 0 : index
    %c0_51 = arith.constant 0 : index
    %84 = vector.load %arg6[%c3_49, %c0_50, %c0_51] : memref<9x32x64xbf16, #tpu.memory_space<vmem>>, vector<1x32x64xbf16>
    %85 = vector.shape_cast %84 : vector<1x32x64xbf16> to vector<32x64xbf16>
    %cst_52 = arith.constant dense<0.000000e+00> : vector<32x64xf32>
    %86 = tpu.matmul %83, %85, %cst_52 {dimension_numbers = #tpu.dot_dimension_numbers<[1], [0], [0], [1], [0, 0, 1, 1], [], []>} : vector<32x32xbf16>, vector<32x64xbf16>, vector<32x64xf32> -> vector<32x64xf32>
    %87 = arith.addf %81, %86 : vector<32x64xf32>
    %88 = vector.extract_strided_slice %64 {offsets = [128, 0], sizes = [32, 32], strides = [1, 1]} : vector<288x32xf32> to vector<32x32xf32>
    %89 = arith.truncf %88 : vector<32x32xf32> to vector<32x32xbf16>
    %c4_53 = arith.constant 4 : index
    %c0_54 = arith.constant 0 : index
    %c0_55 = arith.constant 0 : index
    %90 = vector.load %arg6[%c4_53, %c0_54, %c0_55] : memref<9x32x64xbf16, #tpu.memory_space<vmem>>, vector<1x32x64xbf16>
    %91 = vector.shape_cast %90 : vector<1x32x64xbf16> to vector<32x64xbf16>
    %cst_56 = arith.constant dense<0.000000e+00> : vector<32x64xf32>
    %92 = tpu.matmul %89, %91, %cst_56 {dimension_numbers = #tpu.dot_dimension_numbers<[1], [0], [0], [1], [0, 0, 1, 1], [], []>} : vector<32x32xbf16>, vector<32x64xbf16>, vector<32x64xf32> -> vector<32x64xf32>
    %93 = arith.addf %87, %92 : vector<32x64xf32>
    %94 = vector.extract_strided_slice %64 {offsets = [160, 0], sizes = [32, 32], strides = [1, 1]} : vector<288x32xf32> to vector<32x32xf32>
    %95 = arith.truncf %94 : vector<32x32xf32> to vector<32x32xbf16>
    %c5_57 = arith.constant 5 : index
    %c0_58 = arith.constant 0 : index
    %c0_59 = arith.constant 0 : index
    %96 = vector.load %arg6[%c5_57, %c0_58, %c0_59] : memref<9x32x64xbf16, #tpu.memory_space<vmem>>, vector<1x32x64xbf16>
    %97 = vector.shape_cast %96 : vector<1x32x64xbf16> to vector<32x64xbf16>
    %cst_60 = arith.constant dense<0.000000e+00> : vector<32x64xf32>
    %98 = tpu.matmul %95, %97, %cst_60 {dimension_numbers = #tpu.dot_dimension_numbers<[1], [0], [0], [1], [0, 0, 1, 1], [], []>} : vector<32x32xbf16>, vector<32x64xbf16>, vector<32x64xf32> -> vector<32x64xf32>
    %99 = arith.addf %93, %98 : vector<32x64xf32>
    %100 = vector.extract_strided_slice %64 {offsets = [192, 0], sizes = [32, 32], strides = [1, 1]} : vector<288x32xf32> to vector<32x32xf32>
    %101 = arith.truncf %100 : vector<32x32xf32> to vector<32x32xbf16>
    %c6_61 = arith.constant 6 : index
    %c0_62 = arith.constant 0 : index
    %c0_63 = arith.constant 0 : index
    %102 = vector.load %arg6[%c6_61, %c0_62, %c0_63] : memref<9x32x64xbf16, #tpu.memory_space<vmem>>, vector<1x32x64xbf16>
    %103 = vector.shape_cast %102 : vector<1x32x64xbf16> to vector<32x64xbf16>
    %cst_64 = arith.constant dense<0.000000e+00> : vector<32x64xf32>
    %104 = tpu.matmul %101, %103, %cst_64 {dimension_numbers = #tpu.dot_dimension_numbers<[1], [0], [0], [1], [0, 0, 1, 1], [], []>} : vector<32x32xbf16>, vector<32x64xbf16>, vector<32x64xf32> -> vector<32x64xf32>
    %105 = arith.addf %99, %104 : vector<32x64xf32>
    %106 = vector.extract_strided_slice %64 {offsets = [224, 0], sizes = [32, 32], strides = [1, 1]} : vector<288x32xf32> to vector<32x32xf32>
    %107 = arith.truncf %106 : vector<32x32xf32> to vector<32x32xbf16>
    %c7_65 = arith.constant 7 : index
    %c0_66 = arith.constant 0 : index
    %c0_67 = arith.constant 0 : index
    %108 = vector.load %arg6[%c7_65, %c0_66, %c0_67] : memref<9x32x64xbf16, #tpu.memory_space<vmem>>, vector<1x32x64xbf16>
    %109 = vector.shape_cast %108 : vector<1x32x64xbf16> to vector<32x64xbf16>
    %cst_68 = arith.constant dense<0.000000e+00> : vector<32x64xf32>
    %110 = tpu.matmul %107, %109, %cst_68 {dimension_numbers = #tpu.dot_dimension_numbers<[1], [0], [0], [1], [0, 0, 1, 1], [], []>} : vector<32x32xbf16>, vector<32x64xbf16>, vector<32x64xf32> -> vector<32x64xf32>
    %111 = arith.addf %105, %110 : vector<32x64xf32>
    %112 = vector.extract_strided_slice %64 {offsets = [256, 0], sizes = [32, 32], strides = [1, 1]} : vector<288x32xf32> to vector<32x32xf32>
    %113 = arith.truncf %112 : vector<32x32xf32> to vector<32x32xbf16>
    %c8_69 = arith.constant 8 : index
    %c0_70 = arith.constant 0 : index
    %c0_71 = arith.constant 0 : index
    %114 = vector.load %arg6[%c8_69, %c0_70, %c0_71] : memref<9x32x64xbf16, #tpu.memory_space<vmem>>, vector<1x32x64xbf16>
    %115 = vector.shape_cast %114 : vector<1x32x64xbf16> to vector<32x64xbf16>
    %cst_72 = arith.constant dense<0.000000e+00> : vector<32x64xf32>
    %116 = tpu.matmul %113, %115, %cst_72 {dimension_numbers = #tpu.dot_dimension_numbers<[1], [0], [0], [1], [0, 0, 1, 1], [], []>} : vector<32x32xbf16>, vector<32x64xbf16>, vector<32x64xf32> -> vector<32x64xf32>
    %117 = arith.addf %111, %116 : vector<32x64xf32>
    %c0_73 = arith.constant 0 : index
    %c0_74 = arith.constant 0 : index
    %118 = vector.load %arg7[%c0_73, %c0_74] : memref<1x64xf32, #tpu.memory_space<vmem>>, vector<1x64xf32>
    %119 = vector.broadcast %118 : vector<1x64xf32> to vector<32x64xf32>
    %120 = arith.addf %117, %119 : vector<32x64xf32>
    %cst_75 = arith.constant 0.000000e+00 : f32
    %121 = vector.broadcast %cst_75 : f32 to vector<32x64xf32>
    %122 = arith.maximumf %120, %121 : vector<32x64xf32>
    %c0_76 = arith.constant 0 : index
    %c0_77 = arith.constant 0 : index
    %123 = vector.load %arg8[%c0_76, %c0_77] : memref<72x32xbf16, #tpu.memory_space<vmem>>, vector<72x32xbf16>
    %124 = arith.truncf %122 : vector<32x64xf32> to vector<32x64xbf16>
    %cst_78 = arith.constant dense<0.000000e+00> : vector<72x64xf32>
    %125 = tpu.matmul %123, %124, %cst_78 {dimension_numbers = #tpu.dot_dimension_numbers<[1], [0], [0], [1], [0, 0, 1, 1], [], []>} : vector<72x32xbf16>, vector<32x64xbf16>, vector<72x64xf32> -> vector<72x64xf32>
    %126 = vector.extract_strided_slice %125 {offsets = [0, 0], sizes = [8, 64], strides = [1, 1]} : vector<72x64xf32> to vector<8x64xf32>
    %127 = arith.truncf %126 : vector<8x64xf32> to vector<8x64xbf16>
    %c0_79 = arith.constant 0 : index
    %c0_80 = arith.constant 0 : index
    %c0_81 = arith.constant 0 : index
    %128 = vector.load %arg9[%c0_79, %c0_80, %c0_81] : memref<9x64x128xbf16, #tpu.memory_space<vmem>>, vector<1x64x128xbf16>
    %129 = vector.shape_cast %128 : vector<1x64x128xbf16> to vector<64x128xbf16>
    %cst_82 = arith.constant dense<0.000000e+00> : vector<8x128xf32>
    %130 = tpu.matmul %127, %129, %cst_82 {dimension_numbers = #tpu.dot_dimension_numbers<[1], [0], [0], [1], [0, 0, 1, 1], [], []>} : vector<8x64xbf16>, vector<64x128xbf16>, vector<8x128xf32> -> vector<8x128xf32>
    %131 = vector.extract_strided_slice %125 {offsets = [8, 0], sizes = [8, 64], strides = [1, 1]} : vector<72x64xf32> to vector<8x64xf32>
    %132 = arith.truncf %131 : vector<8x64xf32> to vector<8x64xbf16>
    %c1_83 = arith.constant 1 : index
    %c0_84 = arith.constant 0 : index
    %c0_85 = arith.constant 0 : index
    %133 = vector.load %arg9[%c1_83, %c0_84, %c0_85] : memref<9x64x128xbf16, #tpu.memory_space<vmem>>, vector<1x64x128xbf16>
    %134 = vector.shape_cast %133 : vector<1x64x128xbf16> to vector<64x128xbf16>
    %cst_86 = arith.constant dense<0.000000e+00> : vector<8x128xf32>
    %135 = tpu.matmul %132, %134, %cst_86 {dimension_numbers = #tpu.dot_dimension_numbers<[1], [0], [0], [1], [0, 0, 1, 1], [], []>} : vector<8x64xbf16>, vector<64x128xbf16>, vector<8x128xf32> -> vector<8x128xf32>
    %136 = arith.addf %130, %135 : vector<8x128xf32>
    %137 = vector.extract_strided_slice %125 {offsets = [16, 0], sizes = [8, 64], strides = [1, 1]} : vector<72x64xf32> to vector<8x64xf32>
    %138 = arith.truncf %137 : vector<8x64xf32> to vector<8x64xbf16>
    %c2_87 = arith.constant 2 : index
    %c0_88 = arith.constant 0 : index
    %c0_89 = arith.constant 0 : index
    %139 = vector.load %arg9[%c2_87, %c0_88, %c0_89] : memref<9x64x128xbf16, #tpu.memory_space<vmem>>, vector<1x64x128xbf16>
    %140 = vector.shape_cast %139 : vector<1x64x128xbf16> to vector<64x128xbf16>
    %cst_90 = arith.constant dense<0.000000e+00> : vector<8x128xf32>
    %141 = tpu.matmul %138, %140, %cst_90 {dimension_numbers = #tpu.dot_dimension_numbers<[1], [0], [0], [1], [0, 0, 1, 1], [], []>} : vector<8x64xbf16>, vector<64x128xbf16>, vector<8x128xf32> -> vector<8x128xf32>
    %142 = arith.addf %136, %141 : vector<8x128xf32>
    %143 = vector.extract_strided_slice %125 {offsets = [24, 0], sizes = [8, 64], strides = [1, 1]} : vector<72x64xf32> to vector<8x64xf32>
    %144 = arith.truncf %143 : vector<8x64xf32> to vector<8x64xbf16>
    %c3_91 = arith.constant 3 : index
    %c0_92 = arith.constant 0 : index
    %c0_93 = arith.constant 0 : index
    %145 = vector.load %arg9[%c3_91, %c0_92, %c0_93] : memref<9x64x128xbf16, #tpu.memory_space<vmem>>, vector<1x64x128xbf16>
    %146 = vector.shape_cast %145 : vector<1x64x128xbf16> to vector<64x128xbf16>
    %cst_94 = arith.constant dense<0.000000e+00> : vector<8x128xf32>
    %147 = tpu.matmul %144, %146, %cst_94 {dimension_numbers = #tpu.dot_dimension_numbers<[1], [0], [0], [1], [0, 0, 1, 1], [], []>} : vector<8x64xbf16>, vector<64x128xbf16>, vector<8x128xf32> -> vector<8x128xf32>
    %148 = arith.addf %142, %147 : vector<8x128xf32>
    %149 = vector.extract_strided_slice %125 {offsets = [32, 0], sizes = [8, 64], strides = [1, 1]} : vector<72x64xf32> to vector<8x64xf32>
    %150 = arith.truncf %149 : vector<8x64xf32> to vector<8x64xbf16>
    %c4_95 = arith.constant 4 : index
    %c0_96 = arith.constant 0 : index
    %c0_97 = arith.constant 0 : index
    %151 = vector.load %arg9[%c4_95, %c0_96, %c0_97] : memref<9x64x128xbf16, #tpu.memory_space<vmem>>, vector<1x64x128xbf16>
    %152 = vector.shape_cast %151 : vector<1x64x128xbf16> to vector<64x128xbf16>
    %cst_98 = arith.constant dense<0.000000e+00> : vector<8x128xf32>
    %153 = tpu.matmul %150, %152, %cst_98 {dimension_numbers = #tpu.dot_dimension_numbers<[1], [0], [0], [1], [0, 0, 1, 1], [], []>} : vector<8x64xbf16>, vector<64x128xbf16>, vector<8x128xf32> -> vector<8x128xf32>
    %154 = arith.addf %148, %153 : vector<8x128xf32>
    %155 = vector.extract_strided_slice %125 {offsets = [40, 0], sizes = [8, 64], strides = [1, 1]} : vector<72x64xf32> to vector<8x64xf32>
    %156 = arith.truncf %155 : vector<8x64xf32> to vector<8x64xbf16>
    %c5_99 = arith.constant 5 : index
    %c0_100 = arith.constant 0 : index
    %c0_101 = arith.constant 0 : index
    %157 = vector.load %arg9[%c5_99, %c0_100, %c0_101] : memref<9x64x128xbf16, #tpu.memory_space<vmem>>, vector<1x64x128xbf16>
    %158 = vector.shape_cast %157 : vector<1x64x128xbf16> to vector<64x128xbf16>
    %cst_102 = arith.constant dense<0.000000e+00> : vector<8x128xf32>
    %159 = tpu.matmul %156, %158, %cst_102 {dimension_numbers = #tpu.dot_dimension_numbers<[1], [0], [0], [1], [0, 0, 1, 1], [], []>} : vector<8x64xbf16>, vector<64x128xbf16>, vector<8x128xf32> -> vector<8x128xf32>
    %160 = arith.addf %154, %159 : vector<8x128xf32>
    %161 = vector.extract_strided_slice %125 {offsets = [48, 0], sizes = [8, 64], strides = [1, 1]} : vector<72x64xf32> to vector<8x64xf32>
    %162 = arith.truncf %161 : vector<8x64xf32> to vector<8x64xbf16>
    %c6_103 = arith.constant 6 : index
    %c0_104 = arith.constant 0 : index
    %c0_105 = arith.constant 0 : index
    %163 = vector.load %arg9[%c6_103, %c0_104, %c0_105] : memref<9x64x128xbf16, #tpu.memory_space<vmem>>, vector<1x64x128xbf16>
    %164 = vector.shape_cast %163 : vector<1x64x128xbf16> to vector<64x128xbf16>
    %cst_106 = arith.constant dense<0.000000e+00> : vector<8x128xf32>
    %165 = tpu.matmul %162, %164, %cst_106 {dimension_numbers = #tpu.dot_dimension_numbers<[1], [0], [0], [1], [0, 0, 1, 1], [], []>} : vector<8x64xbf16>, vector<64x128xbf16>, vector<8x128xf32> -> vector<8x128xf32>
    %166 = arith.addf %160, %165 : vector<8x128xf32>
    %167 = vector.extract_strided_slice %125 {offsets = [56, 0], sizes = [8, 64], strides = [1, 1]} : vector<72x64xf32> to vector<8x64xf32>
    %168 = arith.truncf %167 : vector<8x64xf32> to vector<8x64xbf16>
    %c7_107 = arith.constant 7 : index
    %c0_108 = arith.constant 0 : index
    %c0_109 = arith.constant 0 : index
    %169 = vector.load %arg9[%c7_107, %c0_108, %c0_109] : memref<9x64x128xbf16, #tpu.memory_space<vmem>>, vector<1x64x128xbf16>
    %170 = vector.shape_cast %169 : vector<1x64x128xbf16> to vector<64x128xbf16>
    %cst_110 = arith.constant dense<0.000000e+00> : vector<8x128xf32>
    %171 = tpu.matmul %168, %170, %cst_110 {dimension_numbers = #tpu.dot_dimension_numbers<[1], [0], [0], [1], [0, 0, 1, 1], [], []>} : vector<8x64xbf16>, vector<64x128xbf16>, vector<8x128xf32> -> vector<8x128xf32>
    %172 = arith.addf %166, %171 : vector<8x128xf32>
    %173 = vector.extract_strided_slice %125 {offsets = [64, 0], sizes = [8, 64], strides = [1, 1]} : vector<72x64xf32> to vector<8x64xf32>
    %174 = arith.truncf %173 : vector<8x64xf32> to vector<8x64xbf16>
    %c8_111 = arith.constant 8 : index
    %c0_112 = arith.constant 0 : index
    %c0_113 = arith.constant 0 : index
    %175 = vector.load %arg9[%c8_111, %c0_112, %c0_113] : memref<9x64x128xbf16, #tpu.memory_space<vmem>>, vector<1x64x128xbf16>
    %176 = vector.shape_cast %175 : vector<1x64x128xbf16> to vector<64x128xbf16>
    %cst_114 = arith.constant dense<0.000000e+00> : vector<8x128xf32>
    %177 = tpu.matmul %174, %176, %cst_114 {dimension_numbers = #tpu.dot_dimension_numbers<[1], [0], [0], [1], [0, 0, 1, 1], [], []>} : vector<8x64xbf16>, vector<64x128xbf16>, vector<8x128xf32> -> vector<8x128xf32>
    %178 = arith.addf %172, %177 : vector<8x128xf32>
    %c0_115 = arith.constant 0 : index
    %c0_116 = arith.constant 0 : index
    %179 = vector.load %arg10[%c0_115, %c0_116] : memref<1x128xf32, #tpu.memory_space<vmem>>, vector<1x128xf32>
    %180 = vector.broadcast %179 : vector<1x128xf32> to vector<8x128xf32>
    %181 = arith.addf %178, %180 : vector<8x128xf32>
    %cst_117 = arith.constant 0.000000e+00 : f32
    %182 = vector.broadcast %cst_117 : f32 to vector<8x128xf32>
    %183 = arith.maximumf %181, %182 : vector<8x128xf32>
    %c0_118 = arith.constant 0 : index
    %c0_119 = arith.constant 0 : index
    %184 = vector.load %arg11[%c0_118, %c0_119] : memref<2x8xbf16, #tpu.memory_space<vmem>>, vector<2x8xbf16>
    %185 = arith.truncf %183 : vector<8x128xf32> to vector<8x128xbf16>
    %cst_120 = arith.constant dense<0.000000e+00> : vector<2x128xf32>
    %186 = tpu.matmul %184, %185, %cst_120 {dimension_numbers = #tpu.dot_dimension_numbers<[1], [0], [0], [1], [0, 0, 1, 1], [], []>} : vector<2x8xbf16>, vector<8x128xbf16>, vector<2x128xf32> -> vector<2x128xf32>
    %187 = arith.truncf %186 : vector<2x128xf32> to vector<2x128xbf16>
    %c0_121 = arith.constant 0 : index
    %c0_122 = arith.constant 0 : index
    %188 = vector.load %arg12[%c0_121, %c0_122] : memref<128x512xbf16, #tpu.memory_space<vmem>>, vector<128x512xbf16>
    %cst_123 = arith.constant dense<0.000000e+00> : vector<2x512xf32>
    %189 = tpu.matmul %187, %188, %cst_123 {dimension_numbers = #tpu.dot_dimension_numbers<[1], [0], [0], [1], [0, 0, 1, 1], [], []>} : vector<2x128xbf16>, vector<128x512xbf16>, vector<2x512xf32> -> vector<2x512xf32>
    %c0_124 = arith.constant 0 : index
    %c0_125 = arith.constant 0 : index
    %190 = vector.load %arg13[%c0_124, %c0_125] : memref<1x512xf32, #tpu.memory_space<vmem>>, vector<1x512xf32>
    %191 = vector.broadcast %190 : vector<1x512xf32> to vector<2x512xf32>
    %192 = arith.addf %189, %191 : vector<2x512xf32>
    %cst_126 = arith.constant 0.000000e+00 : f32
    %193 = vector.broadcast %cst_126 : f32 to vector<2x512xf32>
    %194 = arith.maximumf %192, %193 : vector<2x512xf32>
    %195 = arith.truncf %194 : vector<2x512xf32> to vector<2x512xbf16>
    %c0_127 = arith.constant 0 : index
    %c0_128 = arith.constant 0 : index
    %196 = vector.load %arg14[%c0_127, %c0_128] : memref<512x64xbf16, #tpu.memory_space<vmem>>, vector<512x64xbf16>
    %cst_129 = arith.constant dense<0.000000e+00> : vector<2x64xf32>
    %197 = tpu.matmul %195, %196, %cst_129 {dimension_numbers = #tpu.dot_dimension_numbers<[1], [0], [0], [1], [0, 0, 1, 1], [], []>} : vector<2x512xbf16>, vector<512x64xbf16>, vector<2x64xf32> -> vector<2x64xf32>
    %c0_130 = arith.constant 0 : index
    %c0_131 = arith.constant 0 : index
    %198 = vector.load %arg15[%c0_130, %c0_131] : memref<1x64xf32, #tpu.memory_space<vmem>>, vector<1x64xf32>
    %199 = vector.broadcast %198 : vector<1x64xf32> to vector<2x64xf32>
    %200 = arith.addf %197, %199 : vector<2x64xf32>
    %cst_132 = arith.constant 0.000000e+00 : f32
    %201 = vector.broadcast %cst_132 : f32 to vector<2x64xf32>
    %202 = arith.maximumf %200, %201 : vector<2x64xf32>
    %203 = arith.truncf %202 : vector<2x64xf32> to vector<2x64xbf16>
    %c0_133 = arith.constant 0 : index
    %c0_134 = arith.constant 0 : index
    %204 = vector.load %arg16[%c0_133, %c0_134] : memref<64x10xbf16, #tpu.memory_space<vmem>>, vector<64x10xbf16>
    %cst_135 = arith.constant dense<0.000000e+00> : vector<2x10xf32>
    %205 = tpu.matmul %203, %204, %cst_135 {dimension_numbers = #tpu.dot_dimension_numbers<[1], [0], [0], [1], [0, 0, 1, 1], [], []>} : vector<2x64xbf16>, vector<64x10xbf16>, vector<2x10xf32> -> vector<2x10xf32>
    %c0_136 = arith.constant 0 : index
    %c0_137 = arith.constant 0 : index
    %206 = vector.load %arg17[%c0_136, %c0_137] : memref<1x10xf32, #tpu.memory_space<vmem>>, vector<1x10xf32>
    %207 = vector.broadcast %206 : vector<1x10xf32> to vector<2x10xf32>
    %208 = arith.addf %205, %207 : vector<2x10xf32>
    %cst_138 = arith.constant dense<0xFF800000> : vector<2xf32>
    %209 = vector.multi_reduction <maximumf>, %208, %cst_138 [1] : vector<2x10xf32> to vector<2xf32>
    %210 = vector.shape_cast %209 : vector<2xf32> to vector<2x1xf32>
    %211 = vector.broadcast %210 : vector<2x1xf32> to vector<2x10xf32>
    %212 = arith.subf %208, %211 : vector<2x10xf32>
    %213 = math.exp %212 : vector<2x10xf32>
    %cst_139 = arith.constant dense<0.000000e+00> : vector<2xf32>
    %214 = vector.multi_reduction <add>, %213, %cst_139 [1] : vector<2x10xf32> to vector<2xf32>
    %215 = vector.shape_cast %214 : vector<2xf32> to vector<2x1xf32>
    %216 = tpu.reciprocal %215 {approx = true} : vector<2x1xf32> -> vector<2x1xf32>
    %217 = vector.broadcast %216 : vector<2x1xf32> to vector<2x10xf32>
    %218 = arith.mulf %213, %217 : vector<2x10xf32>
    %c0_140 = arith.constant 0 : index
    %c0_141 = arith.constant 0 : index
    %219 = vector.load %arg18[%c0_140, %c0_141] : memref<2x10xf32, #tpu.memory_space<vmem>>, vector<2x10xf32>
    tpu.vector_store %arg18[%c0_140, %c0_141], %218 {strides = array<i32>} : memref<2x10xf32, #tpu.memory_space<vmem>>, vector<2x10xf32>,
    return
  }
  func.func @transform_0(%arg0: i32) -> (i32, i32) {
    %c0_i32 = arith.constant 0 : i32
    %c0_i32_0 = arith.constant 0 : i32
    %c0_i32_1 = arith.constant 0 : i32
    return %c0_i32, %c0_i32_0 : i32, i32
  }
  func.func @transform_1(%arg0: i32) -> (i32, i32) {
    %c0_i32 = arith.constant 0 : i32
    %c0_i32_0 = arith.constant 0 : i32
    %c0_i32_1 = arith.constant 0 : i32
    return %c0_i32, %c0_i32_0 : i32, i32
  }
  func.func @transform_2(%arg0: i32) -> (i32, i32, i32) {
    %c0_i32 = arith.constant 0 : i32
    %c0_i32_0 = arith.constant 0 : i32
    %c0_i32_1 = arith.constant 0 : i32
    %c0_i32_2 = arith.constant 0 : i32
    return %c0_i32, %c0_i32_0, %c0_i32_1 : i32, i32, i32
  }
  func.func @transform_3(%arg0: i32) -> (i32, i32) {
    %c0_i32 = arith.constant 0 : i32
    %c0_i32_0 = arith.constant 0 : i32
    %c0_i32_1 = arith.constant 0 : i32
    return %c0_i32, %c0_i32_0 : i32, i32
  }
  func.func @transform_4(%arg0: i32) -> (i32, i32) {
    %c0_i32 = arith.constant 0 : i32
    %c0_i32_0 = arith.constant 0 : i32
    %c0_i32_1 = arith.constant 0 : i32
    return %c0_i32, %c0_i32_0 : i32, i32
  }
  func.func @transform_5(%arg0: i32) -> (i32, i32, i32) {
    %c0_i32 = arith.constant 0 : i32
    %c0_i32_0 = arith.constant 0 : i32
    %c0_i32_1 = arith.constant 0 : i32
    %c0_i32_2 = arith.constant 0 : i32
    return %c0_i32, %c0_i32_0, %c0_i32_1 : i32, i32, i32
  }
  func.func @transform_6(%arg0: i32) -> (i32, i32) {
    %c0_i32 = arith.constant 0 : i32
    %c0_i32_0 = arith.constant 0 : i32
    %c0_i32_1 = arith.constant 0 : i32
    return %c0_i32, %c0_i32_0 : i32, i32
  }
  func.func @transform_7(%arg0: i32) -> (i32, i32) {
    %c0_i32 = arith.constant 0 : i32
    %c0_i32_0 = arith.constant 0 : i32
    %c0_i32_1 = arith.constant 0 : i32
    return %c0_i32, %c0_i32_0 : i32, i32
  }
  func.func @transform_8(%arg0: i32) -> (i32, i32, i32) {
    %c0_i32 = arith.constant 0 : i32
    %c0_i32_0 = arith.constant 0 : i32
    %c0_i32_1 = arith.constant 0 : i32
    %c0_i32_2 = arith.constant 0 : i32
    return %c0_i32, %c0_i32_0, %c0_i32_1 : i32, i32, i32
  }
  func.func @transform_9(%arg0: i32) -> (i32, i32) {
    %c0_i32 = arith.constant 0 : i32
    %c0_i32_0 = arith.constant 0 : i32
    %c0_i32_1 = arith.constant 0 : i32
    return %c0_i32, %c0_i32_0 : i32, i32
  }
  func.func @transform_10(%arg0: i32) -> (i32, i32) {
    %c0_i32 = arith.constant 0 : i32
    %c0_i32_0 = arith.constant 0 : i32
    %c0_i32_1 = arith.constant 0 : i32
    return %c0_i32, %c0_i32_0 : i32, i32
  }
  func.func @transform_11(%arg0: i32) -> (i32, i32) {
    %c0_i32 = arith.constant 0 : i32
    %c0_i32_0 = arith.constant 0 : i32
    %c0_i32_1 = arith.constant 0 : i32
    return %c0_i32, %c0_i32_0 : i32, i32
  }
  func.func @transform_12(%arg0: i32) -> (i32, i32) {
    %c0_i32 = arith.constant 0 : i32
    %c0_i32_0 = arith.constant 0 : i32
    %c0_i32_1 = arith.constant 0 : i32
    return %c0_i32, %c0_i32_0 : i32, i32
  }
  func.func @transform_13(%arg0: i32) -> (i32, i32) {
    %c0_i32 = arith.constant 0 : i32
    %c0_i32_0 = arith.constant 0 : i32
    %c0_i32_1 = arith.constant 0 : i32
    return %c0_i32, %c0_i32_0 : i32, i32
  }
  func.func @transform_14(%arg0: i32) -> (i32, i32) {
    %c0_i32 = arith.constant 0 : i32
    %c0_i32_0 = arith.constant 0 : i32
    %c0_i32_1 = arith.constant 0 : i32
    return %c0_i32, %c0_i32_0 : i32, i32
  }
  func.func @transform_15(%arg0: i32) -> (i32, i32) {
    %c0_i32 = arith.constant 0 : i32
    %c0_i32_0 = arith.constant 0 : i32
    %c0_i32_1 = arith.constant 0 : i32
    return %c0_i32, %c0_i32_0 : i32, i32
  }
  func.func @transform_16(%arg0: i32) -> (i32, i32) {
    %c0_i32 = arith.constant 0 : i32
    %c0_i32_0 = arith.constant 0 : i32
    %c0_i32_1 = arith.constant 0 : i32
    return %c0_i32, %c0_i32_0 : i32, i32
  }
  func.func @transform_17(%arg0: i32) -> (i32, i32) {
    %c0_i32 = arith.constant 0 : i32
    %c0_i32_0 = arith.constant 0 : i32
    %c0_i32_1 = arith.constant 0 : i32
    return %c0_i32, %c0_i32_0 : i32, i32
  }
}

</mosaic_0001>

<bundles_post_ra>
// kernel: model_forward.1
= control target key start
LH: loop header
LB: loop body
LE: loop exit
PB: predicated region body
PF: predicated region fallthrough
CT: control target
= control target key end

     0   :  { %s10912_s0 = inlined_call_operand.vmem [shape: f32[512,3], index: 0, kind: input, shape index: {}]   ;;  %s10913_s1 = inlined_call_operand.hbm [shape: bf16[1152,512], index: 1, kind: input, shape index: {}]   ;;  %s10914_s2 = inlined_call_operand.hbm [shape: bf16[9,3,32], index: 2, kind: input, shape index: {}]   ;;  %s10915_s3 = inlined_call_operand.hbm [shape: f32[1,32], index: 3, kind: input, shape index: {}]   ;;  %s10916_s4 = inlined_call_operand.hbm [shape: bf16[288,128], index: 4, kind: input, shape index: {}]   ;;  %s10917_s5 = inlined_call_operand.hbm [shape: bf16[9,32,64], index: 5, kind: input, shape index: {}]   ;;  %s10918_s6 = inlined_call_operand.hbm [shape: f32[1,64], index: 6, kind: input, shape index: {}]   ;;  %s10919_s7 = inlined_call_operand.vmem [shape: bf16[72,32], index: 7, kind: input, shape index: {}]   ;;  %s10920_s8 = inlined_call_operand.hbm [shape: bf16[9,64,128], index: 8, kind: input, shape index: {}]   ;;  %s10921_s9 = inlined_call_operand.hbm [shape: f32[1,128], index: 9, kind: input, shape index: {}]   ;;  %s10922_s10 = inlined_call_operand.hbm [shape: bf16[2,8], index: 10, kind: input, shape index: {}]   ;;  %s10923_s11 = inlined_call_operand.hbm [shape: bf16[128,512], index: 11, kind: input, shape index: {}]   ;;  %s10924_s12 = inlined_call_operand.hbm [shape: f32[1,512], index: 12, kind: input, shape index: {}]   ;;  %s10925_s13 = inlined_call_operand.vmem [shape: bf16[512,64], index: 13, kind: input, shape index: {}]   ;;  %s10926_s14 = inlined_call_operand.hbm [shape: f32[1,64], index: 14, kind: input, shape index: {}]   ;;  %s10927_s15 = inlined_call_operand.vmem [shape: bf16[64,10], index: 15, kind: input, shape index: {}]   ;;  %s10928_s16 = inlined_call_operand.hbm [shape: f32[1,10], index: 16, kind: input, shape index: {}]   ;;  %s10929_s17 = inlined_call_operand.hbm [shape: f32[2,10], index: 17, kind: output, shape index: {}]  }
   0x1   :  { %10981 = sst [smem:[#allocation80_spill]] %s10912_s0 }
   0x2   :  { %10982 = sst [smem:[#allocation81_spill]] %s10913_s1 }
   0x3   :  { %22 = vsyncpa [#allocation3], 0 }
   0x4   :  { %23 = vsyncpa [#allocation6], 0 }
   0x5   :  { %24 = vsyncpa [#allocation9], 0 }
   0x6   :  { %25 = vsyncpa [#allocation12], 0 }
   0x7   :  { %26 = vsyncpa [#allocation15], 0 }
   0x8   :  { %27 = vsyncpa [#allocation18], 0 }
   0x9   :  { %28 = vsyncpa [#allocation21], 0 }
   0xa   :  { %29 = vsyncpa [#allocation4], 0  ;;  %s9450_s24 = smov [#allocation5]  }
   0xb   :  { %s49_s25 = sshll.u32 %s9450_s24, 4  ;;  %s50_s25 = int_to_ptr.vmem [resolvable:$true] %s49_s25 }
   0xc   :  { %s9162_s26 = scalar_lea.vmem %s50_s25, 288  ;;  %p9167_p1 = scmp.lt.s32.totalorder %s50_s25, %s50_s25 }
   0xd   :  { %p9163_p0 = scmp.ne.s32.totalorder %s50_s25, %s9162_s26  ;;  %p9168_p2 = scmp.lt.s32.totalorder %s9162_s26, %s9162_s26 }
   0xf   :  { %p9169_p3 = por %p9168_p2, %p9167_p1 }
  0x11   :  { %p9170_p4 = pnand %p9169_p3, %p9163_p0 }
  0x13   :  { %9173 = shalt.err (!%p9170_p4)
}
  0x14   :  { %s9451_s27 = smov 32   ;;  %s9452_s28 = smov 2  }
  0x15   :  { %55 = dma.hbm_to_vmem [thread:$0]  %s10914_s2, 288, %s50_s25, [#allocation6], %s9451_s27, %s9451_s27, %s9452_s28  }
  0x16   :  { %s9453_s30 = smov [#allocation8]  }
  0x17   :  { %s71_s18 = sshll.u32 %s9453_s30, 4  ;;  %s72_s18 = int_to_ptr.vmem [resolvable:$true] %s71_s18 }
  0x18   :  { %s9182_s19 = scalar_lea.vmem %s72_s18, 2304  ;;  %p9187_p6 = scmp.lt.s32.totalorder %s72_s18, %s72_s18 }
  0x19   :  { %p9183_p5 = scmp.ne.s32.totalorder %s72_s18, %s9182_s19  ;;  %p9188_p7 = scmp.lt.s32.totalorder %s9182_s19, %s9182_s19 }
  0x1b   :  { %p9189_p8 = por %p9188_p7, %p9187_p6 }
  0x1d   :  { %p9190_p9 = pnand %p9189_p8, %p9183_p5 }
  0x1f   :  { %9193 = shalt.err (!%p9190_p9)
}
  0x20   :  { %s9454_s1 = smov 64   ;;  %s9455_s20 = smov 4  }
  0x21   :  { %77 = dma.hbm_to_vmem [thread:$0]  %s10916_s4, 2304, %s72_s18, [#allocation9], %s9454_s1, %s9454_s1, %s9455_s20  }
  0x22   :  { %s9456_s2 = smov [#allocation11]   ;;  %s9457_s24 = smov [#allocation14]  }
  0x23   :  { %s96_s23 = sshll.u32 %s9456_s2, 4  ;;  %s120_s25 = sshll.u32 %s9457_s24, 4  ;;  %s97_s23 = int_to_ptr.vmem [resolvable:$true] %s96_s23  ;;  %s121_s25 = int_to_ptr.vmem [resolvable:$true] %s120_s25 }
  0x24   :  { %s9202_s26 = scalar_lea.vmem %s97_s23, 16  ;;  %s9206_s27 = scalar_lea.vmem %s97_s23, 32 }
  0x25   :  { %p9203_p10 = scmp.ne.s32.totalorder %s97_s23, %s9202_s26  ;;  %p9207_p11 = scmp.lt.s32.totalorder %s97_s23, %s97_s23 }
  0x26   :  { %p9208_p12 = scmp.lt.s32.totalorder %s9206_s27, %s9202_s26 }
  0x28   :  { %p9209_p13 = por %p9208_p12, %p9207_p11 }
  0x2a   :  { %p9210_p0 = pnand %p9209_p13, %p9203_p10 }
  0x2c   :  { %9213 = shalt.err (!%p9210_p0)
}
  0x2d   :  { %99 = dma.hbm_to_vmem [thread:$0]  %s10918_s6, 16, %s97_s23, [#allocation12]  }
  0x2e   :  { %s9222_s0 = scalar_lea.vmem %s121_s25, 16  ;;  %s9226_s4 = scalar_lea.vmem %s121_s25, 32 }
  0x2f   :  { %p9223_p1 = scmp.ne.s32.totalorder %s121_s25, %s9222_s0  ;;  %p9227_p2 = scmp.lt.s32.totalorder %s121_s25, %s121_s25 }
  0x30   :  { %p9228_p3 = scmp.lt.s32.totalorder %s9226_s4, %s9222_s0 }
  0x32   :  { %p9229_p4 = por %p9228_p3, %p9227_p2 }
  0x34   :  { %p9230_p5 = pnand %p9229_p4, %p9223_p1 }
  0x36   :  { %9233 = shalt.err (!%p9230_p5)
}
  0x37   :  { %123 = dma.hbm_to_vmem [thread:$0]  %s10921_s9, 16, %s121_s25, [#allocation15]  }
  0x38   :  { %s9458_s19 = smov [#allocation17]   ;;  %s9459_s22 = smov [#allocation20]  }
  0x39   :  { %s139_s21 = sshll.u32 %s9458_s19, 4  ;;  %s164_s2 = sshll.u32 %s9459_s22, 4  ;;  %s140_s21 = int_to_ptr.vmem [resolvable:$true] %s139_s21  ;;  %s165_s2 = int_to_ptr.vmem [resolvable:$true] %s164_s2 }
  0x3a   :  { %s9242_s24 = scalar_lea.vmem %s140_s21, 4096  ;;  %p9247_p7 = scmp.lt.s32.totalorder %s140_s21, %s140_s21 }
  0x3b   :  { %p9243_p6 = scmp.ne.s32.totalorder %s140_s21, %s9242_s24  ;;  %p9248_p8 = scmp.lt.s32.totalorder %s9242_s24, %s9242_s24 }
  0x3d   :  { %p9249_p9 = por %p9248_p8, %p9247_p7 }
  0x3f   :  { %p9250_p10 = pnand %p9249_p9, %p9243_p6 }
  0x41   :  { %9253 = shalt.err (!%p9250_p10)
}
  0x42   :  { %s9460_s6 = smov 256   ;;  %s9461_s23 = smov 16  }
  0x43   :  { %145 = dma.hbm_to_vmem [thread:$0]  %s10923_s11, 4096, %s140_s21, [#allocation18], %s9460_s6, %s9460_s6, %s9461_s23  }
  0x44   :  { %s9262_s9 = scalar_lea.vmem %s165_s2, 16  ;;  %s9266_s25 = scalar_lea.vmem %s165_s2, 32 }
  0x45   :  { %p9263_p11 = scmp.ne.s32.totalorder %s165_s2, %s9262_s9  ;;  %p9267_p12 = scmp.lt.s32.totalorder %s165_s2, %s165_s2 }
  0x46   :  { %p9268_p13 = scmp.lt.s32.totalorder %s9266_s25, %s9262_s9 }
  0x48   :  { %p9269_p0 = por %p9268_p13, %p9267_p12 }
  0x4a   :  { %p9270_p1 = pnand %p9269_p0, %p9263_p11 }
  0x4c   :  { %9273 = shalt.err (!%p9270_p1)
}
  0x4d   :  { %167 = dma.hbm_to_vmem [thread:$0]  %s10926_s14, 16, %s165_s2, [#allocation21]  }
  0x4e   :  { %s9462_s0 = smov [#allocation2]   ;;  %s9463_s30 = smov [#allocation7]  }
  0x4f   :  { %s37_s4 = sshll.u32 %s9462_s0, 4  ;;  %s62_s18 = sshll.u32 %s9463_s30, 4  ;;  %s38_s4 = int_to_ptr.vmem [resolvable:$true] %s37_s4  ;;  %s63_s18 = int_to_ptr.vmem [resolvable:$true] %s62_s18 }
  0x50   :  { %s9282_s19 = scalar_lea.vmem %s38_s4, 36864  ;;  %p9287_p3 = scmp.lt.s32.totalorder %s38_s4, %s38_s4 }
  0x51   :  { %p9283_p2 = scmp.ne.s32.totalorder %s38_s4, %s9282_s19  ;;  %p9288_p4 = scmp.lt.s32.totalorder %s9282_s19, %s9282_s19 }
  0x53   :  { %p9289_p5 = por %p9288_p4, %p9287_p3 }
  0x55   :  { %p9290_p6 = pnand %p9289_p5, %p9283_p2 }
  0x57   :  { %9293 = shalt.err (!%p9290_p6)
}
  0x58   :  { %s10983_s22 = sld [smem:[#allocation81_spill]]  ;;  %s9302_s24 = scalar_lea.vmem %s63_s18, 16 }
  0x59   :  { %p9303_p7 = scmp.ne.s32.totalorder %s63_s18, %s9302_s24  ;;  %s9306_s14 = scalar_lea.vmem %s63_s18, 32 }
  0x5a   :  { %p9307_p8 = scmp.lt.s32.totalorder %s63_s18, %s63_s18  ;;  %p9308_p9 = scmp.lt.s32.totalorder %s9306_s14, %s9302_s24 }
  0x5c   :  { %p9309_p10 = por %p9308_p9, %p9307_p8 }
  0x5e   :  { %43 = dma.hbm_to_vmem [thread:$0]  %s10983_s22, 36864, %s38_s4, [#allocation3], %s9460_s6, %s9460_s6, %s9461_s23  }
  0x5f   :  { %p9310_p11 = pnand %p9309_p10, %p9303_p7 }
  0x61   :  { %9313 = shalt.err (!%p9310_p11)
}
  0x62   :  { %65 = dma.hbm_to_vmem [thread:$0]  %s10915_s3, 16, %s63_s18, [#allocation6]  }
  0x63   :  { %s9464_s27 = smov [#allocation10]   ;;  %s9465_s25 = smov [#allocation13]  }
  0x64   :  { %s83_s9 = sshll.u32 %s9464_s27, 4  ;;  %s107_s28 = sshll.u32 %s9465_s25, 4  ;;  %s84_s9 = int_to_ptr.vmem [resolvable:$true] %s83_s9  ;;  %s108_s28 = int_to_ptr.vmem [resolvable:$true] %s107_s28 }
  0x65   :  { %s9322_s29 = scalar_lea.vmem %s84_s9, 2304  ;;  %p9327_p13 = scmp.lt.s32.totalorder %s84_s9, %s84_s9 }
  0x66   :  { %p9323_p12 = scmp.ne.s32.totalorder %s84_s9, %s9322_s29  ;;  %p9328_p0 = scmp.lt.s32.totalorder %s9322_s29, %s9322_s29 }
  0x68   :  { %p9329_p1 = por %p9328_p0, %p9327_p13 }
  0x6a   :  { %p9330_p2 = pnand %p9329_p1, %p9323_p12 }
  0x6c   :  { %9333 = shalt.err (!%p9330_p2)
}
  0x6d   :  { %89 = dma.hbm_to_vmem [thread:$0]  %s10917_s5, 2304, %s84_s9, [#allocation9], %s9454_s1, %s9454_s1, %s9455_s20  }
  0x6e   :  { %s9342_s3 = scalar_lea.vmem %s108_s28, 4608  ;;  %p9347_p4 = scmp.lt.s32.totalorder %s108_s28, %s108_s28 }
  0x6f   :  { %p9343_p3 = scmp.ne.s32.totalorder %s108_s28, %s9342_s3  ;;  %p9348_p5 = scmp.lt.s32.totalorder %s9342_s3, %s9342_s3 }
  0x71   :  { %p9349_p6 = por %p9348_p5, %p9347_p4 }
  0x73   :  { %p9350_p7 = pnand %p9349_p6, %p9343_p3 }
  0x75   :  { %9353 = shalt.err (!%p9350_p7)
}
  0x76   :  { %113 = dma.hbm_to_vmem [thread:$0]  %s10920_s8, 4608, %s108_s28, [#allocation12], %s9454_s1, %s9454_s1, %s9455_s20  }
  0x77   :  { %s9466_s30 = smov [#allocation16]   ;;  %s9467_s19 = smov [#allocation19]  }
  0x78   :  { %s130_s18 = sshll.u32 %s9466_s30, 4  ;;  %s152_s11 = sshll.u32 %s9467_s19, 4  ;;  %s131_s18 = int_to_ptr.vmem [resolvable:$true] %s130_s18  ;;  %s153_s11 = int_to_ptr.vmem [resolvable:$true] %s152_s11 }
  0x79   :  { %s9362_s5 = scalar_lea.vmem %s131_s18, 16  ;;  %s9366_s21 = scalar_lea.vmem %s131_s18, 32 }
  0x7a   :  { %p9363_p8 = scmp.ne.s32.totalorder %s131_s18, %s9362_s5  ;;  %p9367_p9 = scmp.lt.s32.totalorder %s131_s18, %s131_s18 }
  0x7b   :  { %p9368_p10 = scmp.lt.s32.totalorder %s9366_s21, %s9362_s5 }
  0x7d   :  { %p9369_p11 = por %p9368_p10, %p9367_p9 }
  0x7f   :  { %p9370_p12 = pnand %p9369_p11, %p9363_p8 }
  0x81   :  { %9373 = shalt.err (!%p9370_p12)
}
  0x82   :  { %133 = dma.hbm_to_vmem [thread:$0]  %s10922_s10, 16, %s131_s18, [#allocation15]  }
  0x83   :  { %s9382_s14 = scalar_lea.vmem %s153_s11, 64  ;;  %p9387_p0 = scmp.lt.s32.totalorder %s153_s11, %s153_s11 }
  0x84   :  { %p9383_p13 = scmp.ne.s32.totalorder %s153_s11, %s9382_s14  ;;  %p9388_p1 = scmp.lt.s32.totalorder %s9382_s14, %s9382_s14 }
  0x86   :  { %p9389_p2 = por %p9388_p1, %p9387_p0 }
  0x88   :  { %p9390_p3 = pnand %p9389_p2, %p9383_p13 }
  0x8a   :  { %9393 = shalt.err (!%p9390_p3)
}
  0x8b   :  { %155 = dma.hbm_to_vmem [thread:$0]  %s10924_s12, 64, %s153_s11, [#allocation18]  }
  0x8c   :  { %s9468_s20 = smov [#allocation22]  }
  0x8d   :  { %s176_s2 = sshll.u32 %s9468_s20, 4  ;;  %s177_s2 = int_to_ptr.vmem [resolvable:$true] %s176_s2 }
  0x8e   :  { %s9402_s26 = scalar_lea.vmem %s177_s2, 16  ;;  %s9406_s27 = scalar_lea.vmem %s177_s2, 32 }
  0x8f   :  { %p9403_p4 = scmp.ne.s32.totalorder %s177_s2, %s9402_s26  ;;  %p9407_p5 = scmp.lt.s32.totalorder %s177_s2, %s177_s2 }
  0x90   :  { %p9408_p6 = scmp.lt.s32.totalorder %s9406_s27, %s9402_s26 }
  0x92   :  { %p9409_p7 = por %p9408_p6, %p9407_p5 }
  0x94   :  { %p9410_p8 = pnand %p9409_p7, %p9403_p4 }
  0x96   :  { %9413 = shalt.err (!%p9410_p8)
}
  0x97   :  { %179 = dma.hbm_to_vmem [thread:$0]  %s10928_s16, 16, %s177_s2, [#allocation21]  }
  0x98   :  { %9434 = dma.done.wait [#allocation3], 36864  }
  0x99   :  { %9435 = vsyncadd [#allocation3], 4294930432 }
  0x9a   :  { %9436 = dma.done.wait [#allocation6], 304  }
  0x9b   :  { %9437 = vsyncadd [#allocation6], 4294966992 }
  0x9c   :  { %9438 = dma.done.wait [#allocation9], 4608  }
  0x9d   :  { %9439 = vsyncadd [#allocation9], 4294962688 }
  0x9e   :  { %9440 = dma.done.wait [#allocation12], 4624  }
  0x9f   :  { %9441 = vsyncadd [#allocation12], 4294962672 }
  0xa0   :  { %9442 = dma.done.wait [#allocation15], 32  }
  0xa1   :  { %9443 = vsyncadd [#allocation15], 4294967264 }
  0xa2   :  { %9444 = dma.done.wait [#allocation18], 4160  }
  0xa3   :  { %9445 = vsyncadd [#allocation18], 4294963136 }
  0xa4   :  { %9446 = dma.done.wait [#allocation21], 32  }
  0xa5   :  { %9447 = vsyncadd [#allocation21], 4294967264  ;;  %v10931_v0 = vmov 0   ;;  %s10984_s25 = sld [smem:[#allocation80_spill]]  ;;  %v8559_v42 = vld [vmem:[#allocation2 + $0x4] ss:$16 sps:$4 sm:$0xff]  }
  0xa6   :  { %2044 = vmatprep.subr.bf16.mxu0 %v10931_v0  ;;  %2653 = vmatprep.subr.bf16.mxu1 %v10931_v0  ;;  %v8562_v45 = vld [vmem:[#allocation2 + $0xc] ss:$16 sps:$4 sm:$0xff]   ;;  %vm3306_vm0 = vcmask 1040384   ;;  %vm3307_vm1 = vcmask 1041408   ;;  %vm3281_vm2 = vcmask 23552   ;;  %vm4977_vm3 = vcmask 261120  }
  0xa7   :  { %2076 = vmatprep.mubr.bf16.mxu0 %v8559_v42  ;;  %2685 = vmatprep.mubr.bf16.mxu1 %v8562_v45  ;;  %v8557_v42 = vld [vmem:[#allocation2] ss:$16 sps:$4 sm:$0xff]   ;;  %v8563_v45 = vld [vmem:[#allocation2 + $0x24] ss:$16 sps:$4 sm:$0xff]   ;;  %vm9472_vm4 = vmmov 0   ;;  %vm5825_vm5 = vcmask 523264  }
  0xa8   :  { %vm6497_vm6 = vcmask 1043456   ;;  %vm6493_vm7 = vcmask 64512   ;;  %vm7273_vm8 = vcmask 74752  }
  0xab   :  { %v234_v1 = vld [vmem:[%s10984_s25 + $0x70] sm:$0xff]  ;;  %v235_v2 = vld [vmem:[%s10984_s25 + $0x78] sm:$0xff]  ;;  %v232_v6 = vld [vmem:[%s10984_s25 + $0x60] sm:$0xff] }
  0xac   :  { %v266_v3 = vld [vmem:[%s10984_s25 + $0x170] sm:$0xff]  ;;  %v579_v4 = vpack.c.bf16 %v235_v2, %v234_v1  ;;  %v267_v5 = vld [vmem:[%s10984_s25 + $0x178] sm:$0xff]  ;;  %v233_v7 = vld [vmem:[%s10984_s25 + $0x68] sm:$0xff] }
  0xad   :  { %v595_v8 = vpack.c.bf16 %v267_v5, %v266_v3  ;;  %v264_v9 = vld [vmem:[%s10984_s25 + $0x160] sm:$0xff]  ;;  %v265_v10 = vld [vmem:[%s10984_s25 + $0x168] sm:$0xff]  ;;  %v578_v11 = vpack.c.bf16 %v233_v7, %v232_v6  ;;  %v230_v13 = vld [vmem:[%s10984_s25 + $0x50] sm:$0xff] }
  0xae   :  { %2045 = vmatpush1.bf16.msra.mxu0 %v579_v4  ;;  %v594_v12 = vpack.c.bf16 %v265_v10, %v264_v9  ;;  %v231_v14 = vld [vmem:[%s10984_s25 + $0x58] sm:$0xff]  ;;  %v262_v15 = vld [vmem:[%s10984_s25 + $0x150] sm:$0xff]  ;;  %v228_v19 = vld [vmem:[%s10984_s25 + $0x40] sm:$0xff] }
  0xaf   :  { %2654 = vmatpush1.bf16.msra.mxu1 %v595_v8  ;;  %2046 = vmatprep.subr.bf16.mxu0 %v10931_v0  ;;  %v263_v16 = vld [vmem:[%s10984_s25 + $0x158] sm:$0xff]  ;;  %v577_v17 = vpack.c.bf16 %v231_v14, %v230_v13  ;;  %v229_v20 = vld [vmem:[%s10984_s25 + $0x48] sm:$0xff]  ;;  %v260_v21 = vld [vmem:[%s10984_s25 + $0x140] sm:$0xff] }
  0xb0   :  { %2655 = vmatprep.subr.bf16.mxu1 %v10931_v0  ;;  %v593_v18 = vpack.c.bf16 %v263_v16, %v262_v15  ;;  %v261_v22 = vld [vmem:[%s10984_s25 + $0x148] sm:$0xff]  ;;  %v576_v23 = vpack.c.bf16 %v229_v20, %v228_v19  ;;  %v226_v25 = vld [vmem:[%s10984_s25 + $0x30] sm:$0xff]  ;;  %v227_v26 = vld [vmem:[%s10984_s25 + $0x38] sm:$0xff] }
  0xb1   :  { %v592_v24 = vpack.c.bf16 %v261_v22, %v260_v21  ;;  %v258_v27 = vld [vmem:[%s10984_s25 + $0x130] sm:$0xff]  ;;  %v259_v28 = vld [vmem:[%s10984_s25 + $0x138] sm:$0xff]  ;;  %v575_v29 = vpack.c.bf16 %v227_v26, %v226_v25  ;;  %v224_v31 = vld [vmem:[%s10984_s25 + $0x20] sm:$0xff] }
  0xb2   :  { %2047 = vmatpush1.bf16.msra.mxu0 %v578_v11  ;;  %v591_v30 = vpack.c.bf16 %v259_v28, %v258_v27  ;;  %v225_v32 = vld [vmem:[%s10984_s25 + $0x28] sm:$0xff]  ;;  %v256_v33 = vld [vmem:[%s10984_s25 + $0x120] sm:$0xff]  ;;  %v222_v37 = vld [vmem:[%s10984_s25 + $0x10] sm:$0xff] }
  0xb3   :  { %2656 = vmatpush1.bf16.msra.mxu1 %v594_v12  ;;  %2048 = vmatprep.subr.bf16.mxu0 %v10931_v0  ;;  %v257_v34 = vld [vmem:[%s10984_s25 + $0x128] sm:$0xff]  ;;  %v574_v35 = vpack.c.bf16 %v225_v32, %v224_v31  ;;  %v223_v38 = vld [vmem:[%s10984_s25 + $0x18] sm:$0xff]  ;;  %v254_v39 = vld [vmem:[%s10984_s25 + $0x110] sm:$0xff] }
  0xb4   :  { %2657 = vmatprep.subr.bf16.mxu1 %v10931_v0  ;;  %v590_v36 = vpack.c.bf16 %v257_v34, %v256_v33  ;;  %v255_v40 = vld [vmem:[%s10984_s25 + $0x118] sm:$0xff]  ;;  %v220_v41 = vld [vmem:[%s10984_s25] sm:$0xff]  ;;  %v573_v43 = vpack.c.bf16 %v223_v38, %v222_v37  ;;  %v221_v44 = vld [vmem:[%s10984_s25 + $0x8] sm:$0xff] }
  0xb5   :  { %v589_v46 = vpack.c.bf16 %v255_v40, %v254_v39  ;;  %v252_v47 = vld [vmem:[%s10984_s25 + $0x100] sm:$0xff]  ;;  %v253_v48 = vld [vmem:[%s10984_s25 + $0x108] sm:$0xff]  ;;  %v572_v49 = vpack.c.bf16 %v221_v44, %v220_v41  ;;  %v250_v50 = vld [vmem:[%s10984_s25 + $0xf0] sm:$0xff] }
  0xb6   :  { %2049 = vmatpush1.bf16.msra.mxu0 %v577_v17  ;;  %v588_v51 = vpack.c.bf16 %v253_v48, %v252_v47  ;;  %v251_v52 = vld [vmem:[%s10984_s25 + $0xf8] sm:$0xff]  ;;  %v282_v53 = vld [vmem:[%s10984_s25 + $0x1f0] sm:$0xff]  ;;  %v248_v56 = vld [vmem:[%s10984_s25 + $0xe0] sm:$0xff] }
  0xb7   :  { %2658 = vmatpush1.bf16.msra.mxu1 %v593_v18  ;;  %2050 = vmatprep.subr.bf16.mxu0 %v10931_v0  ;;  %v283_v54 = vld [vmem:[%s10984_s25 + $0x1f8] sm:$0xff]  ;;  %v587_v55 = vpack.c.bf16 %v251_v52, %v250_v50  ;;  %v249_v57 = vld [vmem:[%s10984_s25 + $0xe8] sm:$0xff]  ;;  %v280_v59 = vld [vmem:[%s10984_s25 + $0x1e0] sm:$0xff] }
  0xb8   :  { %2659 = vmatprep.subr.bf16.mxu1 %v10931_v0  ;;  %v603_v58 = vpack.c.bf16 %v283_v54, %v282_v53  ;;  %v281_v60 = vld [vmem:[%s10984_s25 + $0x1e8] sm:$0xff]  ;;  %v586_v61 = vpack.c.bf16 %v249_v57, %v248_v56  ;;  %v246_v63 = vld [vmem:[%s10984_s25 + $0xd0] sm:$0xff]  ;;  %v247_v1 = vld [vmem:[%s10984_s25 + $0xd8] sm:$0xff] }
  0xb9   :  { %v602_v62 = vpack.c.bf16 %v281_v60, %v280_v59  ;;  %v278_v2 = vld [vmem:[%s10984_s25 + $0x1d0] sm:$0xff]  ;;  %v279_v3 = vld [vmem:[%s10984_s25 + $0x1d8] sm:$0xff]  ;;  %v585_v4 = vpack.c.bf16 %v247_v1, %v246_v63  ;;  %v244_v5 = vld [vmem:[%s10984_s25 + $0xc0] sm:$0xff] }
  0xba   :  { %2051 = vmatpush1.bf16.msra.mxu0 %v576_v23  ;;  %v245_v6 = vld [vmem:[%s10984_s25 + $0xc8] sm:$0xff]  ;;  %v601_v7 = vpack.c.bf16 %v279_v3, %v278_v2  ;;  %v276_v8 = vld [vmem:[%s10984_s25 + $0x1c0] sm:$0xff]  ;;  %v242_v11 = vld [vmem:[%s10984_s25 + $0xb0] sm:$0xff] }
  0xbb   :  { %2660 = vmatpush1.bf16.msra.mxu1 %v592_v24  ;;  %2052 = vmatprep.subr.bf16.mxu0 %v10931_v0  ;;  %v277_v9 = vld [vmem:[%s10984_s25 + $0x1c8] sm:$0xff]  ;;  %v584_v10 = vpack.c.bf16 %v245_v6, %v244_v5  ;;  %v243_v13 = vld [vmem:[%s10984_s25 + $0xb8] sm:$0xff]  ;;  %v274_v14 = vld [vmem:[%s10984_s25 + $0x1b0] sm:$0xff] }
  0xbc   :  { %2661 = vmatprep.subr.bf16.mxu1 %v10931_v0  ;;  %v600_v12 = vpack.c.bf16 %v277_v9, %v276_v8  ;;  %v275_v15 = vld [vmem:[%s10984_s25 + $0x1b8] sm:$0xff]  ;;  %v583_v16 = vpack.c.bf16 %v243_v13, %v242_v11  ;;  %v240_v17 = vld [vmem:[%s10984_s25 + $0xa0] sm:$0xff]  ;;  %v241_v19 = vld [vmem:[%s10984_s25 + $0xa8] sm:$0xff] }
  0xbd   :  { %v599_v18 = vpack.c.bf16 %v275_v15, %v274_v14  ;;  %v272_v20 = vld [vmem:[%s10984_s25 + $0x1a0] sm:$0xff]  ;;  %v273_v21 = vld [vmem:[%s10984_s25 + $0x1a8] sm:$0xff]  ;;  %v582_v22 = vpack.c.bf16 %v241_v19, %v240_v17  ;;  %v238_v23 = vld [vmem:[%s10984_s25 + $0x90] sm:$0xff] }
  0xbe   :  { %2053 = vmatpush1.bf16.msra.mxu0 %v575_v29  ;;  %v598_v24 = vpack.c.bf16 %v273_v21, %v272_v20  ;;  %v239_v25 = vld [vmem:[%s10984_s25 + $0x98] sm:$0xff]  ;;  %v270_v26 = vld [vmem:[%s10984_s25 + $0x190] sm:$0xff]  ;;  %v236_v28 = vld [vmem:[%s10984_s25 + $0x80] sm:$0xff]  ;;  %v9470_v29 = vmov 65535  }
  0xbf   :  { %2662 = vmatpush1.bf16.msra.mxu1 %v591_v30  ;;  %2054 = vmatprep.subr.bf16.mxu0 %v10931_v0  ;;  %v271_v27 = vld [vmem:[%s10984_s25 + $0x198] sm:$0xff]  ;;  %v3308_v30 = vsel %vm3306_vm0, 4294967295, %v9470_v29  ;;  %v581_v31 = vpack.c.bf16 %v239_v25, %v238_v23  ;;  %v237_v32 = vld [vmem:[%s10984_s25 + $0x88] sm:$0xff]  ;;  %v268_v34 = vld [vmem:[%s10984_s25 + $0x180] sm:$0xff] }
  0xc0   :  { %2663 = vmatprep.subr.bf16.mxu1 %v10931_v0  ;;  %v597_v33 = vpack.c.bf16 %v271_v27, %v270_v26  ;;  %v9834_v37 = vsel %vm3307_vm1, %v3308_v30, 0  ;;  %v3270_v38 = vld [vmem:[#allocation5] sm:$0x3]  ;;  %v580_v39 = vpack.c.bf16 %v237_v32, %v236_v28  ;;  %v8560_v44 = vld [vmem:[#allocation2 + $0x8] ss:$16 sps:$4 sm:$0xff]  }
  0xc1   :  { %v8567_v47 = vld [vmem:[#allocation2 + $0x20] ss:$16 sps:$4 sm:$0xff]   ;;  %v8568_v48 = vld [vmem:[#allocation2 + $0x28] ss:$16 sps:$4 sm:$0xff]   ;;  %v8571_v50 = vld [vmem:[#allocation2 + $0x4c] ss:$16 sps:$4 sm:$0xff]  }
  0xc2   :  { %2055 = vmatpush1.bf16.msra.mxu0 %v574_v35  ;;  %v269_v35 = vld [vmem:[%s10984_s25 + $0x188] sm:$0xff]  ;;  %v8575_v53 = vld [vmem:[#allocation2 + $0x64] ss:$16 sps:$4 sm:$0xff]   ;;  %v8585_v59 = vld [vmem:[#allocation2 + $0x80] ss:$16 sps:$4 sm:$0xff]  }
  0xc3   :  { %2664 = vmatpush1.bf16.msra.mxu1 %v590_v36  ;;  %2056 = vmatprep.subr.bf16.mxu0 %v10931_v0  ;;  %v3280_v36 = vld [vmem:[#allocation5 + $0x2] sm:$0x3]  ;;  %v596_v40 = vpack.c.bf16 %v269_v35, %v268_v34  ;;  %v8574_v52 = vld [vmem:[#allocation2 + $0x48] ss:$16 sps:$4 sm:$0xff]   ;;  %v8577_v54 = vld [vmem:[#allocation2 + $0x6c] ss:$16 sps:$4 sm:$0xff]  }
  0xc4   :  { %2665 = vmatprep.subr.bf16.mxu1 %v10931_v0  ;;  %v3311_v41 = vand.u32 %v9834_v37, %v3280_v36  ;;  %v8580_v56 = vld [vmem:[#allocation2 + $0x68] ss:$16 sps:$4 sm:$0xff]   ;;  %v8581_v57 = vld [vmem:[#allocation2 + $0x84] ss:$16 sps:$4 sm:$0xff]   ;;  %v8591_v63 = vld [vmem:[#allocation2 + $0xa0] ss:$16 sps:$4 sm:$0xff]  }
  0xc5   :  { %v8586_v60 = vld [vmem:[#allocation2 + $0x88] ss:$16 sps:$4 sm:$0xff]   ;;  %v8593_v2 = vld [vmem:[#allocation2 + $0xc4] ss:$16 sps:$4 sm:$0xff]   ;;  %v8595_v3 = vld [vmem:[#allocation2 + $0xcc] ss:$16 sps:$4 sm:$0xff]  }
  0xc6   :  { %2057 = vmatpush1.bf16.msra.mxu0 %v573_v43  ;;  %v3435_v43 = vand.u32 %v9834_v37, %v3270_v38  ;;  %v8592_v1 = vld [vmem:[#allocation2 + $0xa8] ss:$16 sps:$4 sm:$0xff]   ;;  %v8599_v6 = vld [vmem:[#allocation2 + $0xe4] ss:$16 sps:$4 sm:$0xff]   ;;  %v8603_v8 = vld [vmem:[#allocation2 + $0xe0] ss:$16 sps:$4 sm:$0xff]  }
  0xc7   :  { %2666 = vmatpush1.bf16.msra.mxu1 %v589_v46  ;;  %2058 = vmatprep.subr.bf16.mxu0 %v10931_v0  ;;  %v8565_v46 = vld [vmem:[#allocation2 + $0x2c] ss:$16 sps:$4 sm:$0xff]   ;;  %v8598_v5 = vld [vmem:[#allocation2 + $0xc8] ss:$16 sps:$4 sm:$0xff]   ;;  %v8611_v14 = vld [vmem:[#allocation2 + $0x124] ss:$16 sps:$4 sm:$0xff]  }
  0xc8   :  { %2667 = vmatprep.subr.bf16.mxu1 %v10931_v0  ;;  %v8604_v9 = vld [vmem:[#allocation2 + $0xe8] ss:$16 sps:$4 sm:$0xff]   ;;  %v8607_v11 = vld [vmem:[#allocation2 + $0x10c] ss:$16 sps:$4 sm:$0xff]   ;;  %v8621_v20 = vld [vmem:[#allocation2 + $0x140] ss:$16 sps:$4 sm:$0xff]  }
  0xc9   :  { %v8610_v13 = vld [vmem:[#allocation2 + $0x108] ss:$16 sps:$4 sm:$0xff]   ;;  %v8613_v15 = vld [vmem:[#allocation2 + $0x12c] ss:$16 sps:$4 sm:$0xff]   ;;  %v8629_v26 = vld [vmem:[#allocation2 + $0x184] ss:$16 sps:$4 sm:$0xff]  }
  0xca   :  { %2059 = vmatpush1.bf16.msra.mxu0 %v572_v49  ;;  %v8569_v49 = vld [vmem:[#allocation2 + $0x44] ss:$16 sps:$4 sm:$0xff]   ;;  %v8616_v17 = vld [vmem:[#allocation2 + $0x128] ss:$16 sps:$4 sm:$0xff]   ;;  %v8619_v19 = vld [vmem:[#allocation2 + $0x14c] ss:$16 sps:$4 sm:$0xff]  }
  0xcb   :  { %2668 = vmatpush1.bf16.msra.mxu1 %v588_v51  ;;  %2060 = vmatprep.subr.bf16.mxu0 %v10931_v0  ;;  %v8573_v51 = vld [vmem:[#allocation2 + $0x40] ss:$16 sps:$4 sm:$0xff]   ;;  %v8622_v21 = vld [vmem:[#allocation2 + $0x148] ss:$16 sps:$4 sm:$0xff]   ;;  %v8625_v23 = vld [vmem:[#allocation2 + $0x16c] ss:$16 sps:$4 sm:$0xff]  }
  0xcc   :  { %2669 = vmatprep.subr.bf16.mxu1 %v10931_v0  ;;  %v8628_v25 = vld [vmem:[#allocation2 + $0x168] ss:$16 sps:$4 sm:$0xff]   ;;  %v8631_v27 = vld [vmem:[#allocation2 + $0x18c] ss:$16 sps:$4 sm:$0xff]   ;;  %v8633_v28 = vld [vmem:[#allocation2 + $0x180] ss:$16 sps:$4 sm:$0xff]  }
  0xcd   :  { %v8634_v29 = vld [vmem:[#allocation2 + $0x188] ss:$16 sps:$4 sm:$0xff]   ;;  %v8635_v30 = vld [vmem:[#allocation2 + $0x1a4] ss:$16 sps:$4 sm:$0xff]   ;;  %v8639_v32 = vld [vmem:[#allocation2 + $0x1a0] ss:$16 sps:$4 sm:$0xff]  }
  0xce   :  { %2061 = vmatpush2.bf16.msra.mxu0 %v587_v55  ;;  %v8579_v55 = vld [vmem:[#allocation2 + $0x60] ss:$16 sps:$4 sm:$0xff]   ;;  %v8641_v34 = vld [vmem:[#allocation2 + $0x1c4] ss:$16 sps:$4 sm:$0xff]   ;;  %v8643_v35 = vld [vmem:[#allocation2 + $0x1cc] ss:$16 sps:$4 sm:$0xff]  }
  0xcf   :  { %2670 = vmatpush2.bf16.msra.mxu1 %v603_v58  ;;  %2062 = vmatprep.subr.bf16.mxu0 %v10931_v0  ;;  %v8583_v58 = vld [vmem:[#allocation2 + $0x8c] ss:$16 sps:$4 sm:$0xff]   ;;  %v8645_v36 = vld [vmem:[#allocation2 + $0x1c0] ss:$16 sps:$4 sm:$0xff]   ;;  %v8646_v38 = vld [vmem:[#allocation2 + $0x1c8] ss:$16 sps:$4 sm:$0xff]  }
  0xd0   :  { %2671 = vmatprep.subr.bf16.mxu1 %v10931_v0 }
  0xd2   :  { %2063 = vmatpush2.bf16.msra.mxu0 %v586_v61  ;;  %v8587_v61 = vld [vmem:[#allocation2 + $0xa4] ss:$16 sps:$4 sm:$0xff]  }
  0xd3   :  { %2672 = vmatpush2.bf16.msra.mxu1 %v602_v62  ;;  %2064 = vmatprep.subr.bf16.mxu0 %v10931_v0  ;;  %v8589_v62 = vld [vmem:[#allocation2 + $0xac] ss:$16 sps:$4 sm:$0xff]  }
  0xd4   :  { %2673 = vmatprep.subr.bf16.mxu1 %v10931_v0 }
  0xd6   :  { %2065 = vmatpush2.bf16.msra.mxu0 %v585_v4  ;;  %v8597_v4 = vld [vmem:[#allocation2 + $0xc0] ss:$16 sps:$4 sm:$0xff]  }
  0xd7   :  { %2674 = vmatpush2.bf16.msra.mxu1 %v601_v7  ;;  %2066 = vmatprep.subr.bf16.mxu0 %v10931_v0  ;;  %v8601_v7 = vld [vmem:[#allocation2 + $0xec] ss:$16 sps:$4 sm:$0xff]  }
  0xd8   :  { %2675 = vmatprep.subr.bf16.mxu1 %v10931_v0 }
  0xda   :  { %2067 = vmatpush2.bf16.msra.mxu0 %v584_v10  ;;  %v8605_v10 = vld [vmem:[#allocation2 + $0x104] ss:$16 sps:$4 sm:$0xff]  }
  0xdb   :  { %2676 = vmatpush2.bf16.msra.mxu1 %v600_v12  ;;  %2068 = vmatprep.subr.bf16.mxu0 %v10931_v0  ;;  %v8609_v12 = vld [vmem:[#allocation2 + $0x100] ss:$16 sps:$4 sm:$0xff]  }
  0xdc   :  { %2677 = vmatprep.subr.bf16.mxu1 %v10931_v0 }
  0xde   :  { %2069 = vmatpush2.bf16.msra.mxu0 %v583_v16  ;;  %v8615_v16 = vld [vmem:[#allocation2 + $0x120] ss:$16 sps:$4 sm:$0xff]  }
  0xdf   :  { %2678 = vmatpush2.bf16.msra.mxu1 %v599_v18  ;;  %2070 = vmatprep.subr.bf16.mxu0 %v10931_v0  ;;  %v8617_v18 = vld [vmem:[#allocation2 + $0x144] ss:$16 sps:$4 sm:$0xff]  }
  0xe0   :  { %2679 = vmatprep.subr.bf16.mxu1 %v10931_v0 }
  0xe2   :  { %2071 = vmatpush2.bf16.msra.mxu0 %v582_v22  ;;  %v8623_v22 = vld [vmem:[#allocation2 + $0x164] ss:$16 sps:$4 sm:$0xff]  }
  0xe3   :  { %2680 = vmatpush2.bf16.msra.mxu1 %v598_v24  ;;  %2072 = vmatprep.subr.bf16.mxu0 %v10931_v0  ;;  %v8627_v24 = vld [vmem:[#allocation2 + $0x160] ss:$16 sps:$4 sm:$0xff]  }
  0xe4   :  { %2681 = vmatprep.subr.bf16.mxu1 %v10931_v0 }
  0xe6   :  { %2073 = vmatpush2.bf16.msra.mxu0 %v581_v31  ;;  %v8637_v31 = vld [vmem:[#allocation2 + $0x1ac] ss:$16 sps:$4 sm:$0xff]  }
  0xe7   :  { %2682 = vmatpush2.bf16.msra.mxu1 %v597_v33  ;;  %2074 = vmatprep.subr.bf16.mxu0 %v10931_v0  ;;  %v8640_v33 = vld [vmem:[#allocation2 + $0x1a8] ss:$16 sps:$4 sm:$0xff]  }
  0xe8   :  { %2683 = vmatprep.subr.bf16.mxu1 %v10931_v0 }
  0xea   :  { %2075 = vmatpush2.bf16.msra.mxu0 %v580_v39  ;;  %v8647_v39 = vld [vmem:[#allocation2 + $0x1e4] ss:$16 sps:$4 sm:$0xff]  }
  0xeb   :  { %2684 = vmatpush2.bf16.msra.mxu1 %v596_v40  ;;  %8097 = vmatprep.subr.bf16.mxu0 %v3311_v41  ;;  %v8649_v40 = vld [vmem:[#allocation2 + $0x1ec] ss:$16 sps:$4 sm:$0xff]  }
  0xec   :  { %8115 = vmatprep.subr.bf16.mxu1 %v3435_v43 }
  0xed   :  { %2077 = vmatmul.mubr.bf16.vlgmr.msra.gmra.mxu0 %v8557_v42  ;;  %v8652_v42 = vld [vmem:[#allocation2 + $0x1e8] ss:$16 sps:$4 sm:$0xff]  }
  0xee   :  { %2686 = vmatmul.mubr.bf16.vlgmr.msra.gmra.mxu1 %v8560_v44  ;;  %2084 = vmatprep.mubr.bf16.mxu0 %v8563_v45  ;;  %v8655_v44 = vld [vmem:[#allocation2 + $0x20c] ss:$16 sps:$4 sm:$0xff]   ;;  %v8657_v45 = vld [vmem:[#allocation2 + $0x200] ss:$16 sps:$4 sm:$0xff]  }
  0xef   :  { %2693 = vmatprep.mubr.bf16.mxu1 %v8565_v46  ;;  %8098 = vmatpush3.bf16.msra.mxu0 %v3311_v41  ;;  %v8651_v41 = vld [vmem:[#allocation2 + $0x1e0] ss:$16 sps:$4 sm:$0xff]   ;;  %v8658_v46 = vld [vmem:[#allocation2 + $0x208] ss:$16 sps:$4 sm:$0xff]  }
  0xf0   :  { %8116 = vmatpush3.bf16.msra.mxu1 %v3435_v43  ;;  %v8653_v43 = vld [vmem:[#allocation2 + $0x204] ss:$16 sps:$4 sm:$0xff]  }
  0xf5   :  { %2085 = vmatmul.mubr.bf16.gmra.mxu0 %v8567_v47  ;;  %v8659_v47 = vld [vmem:[#allocation2 + $0x224] ss:$16 sps:$4 sm:$0xff]  }
  0xf6   :  { %2694 = vmatmul.mubr.bf16.gmra.mxu1 %v8568_v48  ;;  %2092 = vmatprep.mubr.bf16.mxu0 %v8569_v49  ;;  %v8661_v48 = vld [vmem:[#allocation2 + $0x22c] ss:$16 sps:$4 sm:$0xff]   ;;  %v8663_v49 = vld [vmem:[#allocation2 + $0x220] ss:$16 sps:$4 sm:$0xff]  }
  0xf7   :  { %2701 = vmatprep.mubr.bf16.mxu1 %v8571_v50  ;;  %v8664_v50 = vld [vmem:[#allocation2 + $0x228] ss:$16 sps:$4 sm:$0xff]  }
  0xfd   :  { %2093 = vmatmul.mubr.bf16.gmra.mxu0 %v8573_v51  ;;  %v8665_v51 = vld [vmem:[#allocation2 + $0x244] ss:$16 sps:$4 sm:$0xff]  }
  0xfe   :  { %2702 = vmatmul.mubr.bf16.gmra.mxu1 %v8574_v52  ;;  %2100 = vmatprep.mubr.bf16.mxu0 %v8575_v53  ;;  %v8667_v52 = vld [vmem:[#allocation2 + $0x24c] ss:$16 sps:$4 sm:$0xff]   ;;  %v8669_v53 = vld [vmem:[#allocation2 + $0x240] ss:$16 sps:$4 sm:$0xff]  }
  0xff   :  { %2709 = vmatprep.mubr.bf16.mxu1 %v8577_v54  ;;  %v8670_v54 = vld [vmem:[#allocation2 + $0x248] ss:$16 sps:$4 sm:$0xff]  }
 0x105   :  { %2101 = vmatmul.mubr.bf16.gmra.mxu0 %v8579_v55  ;;  %v8671_v55 = vld [vmem:[#allocation2 + $0x264] ss:$16 sps:$4 sm:$0xff]  }
 0x106   :  { %2710 = vmatmul.mubr.bf16.gmra.mxu1 %v8580_v56  ;;  %2108 = vmatprep.mubr.bf16.mxu0 %v8581_v57  ;;  %v8673_v56 = vld [vmem:[#allocation2 + $0x26c] ss:$16 sps:$4 sm:$0xff]   ;;  %v8675_v57 = vld [vmem:[#allocation2 + $0x260] ss:$16 sps:$4 sm:$0xff]  }
 0x107   :  { %2717 = vmatprep.mubr.bf16.mxu1 %v8583_v58  ;;  %v8676_v58 = vld [vmem:[#allocation2 + $0x268] ss:$16 sps:$4 sm:$0xff]  }
 0x10d   :  { %2109 = vmatmul.mubr.bf16.gmra.mxu0 %v8585_v59  ;;  %v8677_v59 = vld [vmem:[#allocation2 + $0x284] ss:$16 sps:$4 sm:$0xff]  }
 0x10e   :  { %2718 = vmatmul.mubr.bf16.gmra.mxu1 %v8586_v60  ;;  %2116 = vmatprep.mubr.bf16.mxu0 %v8587_v61  ;;  %v8679_v60 = vld [vmem:[#allocation2 + $0x28c] ss:$16 sps:$4 sm:$0xff]   ;;  %v8681_v61 = vld [vmem:[#allocation2 + $0x280] ss:$16 sps:$4 sm:$0xff]  }
 0x10f   :  { %2725 = vmatprep.mubr.bf16.mxu1 %v8589_v62  ;;  %v8682_v62 = vld [vmem:[#allocation2 + $0x288] ss:$16 sps:$4 sm:$0xff]  }
 0x115   :  { %2117 = vmatmul.mubr.bf16.gmra.mxu0 %v8591_v63  ;;  %v8683_v63 = vld [vmem:[#allocation2 + $0x2a4] ss:$16 sps:$4 sm:$0xff]  }
 0x116   :  { %2726 = vmatmul.mubr.bf16.gmra.mxu1 %v8592_v1  ;;  %2124 = vmatprep.mubr.bf16.mxu0 %v8593_v2  ;;  %v8685_v1 = vld [vmem:[#allocation2 + $0x2ac] ss:$16 sps:$4 sm:$0xff]   ;;  %v8687_v2 = vld [vmem:[#allocation2 + $0x2a0] ss:$16 sps:$4 sm:$0xff]  }
 0x117   :  { %2733 = vmatprep.mubr.bf16.mxu1 %v8595_v3  ;;  %v8688_v3 = vld [vmem:[#allocation2 + $0x2a8] ss:$16 sps:$4 sm:$0xff]  }
 0x11d   :  { %2125 = vmatmul.mubr.bf16.gmra.mxu0 %v8597_v4  ;;  %v8689_v4 = vld [vmem:[#allocation2 + $0x2c4] ss:$16 sps:$4 sm:$0xff]  }
 0x11e   :  { %2734 = vmatmul.mubr.bf16.gmra.mxu1 %v8598_v5  ;;  %2132 = vmatprep.mubr.bf16.mxu0 %v8599_v6  ;;  %v8691_v5 = vld [vmem:[#allocation2 + $0x2cc] ss:$16 sps:$4 sm:$0xff]   ;;  %v8693_v6 = vld [vmem:[#allocation2 + $0x2c0] ss:$16 sps:$4 sm:$0xff]  }
 0x11f   :  { %2741 = vmatprep.mubr.bf16.mxu1 %v8601_v7  ;;  %v8694_v7 = vld [vmem:[#allocation2 + $0x2c8] ss:$16 sps:$4 sm:$0xff]  }
 0x125   :  { %2133 = vmatmul.mubr.bf16.gmra.mxu0 %v8603_v8  ;;  %v8695_v8 = vld [vmem:[#allocation2 + $0x2e4] ss:$16 sps:$4 sm:$0xff]  }
 0x126   :  { %2742 = vmatmul.mubr.bf16.gmra.mxu1 %v8604_v9  ;;  %2140 = vmatprep.mubr.bf16.mxu0 %v8605_v10  ;;  %v8697_v9 = vld [vmem:[#allocation2 + $0x2ec] ss:$16 sps:$4 sm:$0xff]   ;;  %v8699_v10 = vld [vmem:[#allocation2 + $0x2e0] ss:$16 sps:$4 sm:$0xff]  }
 0x127   :  { %2749 = vmatprep.mubr.bf16.mxu1 %v8607_v11  ;;  %v8700_v11 = vld [vmem:[#allocation2 + $0x2e8] ss:$16 sps:$4 sm:$0xff]  }
 0x12d   :  { %2141 = vmatmul.mubr.bf16.gmra.mxu0 %v8609_v12  ;;  %v8701_v12 = vld [vmem:[#allocation2 + $0x304] ss:$16 sps:$4 sm:$0xff]  }
 0x12e   :  { %2750 = vmatmul.mubr.bf16.gmra.mxu1 %v8610_v13  ;;  %2148 = vmatprep.mubr.bf16.mxu0 %v8611_v14  ;;  %v8703_v13 = vld [vmem:[#allocation2 + $0x30c] ss:$16 sps:$4 sm:$0xff]   ;;  %v8705_v14 = vld [vmem:[#allocation2 + $0x300] ss:$16 sps:$4 sm:$0xff]  }
 0x12f   :  { %2757 = vmatprep.mubr.bf16.mxu1 %v8613_v15  ;;  %v8706_v15 = vld [vmem:[#allocation2 + $0x308] ss:$16 sps:$4 sm:$0xff]  }
 0x135   :  { %2149 = vmatmul.mubr.bf16.gmra.mxu0 %v8615_v16  ;;  %v8707_v16 = vld [vmem:[#allocation2 + $0x324] ss:$16 sps:$4 sm:$0xff]  }
 0x136   :  { %2758 = vmatmul.mubr.bf16.gmra.mxu1 %v8616_v17  ;;  %2156 = vmatprep.mubr.bf16.mxu0 %v8617_v18  ;;  %v8709_v17 = vld [vmem:[#allocation2 + $0x32c] ss:$16 sps:$4 sm:$0xff]  }
 0x137   :  { %2765 = vmatprep.mubr.bf16.mxu1 %v8619_v19 }
 0x13d   :  { %2157 = vmatmul.mubr.bf16.gmra.mxu0 %v8621_v20 }
 0x13e   :  { %2766 = vmatmul.mubr.bf16.gmra.mxu1 %v8622_v21  ;;  %2164 = vmatprep.mubr.bf16.mxu0 %v8623_v22 }
 0x13f   :  { %2773 = vmatprep.mubr.bf16.mxu1 %v8625_v23 }
 0x145   :  { %2165 = vmatmul.mubr.bf16.gmra.mxu0 %v8627_v24  ;;  %v8711_v24 = vld [vmem:[#allocation2 + $0x320] ss:$16 sps:$4 sm:$0xff]  }
 0x146   :  { %2774 = vmatmul.mubr.bf16.gmra.mxu1 %v8628_v25  ;;  %2172 = vmatprep.mubr.bf16.mxu0 %v8629_v26  ;;  %v8712_v26 = vld [vmem:[#allocation2 + $0x328] ss:$16 sps:$4 sm:$0xff]  }
 0x147   :  { %2781 = vmatprep.mubr.bf16.mxu1 %v8631_v27  ;;  %v8713_v27 = vld [vmem:[#allocation2 + $0x344] ss:$16 sps:$4 sm:$0xff]  }
 0x14d   :  { %2173 = vmatmul.mubr.bf16.gmra.mxu0 %v8633_v28 }
 0x14e   :  { %2782 = vmatmul.mubr.bf16.gmra.mxu1 %v8634_v29  ;;  %2180 = vmatprep.mubr.bf16.mxu0 %v8635_v30  ;;  %v8715_v30 = vld [vmem:[#allocation2 + $0x34c] ss:$16 sps:$4 sm:$0xff]  }
 0x14f   :  { %2789 = vmatprep.mubr.bf16.mxu1 %v8637_v31 }
 0x155   :  { %2181 = vmatmul.mubr.bf16.gmra.mxu0 %v8639_v32  ;;  %v8850_v32 = vld [vmem:[#allocation2 + $0x60c] ss:$16 sps:$4 sm:$0xff]  }
 0x156   :  { %2790 = vmatmul.mubr.bf16.gmra.mxu1 %v8640_v33  ;;  %2188 = vmatprep.mubr.bf16.mxu0 %v8641_v34 }
 0x157   :  { %2797 = vmatprep.mubr.bf16.mxu1 %v8643_v35 }
 0x15d   :  { %2189 = vmatmul.mubr.bf16.gmra.mxu0 %v8645_v36 }
 0x15e   :  { %2798 = vmatmul.mubr.bf16.gmra.mxu1 %v8646_v38  ;;  %2196 = vmatprep.mubr.bf16.mxu0 %v8647_v39 }
 0x15f   :  { %2805 = vmatprep.mubr.bf16.mxu1 %v8649_v40  ;;  %v8717_v40 = vld [vmem:[#allocation2 + $0x340] ss:$16 sps:$4 sm:$0xff]  }
 0x165   :  { %2197 = vmatmul.mubr.bf16.gmra.mxu0 %v8651_v41 }
 0x166   :  { %2806 = vmatmul.mubr.bf16.gmra.mxu1 %v8652_v42  ;;  %2204 = vmatprep.mubr.bf16.mxu0 %v8653_v43  ;;  %v8718_v42 = vld [vmem:[#allocation2 + $0x348] ss:$16 sps:$4 sm:$0xff]   ;;  %v8719_v43 = vld [vmem:[#allocation2 + $0x364] ss:$16 sps:$4 sm:$0xff]  }
 0x167   :  { %2813 = vmatprep.mubr.bf16.mxu1 %v8655_v44 }
 0x16d   :  { %2205 = vmatmul.mubr.bf16.gmra.mxu0 %v8657_v45 }
 0x16e   :  { %2814 = vmatmul.mubr.bf16.gmra.mxu1 %v8658_v46  ;;  %2212 = vmatprep.mubr.bf16.mxu0 %v8659_v47  ;;  %v8721_v46 = vld [vmem:[#allocation2 + $0x36c] ss:$16 sps:$4 sm:$0xff]  }
 0x16f   :  { %2821 = vmatprep.mubr.bf16.mxu1 %v8661_v48  ;;  %v8844_v48 = vld [vmem:[#allocation2 + $0x5ec] ss:$16 sps:$4 sm:$0xff]  }
 0x175   :  { %2213 = vmatmul.mubr.bf16.gmra.mxu0 %v8663_v49 }
 0x176   :  { %2822 = vmatmul.mubr.bf16.gmra.mxu1 %v8664_v50  ;;  %2220 = vmatprep.mubr.bf16.mxu0 %v8665_v51 }
 0x177   :  { %2829 = vmatprep.mubr.bf16.mxu1 %v8667_v52 }
 0x17d   :  { %2221 = vmatmul.mubr.bf16.gmra.mxu0 %v8669_v53 }
 0x17e   :  { %2830 = vmatmul.mubr.bf16.gmra.mxu1 %v8670_v54  ;;  %2228 = vmatprep.mubr.bf16.mxu0 %v8671_v55  ;;  %v8723_v55 = vld [vmem:[#allocation2 + $0x360] ss:$16 sps:$4 sm:$0xff]  }
 0x17f   :  { %2837 = vmatprep.mubr.bf16.mxu1 %v8673_v56 }
 0x185   :  { %2229 = vmatmul.mubr.bf16.gmra.mxu0 %v8675_v57  ;;  %v8724_v57 = vld [vmem:[#allocation2 + $0x368] ss:$16 sps:$4 sm:$0xff]  }
 0x186   :  { %2838 = vmatmul.mubr.bf16.gmra.mxu1 %v8676_v58  ;;  %2236 = vmatprep.mubr.bf16.mxu0 %v8677_v59  ;;  %v8727_v58 = vld [vmem:[#allocation2 + $0x384] ss:$16 sps:$4 sm:$0xff]  }
 0x187   :  { %2845 = vmatprep.mubr.bf16.mxu1 %v8679_v60 }
 0x18d   :  { %2237 = vmatmul.mubr.bf16.gmra.mxu0 %v8681_v61  ;;  %v8730_v61 = vld [vmem:[#allocation2 + $0x38c] ss:$16 sps:$4 sm:$0xff]  }
 0x18e   :  { %2846 = vmatmul.mubr.bf16.gmra.mxu1 %v8682_v62  ;;  %2244 = vmatprep.mubr.bf16.mxu0 %v8683_v63  ;;  %v8838_v63 = vld [vmem:[#allocation2 + $0x5cc] ss:$16 sps:$4 sm:$0xff]  }
 0x18f   :  { %2853 = vmatprep.mubr.bf16.mxu1 %v8685_v1 }
 0x195   :  { %2245 = vmatmul.mubr.bf16.gmra.mxu0 %v8687_v2 }
 0x196   :  { %2854 = vmatmul.mubr.bf16.gmra.mxu1 %v8688_v3  ;;  %2252 = vmatprep.mubr.bf16.mxu0 %v8689_v4 }
 0x197   :  { %2861 = vmatprep.mubr.bf16.mxu1 %v8691_v5 }
 0x19d   :  { %2253 = vmatmul.mubr.bf16.gmra.mxu0 %v8693_v6 }
 0x19e   :  { %2862 = vmatmul.mubr.bf16.gmra.mxu1 %v8694_v7  ;;  %2260 = vmatprep.mubr.bf16.mxu0 %v8695_v8  ;;  %v8725_v7 = vld [vmem:[#allocation2 + $0x380] ss:$16 sps:$4 sm:$0xff]  }
 0x19f   :  { %2869 = vmatprep.mubr.bf16.mxu1 %v8697_v9  ;;  %v8728_v9 = vld [vmem:[#allocation2 + $0x388] ss:$16 sps:$4 sm:$0xff]  }
 0x1a5   :  { %2261 = vmatmul.mubr.bf16.gmra.mxu0 %v8699_v10  ;;  %v8733_v10 = vld [vmem:[#allocation2 + $0x3a4] ss:$16 sps:$4 sm:$0xff]  }
 0x1a6   :  { %2870 = vmatmul.mubr.bf16.gmra.mxu1 %v8700_v11  ;;  %2268 = vmatprep.mubr.bf16.mxu0 %v8701_v12 }
 0x1a7   :  { %2877 = vmatprep.mubr.bf16.mxu1 %v8703_v13  ;;  %v8736_v13 = vld [vmem:[#allocation2 + $0x3ac] ss:$16 sps:$4 sm:$0xff]  }
 0x1ad   :  { %v2078_v18 = vpop.f32.mrf.mxu0  ;;  %2269 = vmatmul.mubr.bf16.gmra.mxu0 %v8705_v14 }
 0x1ae   :  { %v2687_v19 = vpop.f32.mrf.mxu1  ;;  %2878 = vmatmul.mubr.bf16.gmra.mxu1 %v8706_v15  ;;  %2276 = vmatprep.mubr.bf16.mxu0 %v8707_v16  ;;  %v8832_v15 = vld [vmem:[#allocation2 + $0x5ac] ss:$16 sps:$4 sm:$0xff]  }
 0x1af   :  { %v9840_v20 = vadd.f32 %v2687_v19, %v2078_v18  ;;  %v2080_v21 = vpop.f32.mrf.mxu0  ;;  %2885 = vmatprep.mubr.bf16.mxu1 %v8709_v17 }
 0x1b0   :  { %v2689_v22 = vpop.f32.mrf.mxu1 }
 0x1b1   :  { %v2081_v23 = vpop.f32.mrf.mxu0 }
 0x1b2   :  { %v2690_v25 = vpop.f32.mrf.mxu1 }
 0x1b3   :  { %v9842_v28 = vadd.f32 %v2690_v25, %v2081_v23  ;;  %v2083_v29 = vpop.f32.mrf.mxu0  ;;  %v8731_v23 = vld [vmem:[#allocation2 + $0x3a0] ss:$16 sps:$4 sm:$0xff]   ;;  %v8734_v25 = vld [vmem:[#allocation2 + $0x3a8] ss:$16 sps:$4 sm:$0xff]  }
 0x1b4   :  { %v2692_v31 = vpop.f32.mrf.mxu1 }
 0x1b5   :  { %v2086_v33 = vpop.f32.mrf.mxu0  ;;  %2277 = vmatmul.mubr.bf16.gmra.mxu0 %v8711_v24 }
 0x1b6   :  { %v2695_v34 = vpop.f32.mrf.mxu1  ;;  %2886 = vmatmul.mubr.bf16.gmra.mxu1 %v8712_v26  ;;  %2284 = vmatprep.mubr.bf16.mxu0 %v8713_v27  ;;  %v8739_v26 = vld [vmem:[#allocation2 + $0x3c4] ss:$16 sps:$4 sm:$0xff]  }
 0x1b7   :  { %v9846_v35 = vadd.f32 %v2695_v34, %v2086_v33  ;;  %v2088_v36 = vpop.f32.mrf.mxu0  ;;  %2893 = vmatprep.mubr.bf16.mxu1 %v8715_v30  ;;  %v8742_v30 = vld [vmem:[#allocation2 + $0x3cc] ss:$16 sps:$4 sm:$0xff]  }
 0x1b8   :  { %v2697_v38 = vpop.f32.mrf.mxu1  ;;  %v8826_v33 = vld [vmem:[#allocation2 + $0x58c] ss:$16 sps:$4 sm:$0xff]  }
 0x1b9   :  { %v2089_v39 = vpop.f32.mrf.mxu0 }
 0x1ba   :  { %v2698_v41 = vpop.f32.mrf.mxu1 }
 0x1bb   :  { %v9848_v44 = vadd.f32 %v2698_v41, %v2089_v39  ;;  %v2091_v45 = vpop.f32.mrf.mxu0 }
 0x1bc   :  { %v2700_v47 = vpop.f32.mrf.mxu1  ;;  %v8740_v45 = vld [vmem:[#allocation2 + $0x3c8] ss:$16 sps:$4 sm:$0xff]  }
 0x1bd   :  { %v2094_v49 = vpop.f32.mrf.mxu0  ;;  %2285 = vmatmul.mubr.bf16.gmra.mxu0 %v8717_v40 }
 0x1be   :  { %v2703_v50 = vpop.f32.mrf.mxu1  ;;  %2894 = vmatmul.mubr.bf16.gmra.mxu1 %v8718_v42  ;;  %2292 = vmatprep.mubr.bf16.mxu0 %v8719_v43  ;;  %v8737_v42 = vld [vmem:[#allocation2 + $0x3c0] ss:$16 sps:$4 sm:$0xff]  }
 0x1bf   :  { %v9852_v51 = vadd.f32 %v2703_v50, %v2094_v49  ;;  %v2096_v52 = vpop.f32.mrf.mxu0  ;;  %2901 = vmatprep.mubr.bf16.mxu1 %v8721_v46  ;;  %v8745_v46 = vld [vmem:[#allocation2 + $0x3e4] ss:$16 sps:$4 sm:$0xff]   ;;  %v8748_v50 = vld [vmem:[#allocation2 + $0x3ec] ss:$16 sps:$4 sm:$0xff]  }
 0x1c0   :  { %v2705_v53 = vpop.f32.mrf.mxu1 }
 0x1c1   :  { %v2097_v54 = vpop.f32.mrf.mxu0  ;;  %v8820_v53 = vld [vmem:[#allocation2 + $0x56c] ss:$16 sps:$4 sm:$0xff]  }
 0x1c2   :  { %v2706_v56 = vpop.f32.mrf.mxu1 }
 0x1c3   :  { %v9854_v59 = vadd.f32 %v2706_v56, %v2097_v54  ;;  %v2099_v60 = vpop.f32.mrf.mxu0 }
 0x1c4   :  { %v2708_v62 = vpop.f32.mrf.mxu1 }
 0x1c5   :  { %v2102_v1 = vpop.f32.mrf.mxu0  ;;  %2293 = vmatmul.mubr.bf16.gmra.mxu0 %v8723_v55 }
 0x1c6   :  { %v2711_v2 = vpop.f32.mrf.mxu1  ;;  %2902 = vmatmul.mubr.bf16.gmra.mxu1 %v8724_v57  ;;  %2300 = vmatprep.mubr.bf16.mxu0 %v8727_v58 }
 0x1c7   :  { %v9858_v3 = vadd.f32 %v2711_v2, %v2102_v1  ;;  %v2104_v4 = vpop.f32.mrf.mxu0  ;;  %2909 = vmatprep.mubr.bf16.mxu1 %v8730_v61  ;;  %v8743_v61 = vld [vmem:[#allocation2 + $0x3e0] ss:$16 sps:$4 sm:$0xff]   ;;  %v8746_v1 = vld [vmem:[#allocation2 + $0x3e8] ss:$16 sps:$4 sm:$0xff]   ;;  %v8751_v2 = vld [vmem:[#allocation2 + $0x404] ss:$16 sps:$4 sm:$0xff]  }
 0x1c8   :  { %v2713_v5 = vpop.f32.mrf.mxu1 }
 0x1c9   :  { %v2105_v6 = vpop.f32.mrf.mxu0 }
 0x1ca   :  { %v2714_v8 = vpop.f32.mrf.mxu1 }
 0x1cb   :  { %v9860_v11 = vadd.f32 %v2714_v8, %v2105_v6  ;;  %v2107_v12 = vpop.f32.mrf.mxu0  ;;  %v8754_v6 = vld [vmem:[#allocation2 + $0x40c] ss:$16 sps:$4 sm:$0xff]  }
 0x1cc   :  { %v2716_v14 = vpop.f32.mrf.mxu1  ;;  %v8814_v8 = vld [vmem:[#allocation2 + $0x54c] ss:$16 sps:$4 sm:$0xff]  }
 0x1cd   :  { %v2110_v16 = vpop.f32.mrf.mxu0  ;;  %2301 = vmatmul.mubr.bf16.gmra.mxu0 %v8725_v7 }
 0x1ce   :  { %v2719_v17 = vpop.f32.mrf.mxu1  ;;  %2910 = vmatmul.mubr.bf16.gmra.mxu1 %v8728_v9  ;;  %2308 = vmatprep.mubr.bf16.mxu0 %v8733_v10 }
 0x1cf   :  { %v9864_v18 = vadd.f32 %v2719_v17, %v2110_v16  ;;  %v2112_v19 = vpop.f32.mrf.mxu0  ;;  %2917 = vmatprep.mubr.bf16.mxu1 %v8736_v13  ;;  %v8749_v17 = vld [vmem:[#allocation2 + $0x400] ss:$16 sps:$4 sm:$0xff]  }
 0x1d0   :  { %v2721_v21 = vpop.f32.mrf.mxu1 }
 0x1d1   :  { %v2113_v22 = vpop.f32.mrf.mxu0  ;;  %v8752_v21 = vld [vmem:[#allocation2 + $0x408] ss:$16 sps:$4 sm:$0xff]  }
 0x1d2   :  { %v2722_v24 = vpop.f32.mrf.mxu1 }
 0x1d3   :  { %v9866_v27 = vadd.f32 %v2722_v24, %v2113_v22  ;;  %v2115_v29 = vpop.f32.mrf.mxu0  ;;  %v8757_v22 = vld [vmem:[#allocation2 + $0x424] ss:$16 sps:$4 sm:$0xff]  }
 0x1d4   :  { %v2724_v31 = vpop.f32.mrf.mxu1 }
 0x1d5   :  { %v2118_v34 = vpop.f32.mrf.mxu0  ;;  %2309 = vmatmul.mubr.bf16.gmra.mxu0 %v8731_v23 }
 0x1d6   :  { %v2727_v36 = vpop.f32.mrf.mxu1  ;;  %2918 = vmatmul.mubr.bf16.gmra.mxu1 %v8734_v25  ;;  %2316 = vmatprep.mubr.bf16.mxu0 %v8739_v26  ;;  %v8760_v25 = vld [vmem:[#allocation2 + $0x42c] ss:$16 sps:$4 sm:$0xff]  }
 0x1d7   :  { %v9870_v38 = vadd.f32 %v2727_v36, %v2118_v34  ;;  %v2120_v39 = vpop.f32.mrf.mxu0  ;;  %2925 = vmatprep.mubr.bf16.mxu1 %v8742_v30 }
 0x1d8   :  { %v2729_v40 = vpop.f32.mrf.mxu1 }
 0x1d9   :  { %v2121_v41 = vpop.f32.mrf.mxu0 }
 0x1da   :  { %v2730_v43 = vpop.f32.mrf.mxu1 }
 0x1db   :  { %v9872_v47 = vadd.f32 %v2730_v43, %v2121_v41  ;;  %v2123_v49 = vpop.f32.mrf.mxu0  ;;  %v8755_v41 = vld [vmem:[#allocation2 + $0x420] ss:$16 sps:$4 sm:$0xff]   ;;  %v8758_v43 = vld [vmem:[#allocation2 + $0x428] ss:$16 sps:$4 sm:$0xff]  }
 0x1dc   :  { %v2732_v52 = vpop.f32.mrf.mxu1 }
 0x1dd   :  { %v2126_v54 = vpop.f32.mrf.mxu0  ;;  %2317 = vmatmul.mubr.bf16.gmra.mxu0 %v8737_v42 }
 0x1de   :  { %v2735_v55 = vpop.f32.mrf.mxu1  ;;  %2926 = vmatmul.mubr.bf16.gmra.mxu1 %v8740_v45  ;;  %2324 = vmatprep.mubr.bf16.mxu0 %v8745_v46  ;;  %v8763_v45 = vld [vmem:[#allocation2 + $0x444] ss:$16 sps:$4 sm:$0xff]  }
 0x1df   :  { %v9876_v56 = vadd.f32 %v2735_v55, %v2126_v54  ;;  %v2128_v57 = vpop.f32.mrf.mxu0  ;;  %2933 = vmatprep.mubr.bf16.mxu1 %v8748_v50  ;;  %v8766_v50 = vld [vmem:[#allocation2 + $0x44c] ss:$16 sps:$4 sm:$0xff]  }
 0x1e0   :  { %v2737_v58 = vpop.f32.mrf.mxu1 }
 0x1e1   :  { %v2129_v60 = vpop.f32.mrf.mxu0 }
 0x1e2   :  { %v2738_v62 = vpop.f32.mrf.mxu1 }
 0x1e3   :  { %v9878_v4 = vadd.f32 %v2738_v62, %v2129_v60  ;;  %v2131_v5 = vpop.f32.mrf.mxu0 }
 0x1e4   :  { %v2740_v7 = vpop.f32.mrf.mxu1  ;;  %v8764_v5 = vld [vmem:[#allocation2 + $0x448] ss:$16 sps:$4 sm:$0xff]  }
 0x1e5   :  { %v2134_v9 = vpop.f32.mrf.mxu0  ;;  %2325 = vmatmul.mubr.bf16.gmra.mxu0 %v8743_v61 }
 0x1e6   :  { %v2743_v10 = vpop.f32.mrf.mxu1  ;;  %2934 = vmatmul.mubr.bf16.gmra.mxu1 %v8746_v1  ;;  %2332 = vmatprep.mubr.bf16.mxu0 %v8751_v2  ;;  %v8761_v1 = vld [vmem:[#allocation2 + $0x440] ss:$16 sps:$4 sm:$0xff]  }
 0x1e7   :  { %v9882_v12 = vadd.f32 %v2743_v10, %v2134_v9  ;;  %v2136_v13 = vpop.f32.mrf.mxu0  ;;  %2941 = vmatprep.mubr.bf16.mxu1 %v8754_v6  ;;  %v8769_v6 = vld [vmem:[#allocation2 + $0x464] ss:$16 sps:$4 sm:$0xff]   ;;  %v8772_v10 = vld [vmem:[#allocation2 + $0x46c] ss:$16 sps:$4 sm:$0xff]  }
 0x1e8   :  { %v2745_v14 = vpop.f32.mrf.mxu1 }
 0x1e9   :  { %v2137_v16 = vpop.f32.mrf.mxu0 }
 0x1ea   :  { %v2746_v19 = vpop.f32.mrf.mxu1 }
 0x1eb   :  { %v9884_v23 = vadd.f32 %v2746_v19, %v2137_v16  ;;  %v2139_v24 = vpop.f32.mrf.mxu0 }
 0x1ec   :  { %v2748_v26 = vpop.f32.mrf.mxu1 }
 0x1ed   :  { %v2142_v30 = vpop.f32.mrf.mxu0  ;;  %2333 = vmatmul.mubr.bf16.gmra.mxu0 %v8749_v17 }
 0x1ee   :  { %v2751_v31 = vpop.f32.mrf.mxu1  ;;  %2942 = vmatmul.mubr.bf16.gmra.mxu1 %v8752_v21  ;;  %2340 = vmatprep.mubr.bf16.mxu0 %v8757_v22 }
 0x1ef   :  { %v9888_v34 = vadd.f32 %v2751_v31, %v2142_v30  ;;  %v2144_v36 = vpop.f32.mrf.mxu0  ;;  %2949 = vmatprep.mubr.bf16.mxu1 %v8760_v25  ;;  %v8767_v25 = vld [vmem:[#allocation2 + $0x460] ss:$16 sps:$4 sm:$0xff]   ;;  %v8770_v30 = vld [vmem:[#allocation2 + $0x468] ss:$16 sps:$4 sm:$0xff]   ;;  %v8775_v31 = vld [vmem:[#allocation2 + $0x484] ss:$16 sps:$4 sm:$0xff]  }
 0x1f0   :  { %v2753_v39 = vpop.f32.mrf.mxu1 }
 0x1f1   :  { %v2145_v40 = vpop.f32.mrf.mxu0 }
 0x1f2   :  { %v2754_v42 = vpop.f32.mrf.mxu1 }
 0x1f3   :  { %v9890_v46 = vadd.f32 %v2754_v42, %v2145_v40  ;;  %v2147_v49 = vpop.f32.mrf.mxu0  ;;  %v8778_v40 = vld [vmem:[#allocation2 + $0x48c] ss:$16 sps:$4 sm:$0xff]  }
 0x1f4   :  { %v2756_v52 = vpop.f32.mrf.mxu1 }
 0x1f5   :  { %v2150_v55 = vpop.f32.mrf.mxu0  ;;  %2341 = vmatmul.mubr.bf16.gmra.mxu0 %v8755_v41 }
 0x1f6   :  { %v2759_v57 = vpop.f32.mrf.mxu1  ;;  %2950 = vmatmul.mubr.bf16.gmra.mxu1 %v8758_v43  ;;  %2348 = vmatprep.mubr.bf16.mxu0 %v8763_v45 }
 0x1f7   :  { %v9894_v58 = vadd.f32 %v2759_v57, %v2150_v55  ;;  %v2152_v60 = vpop.f32.mrf.mxu0  ;;  %2957 = vmatprep.mubr.bf16.mxu1 %v8766_v50  ;;  %v8773_v57 = vld [vmem:[#allocation2 + $0x480] ss:$16 sps:$4 sm:$0xff]  }
 0x1f8   :  { %v2761_v61 = vpop.f32.mrf.mxu1 }
 0x1f9   :  { %v2153_v62 = vpop.f32.mrf.mxu0  ;;  %v8776_v61 = vld [vmem:[#allocation2 + $0x488] ss:$16 sps:$4 sm:$0xff]  }
 0x1fa   :  { %v2762_v2 = vpop.f32.mrf.mxu1 }
 0x1fb   :  { %v9896_v7 = vadd.f32 %v2762_v2, %v2153_v62  ;;  %v2155_v9 = vpop.f32.mrf.mxu0  ;;  %v8781_v62 = vld [vmem:[#allocation2 + $0x4a4] ss:$16 sps:$4 sm:$0xff]  }
 0x1fc   :  { %v2764_v13 = vpop.f32.mrf.mxu1 }
 0x1fd   :  { %v2158_v16 = vpop.f32.mrf.mxu0  ;;  %2349 = vmatmul.mubr.bf16.gmra.mxu0 %v8761_v1 }
 0x1fe   :  { %v2767_v17 = vpop.f32.mrf.mxu1  ;;  %2958 = vmatmul.mubr.bf16.gmra.mxu1 %v8764_v5  ;;  %2356 = vmatprep.mubr.bf16.mxu0 %v8769_v6  ;;  %v8784_v5 = vld [vmem:[#allocation2 + $0x4ac] ss:$16 sps:$4 sm:$0xff]  }
 0x1ff   :  { %v9900_v19 = vadd.f32 %v2767_v17, %v2158_v16  ;;  %v2160_v21 = vpop.f32.mrf.mxu0  ;;  %2965 = vmatprep.mubr.bf16.mxu1 %v8772_v10 }
 0x200   :  { %v2769_v22 = vpop.f32.mrf.mxu1 }
 0x201   :  { %v2161_v24 = vpop.f32.mrf.mxu0 }
 0x202   :  { %v2770_v26 = vpop.f32.mrf.mxu1 }
 0x203   :  { %v9902_v36 = vadd.f32 %v2770_v26, %v2161_v24  ;;  %v2163_v39 = vpop.f32.mrf.mxu0  ;;  %v8779_v24 = vld [vmem:[#allocation2 + $0x4a0] ss:$16 sps:$4 sm:$0xff]   ;;  %v8782_v26 = vld [vmem:[#allocation2 + $0x4a8] ss:$16 sps:$4 sm:$0xff]  }
 0x204   :  { %v2772_v41 = vpop.f32.mrf.mxu1 }
 0x205   :  { %v2166_v43 = vpop.f32.mrf.mxu0  ;;  %2357 = vmatmul.mubr.bf16.gmra.mxu0 %v8767_v25 }
 0x206   :  { %v2775_v45 = vpop.f32.mrf.mxu1  ;;  %2966 = vmatmul.mubr.bf16.gmra.mxu1 %v8770_v30  ;;  %2364 = vmatprep.mubr.bf16.mxu0 %v8775_v31  ;;  %v8787_v30 = vld [vmem:[#allocation2 + $0x4c4] ss:$16 sps:$4 sm:$0xff]  }
 0x207   :  { %v9906_v49 = vadd.f32 %v2775_v45, %v2166_v43  ;;  %v2168_v50 = vpop.f32.mrf.mxu0  ;;  %2973 = vmatprep.mubr.bf16.mxu1 %v8778_v40  ;;  %v8790_v40 = vld [vmem:[#allocation2 + $0x4cc] ss:$16 sps:$4 sm:$0xff]  }
 0x208   :  { %v2777_v52 = vpop.f32.mrf.mxu1 }
 0x209   :  { %v2169_v55 = vpop.f32.mrf.mxu0 }
 0x20a   :  { %v2778_v60 = vpop.f32.mrf.mxu1 }
 0x20b   :  { %v9908_v1 = vadd.f32 %v2778_v60, %v2169_v55  ;;  %v2171_v2 = vpop.f32.mrf.mxu0 }
 0x20c   :  { %v2780_v6 = vpop.f32.mrf.mxu1  ;;  %v8788_v2 = vld [vmem:[#allocation2 + $0x4c8] ss:$16 sps:$4 sm:$0xff]  }
 0x20d   :  { %v2174_v10 = vpop.f32.mrf.mxu0  ;;  %2365 = vmatmul.mubr.bf16.gmra.mxu0 %v8773_v57 }
 0x20e   :  { %v2783_v13 = vpop.f32.mrf.mxu1  ;;  %2974 = vmatmul.mubr.bf16.gmra.mxu1 %v8776_v61  ;;  %2372 = vmatprep.mubr.bf16.mxu0 %v8781_v62  ;;  %v8785_v61 = vld [vmem:[#allocation2 + $0x4c0] ss:$16 sps:$4 sm:$0xff]  }
 0x20f   :  { %v9912_v16 = vadd.f32 %v2783_v13, %v2174_v10  ;;  %v2176_v17 = vpop.f32.mrf.mxu0  ;;  %2981 = vmatprep.mubr.bf16.mxu1 %v8784_v5  ;;  %v8793_v5 = vld [vmem:[#allocation2 + $0x4e4] ss:$16 sps:$4 sm:$0xff]   ;;  %v8796_v13 = vld [vmem:[#allocation2 + $0x4ec] ss:$16 sps:$4 sm:$0xff]  }
 0x210   :  { %v2785_v21 = vpop.f32.mrf.mxu1 }
 0x211   :  { %v2177_v22 = vpop.f32.mrf.mxu0 }
 0x212   :  { %v2786_v25 = vpop.f32.mrf.mxu1 }
 0x213   :  { %v9914_v31 = vadd.f32 %v2786_v25, %v2177_v22  ;;  %v2179_v39 = vpop.f32.mrf.mxu0 }
 0x214   :  { %v2788_v41 = vpop.f32.mrf.mxu1 }
 0x215   :  { %v2182_v45 = vpop.f32.mrf.mxu0  ;;  %2373 = vmatmul.mubr.bf16.gmra.mxu0 %v8779_v24 }
 0x216   :  { %v2791_v50 = vpop.f32.mrf.mxu1  ;;  %2982 = vmatmul.mubr.bf16.gmra.mxu1 %v8782_v26  ;;  %2380 = vmatprep.mubr.bf16.mxu0 %v8787_v30 }
 0x217   :  { %v9918_v52 = vadd.f32 %v2791_v50, %v2182_v45  ;;  %v2184_v55 = vpop.f32.mrf.mxu0  ;;  %2989 = vmatprep.mubr.bf16.mxu1 %v8790_v40  ;;  %v8791_v40 = vld [vmem:[#allocation2 + $0x4e0] ss:$16 sps:$4 sm:$0xff]   ;;  %v8794_v45 = vld [vmem:[#allocation2 + $0x4e8] ss:$16 sps:$4 sm:$0xff]   ;;  %v8799_v50 = vld [vmem:[#allocation2 + $0x504] ss:$16 sps:$4 sm:$0xff]  }
 0x218   :  { %v2793_v57 = vpop.f32.mrf.mxu1 }
 0x219   :  { %v2185_v60 = vpop.f32.mrf.mxu0 }
 0x21a   :  { %v2794_v62 = vpop.f32.mrf.mxu1 }
 0x21b   :  { %v9920_v6 = vadd.f32 %v2794_v62, %v2185_v60  ;;  %v2187_v10 = vpop.f32.mrf.mxu0  ;;  %v8802_v60 = vld [vmem:[#allocation2 + $0x50c] ss:$16 sps:$4 sm:$0xff]  }
 0x21c   :  { %v2796_v17 = vpop.f32.mrf.mxu1 }
 0x21d   :  { %v2190_v22 = vpop.f32.mrf.mxu0  ;;  %2381 = vmatmul.mubr.bf16.gmra.mxu0 %v8785_v61 }
 0x21e   :  { %v2799_v24 = vpop.f32.mrf.mxu1  ;;  %2990 = vmatmul.mubr.bf16.gmra.mxu1 %v8788_v2  ;;  %2388 = vmatprep.mubr.bf16.mxu0 %v8793_v5 }
 0x21f   :  { %v9924_v25 = vadd.f32 %v2799_v24, %v2190_v22  ;;  %v2192_v26 = vpop.f32.mrf.mxu0  ;;  %2997 = vmatprep.mubr.bf16.mxu1 %v8796_v13  ;;  %v8797_v24 = vld [vmem:[#allocation2 + $0x500] ss:$16 sps:$4 sm:$0xff]  }
 0x220   :  { %v2801_v30 = vpop.f32.mrf.mxu1 }
 0x221   :  { %v2193_v39 = vpop.f32.mrf.mxu0  ;;  %v8800_v30 = vld [vmem:[#allocation2 + $0x508] ss:$16 sps:$4 sm:$0xff]  }
 0x222   :  { %v2802_v41 = vpop.f32.mrf.mxu1 }
 0x223   :  { %v9926_v55 = vadd.f32 %v2802_v41, %v2193_v39  ;;  %v2195_v57 = vpop.f32.mrf.mxu0  ;;  %v8805_v39 = vld [vmem:[#allocation2 + $0x524] ss:$16 sps:$4 sm:$0xff]  }
 0x224   :  { %v2804_v62 = vpop.f32.mrf.mxu1 }
 0x225   :  { %v2198_v2 = vpop.f32.mrf.mxu0  ;;  %2389 = vmatmul.mubr.bf16.gmra.mxu0 %v8791_v40  ;;  %v8808_v62 = vld [vmem:[#allocation2 + $0x52c] ss:$16 sps:$4 sm:$0xff]  }
 0x226   :  { %v2807_v5 = vpop.f32.mrf.mxu1  ;;  %2998 = vmatmul.mubr.bf16.gmra.mxu1 %v8794_v45  ;;  %2396 = vmatprep.mubr.bf16.mxu0 %v8799_v50 }
 0x227   :  { %v9930_v10 = vadd.f32 %v2807_v5, %v2198_v2  ;;  %v2200_v13 = vpop.f32.mrf.mxu0  ;;  %3005 = vmatprep.mubr.bf16.mxu1 %v8802_v60 }
 0x228   :  { %v2809_v17 = vpop.f32.mrf.mxu1 }
 0x229   :  { %v2201_v22 = vpop.f32.mrf.mxu0  ;;  %v8803_v17 = vld [vmem:[#allocation2 + $0x520] ss:$16 sps:$4 sm:$0xff]  }
 0x22a   :  { %v2810_v26 = vpop.f32.mrf.mxu1 }
 0x22b   :  { %v9932_v41 = vadd.f32 %v2810_v26, %v2201_v22  ;;  %v2203_v57 = vpop.f32.mrf.mxu0  ;;  %v8806_v26 = vld [vmem:[#allocation2 + $0x528] ss:$16 sps:$4 sm:$0xff]  }
 0x22c   :  { %v2812_v0 = vpop.f32.mrf.mxu1  ;;  %v8811_v57 = vld [vmem:[#allocation2 + $0x544] ss:$16 sps:$4 sm:$0xff]  }
 0x22d   :  { %v2206_v45 = vpop.f32.mrf.mxu0  ;;  %2397 = vmatmul.mubr.bf16.gmra.mxu0 %v8797_v24 }
 0x22e   :  { %v2815_v50 = vpop.f32.mrf.mxu1  ;;  %3006 = vmatmul.mubr.bf16.gmra.mxu1 %v8800_v30  ;;  %2404 = vmatprep.mubr.bf16.mxu0 %v8805_v39 }
 0x22f   :  { %v9936_v60 = vadd.f32 %v2815_v50, %v2206_v45  ;;  %v2208_v2 = vpop.f32.mrf.mxu0  ;;  %3013 = vmatprep.mubr.bf16.mxu1 %v8808_v62 }
 0x230   :  { %v2817_v5 = vpop.f32.mrf.mxu1 }
 0x231   :  { %v2209_v13 = vpop.f32.mrf.mxu0  ;;  %v8809_v5 = vld [vmem:[#allocation2 + $0x540] ss:$16 sps:$4 sm:$0xff]  }
 0x232   :  { %v2818_v22 = vpop.f32.mrf.mxu1 }
 0x233   :  { %v9938_v29 = vadd.f32 %v2818_v22, %v2209_v13  ;;  %v2211_v0 = vpop.f32.mrf.mxu0  ;;  %v8812_v22 = vld [vmem:[#allocation2 + $0x548] ss:$16 sps:$4 sm:$0xff]  }
 0x234   :  { %v2820_v40 = vpop.f32.mrf.mxu1  ;;  %v8817_v0 = vld [vmem:[#allocation2 + $0x564] ss:$16 sps:$4 sm:$0xff]  }
 0x235   :  { %v2214_v30 = vpop.f32.mrf.mxu0  ;;  %2405 = vmatmul.mubr.bf16.gmra.mxu0 %v8803_v17 }
 0x236   :  { %v2823_v39 = vpop.f32.mrf.mxu1  ;;  %3014 = vmatmul.mubr.bf16.gmra.mxu1 %v8806_v26  ;;  %2412 = vmatprep.mubr.bf16.mxu0 %v8811_v57 }
 0x237   :  { %v9942_v62 = vadd.f32 %v2823_v39, %v2214_v30  ;;  %v2216_v45 = vpop.f32.mrf.mxu0  ;;  %3021 = vmatprep.mubr.bf16.mxu1 %v8814_v8 }
 0x238   :  { %v2825_v50 = vpop.f32.mrf.mxu1 }
 0x239   :  { %v2217_v2 = vpop.f32.mrf.mxu0  ;;  %v8815_v50 = vld [vmem:[#allocation2 + $0x560] ss:$16 sps:$4 sm:$0xff]  }
 0x23a   :  { %v2826_v13 = vpop.f32.mrf.mxu1 }
 0x23b   :  { %v9944_v61 = vadd.f32 %v2826_v13, %v2217_v2  ;;  %v2219_v40 = vpop.f32.mrf.mxu0  ;;  %v8818_v13 = vld [vmem:[#allocation2 + $0x568] ss:$16 sps:$4 sm:$0xff]  }
 0x23c   :  { %v2828_v24 = vpop.f32.mrf.mxu1  ;;  %v8823_v40 = vld [vmem:[#allocation2 + $0x584] ss:$16 sps:$4 sm:$0xff]  }
 0x23d   :  { %v2222_v26 = vpop.f32.mrf.mxu0  ;;  %2413 = vmatmul.mubr.bf16.gmra.mxu0 %v8809_v5 }
 0x23e   :  { %v2831_v57 = vpop.f32.mrf.mxu1  ;;  %3022 = vmatmul.mubr.bf16.gmra.mxu1 %v8812_v22  ;;  %2420 = vmatprep.mubr.bf16.mxu0 %v8817_v0 }
 0x23f   :  { %v9948_v8 = vadd.f32 %v2831_v57, %v2222_v26  ;;  %v2224_v30 = vpop.f32.mrf.mxu0  ;;  %3029 = vmatprep.mubr.bf16.mxu1 %v8820_v53 }
 0x240   :  { %v2833_v39 = vpop.f32.mrf.mxu1 }
 0x241   :  { %10985 = vst [vmem:[#allocation32_spill] sm:$0xff] %v9948_v8  ;;  %v2225_v45 = vpop.f32.mrf.mxu0  ;;  %v8821_v39 = vld [vmem:[#allocation2 + $0x580] ss:$16 sps:$4 sm:$0xff]   ;;  %v8934_v8 = vld [vmem:[#allocation2 + $0x7cc] ss:$16 sps:$4 sm:$0xff]  }
 0x242   :  { %v2834_v2 = vpop.f32.mrf.mxu1 }
 0x243   :  { %v9950_v21 = vadd.f32 %v2834_v2, %v2225_v45  ;;  %v2227_v24 = vpop.f32.mrf.mxu0  ;;  %v8824_v2 = vld [vmem:[#allocation2 + $0x588] ss:$16 sps:$4 sm:$0xff]  }
 0x244   :  { %v2836_v17 = vpop.f32.mrf.mxu1  ;;  %v8829_v24 = vld [vmem:[#allocation2 + $0x5a4] ss:$16 sps:$4 sm:$0xff]  }
 0x245   :  { %v2230_v22 = vpop.f32.mrf.mxu0  ;;  %2421 = vmatmul.mubr.bf16.gmra.mxu0 %v8815_v50 }
 0x246   :  { %v2839_v0 = vpop.f32.mrf.mxu1  ;;  %3030 = vmatmul.mubr.bf16.gmra.mxu1 %v8818_v13  ;;  %2428 = vmatprep.mubr.bf16.mxu0 %v8823_v40 }
 0x247   :  { %v9954_v53 = vadd.f32 %v2839_v0, %v2230_v22  ;;  %v2232_v26 = vpop.f32.mrf.mxu0  ;;  %3037 = vmatprep.mubr.bf16.mxu1 %v8826_v33 }
 0x248   :  { %v2841_v57 = vpop.f32.mrf.mxu1 }
 0x249   :  { %10986 = vst [vmem:[#allocation33_spill] sm:$0xff] %v9954_v53  ;;  %v2233_v30 = vpop.f32.mrf.mxu0  ;;  %v8827_v57 = vld [vmem:[#allocation2 + $0x5a0] ss:$16 sps:$4 sm:$0xff]   ;;  %v8880_v53 = vld [vmem:[#allocation2 + $0x6ac] ss:$16 sps:$4 sm:$0xff]  }
 0x24a   :  { %v2842_v45 = vpop.f32.mrf.mxu1 }
 0x24b   :  { %v9956_v43 = vadd.f32 %v2842_v45, %v2233_v30  ;;  %v2235_v17 = vpop.f32.mrf.mxu0  ;;  %v8830_v45 = vld [vmem:[#allocation2 + $0x5a8] ss:$16 sps:$4 sm:$0xff]  }
 0x24c   :  { %v2844_v5 = vpop.f32.mrf.mxu1  ;;  %v8835_v17 = vld [vmem:[#allocation2 + $0x5c4] ss:$16 sps:$4 sm:$0xff]  }
 0x24d   :  { %10987 = vst [vmem:[#allocation34_spill] sm:$0xff] %v9956_v43  ;;  %v2238_v13 = vpop.f32.mrf.mxu0  ;;  %2429 = vmatmul.mubr.bf16.gmra.mxu0 %v8821_v39 }
 0x24e   :  { %v2847_v40 = vpop.f32.mrf.mxu1  ;;  %3038 = vmatmul.mubr.bf16.gmra.mxu1 %v8824_v2  ;;  %2436 = vmatprep.mubr.bf16.mxu0 %v8829_v24 }
 0x24f   :  { %v9960_v33 = vadd.f32 %v2847_v40, %v2238_v13  ;;  %v2240_v22 = vpop.f32.mrf.mxu0  ;;  %3045 = vmatprep.mubr.bf16.mxu1 %v8832_v15 }
 0x250   :  { %v2849_v0 = vpop.f32.mrf.mxu1 }
 0x251   :  { %10988 = vst [vmem:[#allocation35_spill] sm:$0xff] %v9960_v33  ;;  %v2241_v26 = vpop.f32.mrf.mxu0  ;;  %v8833_v0 = vld [vmem:[#allocation2 + $0x5c0] ss:$16 sps:$4 sm:$0xff]   ;;  %v8874_v33 = vld [vmem:[#allocation2 + $0x68c] ss:$16 sps:$4 sm:$0xff]  }
 0x252   :  { %v2850_v30 = vpop.f32.mrf.mxu1 }
 0x253   :  { %v9962_v9 = vadd.f32 %v2850_v30, %v2241_v26  ;;  %v2243_v5 = vpop.f32.mrf.mxu0  ;;  %v8836_v30 = vld [vmem:[#allocation2 + $0x5c8] ss:$16 sps:$4 sm:$0xff]  }
 0x254   :  { %v2852_v50 = vpop.f32.mrf.mxu1  ;;  %v8841_v5 = vld [vmem:[#allocation2 + $0x5e4] ss:$16 sps:$4 sm:$0xff]  }
 0x255   :  { %10989 = vst [vmem:[#allocation36_spill] sm:$0xff] %v9962_v9  ;;  %v2246_v2 = vpop.f32.mrf.mxu0  ;;  %2437 = vmatmul.mubr.bf16.gmra.mxu0 %v8827_v57 }
 0x256   :  { %v2855_v24 = vpop.f32.mrf.mxu1  ;;  %3046 = vmatmul.mubr.bf16.gmra.mxu1 %v8830_v45  ;;  %2444 = vmatprep.mubr.bf16.mxu0 %v8835_v17 }
 0x257   :  { %v9966_v15 = vadd.f32 %v2855_v24, %v2246_v2  ;;  %v2248_v13 = vpop.f32.mrf.mxu0  ;;  %3053 = vmatprep.mubr.bf16.mxu1 %v8838_v63 }
 0x258   :  { %v2857_v40 = vpop.f32.mrf.mxu1 }
 0x259   :  { %10990 = vst [vmem:[#allocation37_spill] sm:$0xff] %v9966_v15  ;;  %v2249_v22 = vpop.f32.mrf.mxu0  ;;  %v8839_v40 = vld [vmem:[#allocation2 + $0x5e0] ss:$16 sps:$4 sm:$0xff]   ;;  %v8856_v15 = vld [vmem:[#allocation2 + $0x62c] ss:$16 sps:$4 sm:$0xff]  }
 0x25a   :  { %v2858_v26 = vpop.f32.mrf.mxu1 }
 0x25b   :  { %v9968_v42 = vadd.f32 %v2858_v26, %v2249_v22  ;;  %v2251_v50 = vpop.f32.mrf.mxu0  ;;  %v8842_v26 = vld [vmem:[#allocation2 + $0x5e8] ss:$16 sps:$4 sm:$0xff]  }
 0x25c   :  { %v2860_v39 = vpop.f32.mrf.mxu1  ;;  %v8847_v50 = vld [vmem:[#allocation2 + $0x604] ss:$16 sps:$4 sm:$0xff]  }
 0x25d   :  { %10991 = vst [vmem:[#allocation38_spill] sm:$0xff] %v9968_v42  ;;  %v2254_v45 = vpop.f32.mrf.mxu0  ;;  %2445 = vmatmul.mubr.bf16.gmra.mxu0 %v8833_v0 }
 0x25e   :  { %v2863_v17 = vpop.f32.mrf.mxu1  ;;  %3054 = vmatmul.mubr.bf16.gmra.mxu1 %v8836_v30  ;;  %2452 = vmatprep.mubr.bf16.mxu0 %v8841_v5 }
 0x25f   :  { %v9972_v63 = vadd.f32 %v2863_v17, %v2254_v45  ;;  %v2256_v2 = vpop.f32.mrf.mxu0  ;;  %3061 = vmatprep.mubr.bf16.mxu1 %v8844_v48 }
 0x260   :  { %v2865_v24 = vpop.f32.mrf.mxu1 }
 0x261   :  { %10992 = vst [vmem:[#allocation39_spill] sm:$0xff] %v9972_v63  ;;  %v2257_v13 = vpop.f32.mrf.mxu0  ;;  %v8845_v24 = vld [vmem:[#allocation2 + $0x600] ss:$16 sps:$4 sm:$0xff]  }
 0x262   :  { %v2866_v22 = vpop.f32.mrf.mxu1 }
 0x263   :  { %v9974_v14 = vadd.f32 %v2866_v22, %v2257_v13  ;;  %v2259_v39 = vpop.f32.mrf.mxu0  ;;  %v8848_v22 = vld [vmem:[#allocation2 + $0x608] ss:$16 sps:$4 sm:$0xff]  }
 0x264   :  { %v2868_v57 = vpop.f32.mrf.mxu1  ;;  %v8853_v39 = vld [vmem:[#allocation2 + $0x624] ss:$16 sps:$4 sm:$0xff]  }
 0x265   :  { %10993 = vst [vmem:[#allocation40_spill] sm:$0xff] %v9974_v14  ;;  %v2262_v30 = vpop.f32.mrf.mxu0  ;;  %2453 = vmatmul.mubr.bf16.gmra.mxu0 %v8839_v40  ;;  %v8862_v14 = vld [vmem:[#allocation2 + $0x64c] ss:$16 sps:$4 sm:$0xff]  }
 0x266   :  { %v2871_v5 = vpop.f32.mrf.mxu1  ;;  %3062 = vmatmul.mubr.bf16.gmra.mxu1 %v8842_v26  ;;  %2460 = vmatprep.mubr.bf16.mxu0 %v8847_v50 }
 0x267   :  { %v9978_v48 = vadd.f32 %v2871_v5, %v2262_v30  ;;  %v2264_v45 = vpop.f32.mrf.mxu0  ;;  %3069 = vmatprep.mubr.bf16.mxu1 %v8850_v32 }
 0x268   :  { %v2873_v17 = vpop.f32.mrf.mxu1 }
 0x269   :  { %10994 = vst [vmem:[#allocation41_spill] sm:$0xff] %v9978_v48  ;;  %v2265_v2 = vpop.f32.mrf.mxu0  ;;  %v8851_v17 = vld [vmem:[#allocation2 + $0x620] ss:$16 sps:$4 sm:$0xff]  }
 0x26a   :  { %v2874_v13 = vpop.f32.mrf.mxu1 }
 0x26b   :  { %v9980_v54 = vadd.f32 %v2874_v13, %v2265_v2  ;;  %v2267_v57 = vpop.f32.mrf.mxu0  ;;  %v8854_v13 = vld [vmem:[#allocation2 + $0x628] ss:$16 sps:$4 sm:$0xff]  }
 0x26c   :  { %v2876_v0 = vpop.f32.mrf.mxu1  ;;  %v8859_v57 = vld [vmem:[#allocation2 + $0x644] ss:$16 sps:$4 sm:$0xff]  }
 0x26d   :  { %10995 = vst [vmem:[#allocation42_spill] sm:$0xff] %v9980_v54  ;;  %v2270_v26 = vpop.f32.mrf.mxu0  ;;  %2461 = vmatmul.mubr.bf16.gmra.mxu0 %v8845_v24  ;;  %v8868_v54 = vld [vmem:[#allocation2 + $0x66c] ss:$16 sps:$4 sm:$0xff]  }
 0x26e   :  { %v2879_v50 = vpop.f32.mrf.mxu1  ;;  %3070 = vmatmul.mubr.bf16.gmra.mxu1 %v8848_v22  ;;  %2468 = vmatprep.mubr.bf16.mxu0 %v8853_v39 }
 0x26f   :  { %v9984_v32 = vadd.f32 %v2879_v50, %v2270_v26  ;;  %v2272_v30 = vpop.f32.mrf.mxu0  ;;  %3077 = vmatprep.mubr.bf16.mxu1 %v8856_v15 }
 0x270   :  { %v2881_v5 = vpop.f32.mrf.mxu1 }
 0x271   :  { %v2273_v45 = vpop.f32.mrf.mxu0  ;;  %v8857_v5 = vld [vmem:[#allocation2 + $0x640] ss:$16 sps:$4 sm:$0xff]  }
 0x272   :  { %v2882_v2 = vpop.f32.mrf.mxu1 }
 0x273   :  { %v9986_v63 = vadd.f32 %v2882_v2, %v2273_v45  ;;  %v2275_v0 = vpop.f32.mrf.mxu0  ;;  %v8860_v2 = vld [vmem:[#allocation2 + $0x648] ss:$16 sps:$4 sm:$0xff]  }
 0x274   :  { %v2884_v40 = vpop.f32.mrf.mxu1  ;;  %v8865_v0 = vld [vmem:[#allocation2 + $0x664] ss:$16 sps:$4 sm:$0xff]  }
 0x275   :  { %v2278_v22 = vpop.f32.mrf.mxu0  ;;  %2469 = vmatmul.mubr.bf16.gmra.mxu0 %v8851_v17 }
 0x276   :  { %v2887_v39 = vpop.f32.mrf.mxu1  ;;  %3078 = vmatmul.mubr.bf16.gmra.mxu1 %v8854_v13  ;;  %2476 = vmatprep.mubr.bf16.mxu0 %v8859_v57 }
 0x277   :  { %v9990_v15 = vadd.f32 %v2887_v39, %v2278_v22  ;;  %v2280_v26 = vpop.f32.mrf.mxu0  ;;  %3085 = vmatprep.mubr.bf16.mxu1 %v8862_v14 }
 0x278   :  { %v2889_v50 = vpop.f32.mrf.mxu1 }
 0x279   :  { %v2281_v30 = vpop.f32.mrf.mxu0  ;;  %v8863_v50 = vld [vmem:[#allocation2 + $0x660] ss:$16 sps:$4 sm:$0xff]  }
 0x27a   :  { %v2890_v45 = vpop.f32.mrf.mxu1 }
 0x27b   :  { %v9992_v48 = vadd.f32 %v2890_v45, %v2281_v30  ;;  %v2283_v40 = vpop.f32.mrf.mxu0  ;;  %v8866_v45 = vld [vmem:[#allocation2 + $0x668] ss:$16 sps:$4 sm:$0xff]  }
 0x27c   :  { %v2892_v24 = vpop.f32.mrf.mxu1  ;;  %v8871_v40 = vld [vmem:[#allocation2 + $0x684] ss:$16 sps:$4 sm:$0xff]  }
 0x27d   :  { %v2286_v13 = vpop.f32.mrf.mxu0  ;;  %2477 = vmatmul.mubr.bf16.gmra.mxu0 %v8857_v5 }
 0x27e   :  { %v2895_v57 = vpop.f32.mrf.mxu1  ;;  %3086 = vmatmul.mubr.bf16.gmra.mxu1 %v8860_v2  ;;  %2484 = vmatprep.mubr.bf16.mxu0 %v8865_v0 }
 0x27f   :  { %v9996_v14 = vadd.f32 %v2895_v57, %v2286_v13  ;;  %v2288_v22 = vpop.f32.mrf.mxu0  ;;  %3093 = vmatprep.mubr.bf16.mxu1 %v8868_v54 }
 0x280   :  { %v2897_v39 = vpop.f32.mrf.mxu1 }
 0x281   :  { %10996 = vst [vmem:[#allocation43_spill] sm:$0xff] %v9996_v14  ;;  %v2289_v26 = vpop.f32.mrf.mxu0  ;;  %v8869_v39 = vld [vmem:[#allocation2 + $0x680] ss:$16 sps:$4 sm:$0xff]   ;;  %v8886_v14 = vld [vmem:[#allocation2 + $0x6cc] ss:$16 sps:$4 sm:$0xff]  }
 0x282   :  { %v2898_v30 = vpop.f32.mrf.mxu1 }
 0x283   :  { %v9998_v42 = vadd.f32 %v2898_v30, %v2289_v26  ;;  %v2291_v24 = vpop.f32.mrf.mxu0  ;;  %v8872_v30 = vld [vmem:[#allocation2 + $0x688] ss:$16 sps:$4 sm:$0xff]  }
 0x284   :  { %v2900_v17 = vpop.f32.mrf.mxu1  ;;  %v8877_v24 = vld [vmem:[#allocation2 + $0x6a4] ss:$16 sps:$4 sm:$0xff]  }
 0x285   :  { %10997 = vst [vmem:[#allocation44_spill] sm:$0xff] %v9998_v42  ;;  %v2294_v2 = vpop.f32.mrf.mxu0  ;;  %2485 = vmatmul.mubr.bf16.gmra.mxu0 %v8863_v50 }
 0x286   :  { %v2903_v0 = vpop.f32.mrf.mxu1  ;;  %3094 = vmatmul.mubr.bf16.gmra.mxu1 %v8866_v45  ;;  %2492 = vmatprep.mubr.bf16.mxu0 %v8871_v40 }
 0x287   :  { %v10002_v54 = vadd.f32 %v2903_v0, %v2294_v2  ;;  %v2296_v13 = vpop.f32.mrf.mxu0  ;;  %3101 = vmatprep.mubr.bf16.mxu1 %v8874_v33 }
 0x288   :  { %v2905_v57 = vpop.f32.mrf.mxu1 }
 0x289   :  { %10998 = vst [vmem:[#allocation45_spill] sm:$0xff] %v10002_v54  ;;  %v2297_v22 = vpop.f32.mrf.mxu0  ;;  %v8875_v57 = vld [vmem:[#allocation2 + $0x6a0] ss:$16 sps:$4 sm:$0xff]  }
 0x28a   :  { %v2906_v26 = vpop.f32.mrf.mxu1 }
 0x28b   :  { %v10004_v9 = vadd.f32 %v2906_v26, %v2297_v22  ;;  %v2299_v17 = vpop.f32.mrf.mxu0  ;;  %v8878_v26 = vld [vmem:[#allocation2 + $0x6a8] ss:$16 sps:$4 sm:$0xff]  }
 0x28c   :  { %v2908_v5 = vpop.f32.mrf.mxu1  ;;  %v8883_v17 = vld [vmem:[#allocation2 + $0x6c4] ss:$16 sps:$4 sm:$0xff]  }
 0x28d   :  { %10999 = vst [vmem:[#allocation46_spill] sm:$0xff] %v10004_v9  ;;  %v2302_v45 = vpop.f32.mrf.mxu0  ;;  %2493 = vmatmul.mubr.bf16.gmra.mxu0 %v8869_v39  ;;  %v8892_v9 = vld [vmem:[#allocation2 + $0x6ec] ss:$16 sps:$4 sm:$0xff]  }
 0x28e   :  { %v2911_v40 = vpop.f32.mrf.mxu1  ;;  %3102 = vmatmul.mubr.bf16.gmra.mxu1 %v8872_v30  ;;  %2500 = vmatprep.mubr.bf16.mxu0 %v8877_v24 }
 0x28f   :  { %v10008_v33 = vadd.f32 %v2911_v40, %v2302_v45  ;;  %v2304_v2 = vpop.f32.mrf.mxu0  ;;  %3109 = vmatprep.mubr.bf16.mxu1 %v8880_v53 }
 0x290   :  { %v2913_v0 = vpop.f32.mrf.mxu1 }
 0x291   :  { %11000 = vst [vmem:[#allocation47_spill] sm:$0xff] %v10008_v33  ;;  %v2305_v13 = vpop.f32.mrf.mxu0  ;;  %v8881_v0 = vld [vmem:[#allocation2 + $0x6c0] ss:$16 sps:$4 sm:$0xff]  }
 0x292   :  { %v2914_v22 = vpop.f32.mrf.mxu1 }
 0x293   :  { %v10010_v43 = vadd.f32 %v2914_v22, %v2305_v13  ;;  %v2307_v5 = vpop.f32.mrf.mxu0  ;;  %v8884_v22 = vld [vmem:[#allocation2 + $0x6c8] ss:$16 sps:$4 sm:$0xff]  }
 0x294   :  { %v2916_v50 = vpop.f32.mrf.mxu1  ;;  %v8889_v5 = vld [vmem:[#allocation2 + $0x6e4] ss:$16 sps:$4 sm:$0xff]  }
 0x295   :  { %11001 = vst [vmem:[#allocation48_spill] sm:$0xff] %v10010_v43  ;;  %v2310_v30 = vpop.f32.mrf.mxu0  ;;  %2501 = vmatmul.mubr.bf16.gmra.mxu0 %v8875_v57  ;;  %v8898_v43 = vld [vmem:[#allocation2 + $0x70c] ss:$16 sps:$4 sm:$0xff]  }
 0x296   :  { %v2919_v24 = vpop.f32.mrf.mxu1  ;;  %3110 = vmatmul.mubr.bf16.gmra.mxu1 %v8878_v26  ;;  %2508 = vmatprep.mubr.bf16.mxu0 %v8883_v17 }
 0x297   :  { %v10014_v53 = vadd.f32 %v2919_v24, %v2310_v30  ;;  %v2312_v45 = vpop.f32.mrf.mxu0  ;;  %3117 = vmatprep.mubr.bf16.mxu1 %v8886_v14 }
 0x298   :  { %v2921_v40 = vpop.f32.mrf.mxu1 }
 0x299   :  { %11002 = vst [vmem:[#allocation49_spill] sm:$0xff] %v10014_v53  ;;  %v2313_v2 = vpop.f32.mrf.mxu0  ;;  %v8887_v40 = vld [vmem:[#allocation2 + $0x6e0] ss:$16 sps:$4 sm:$0xff]  }
 0x29a   :  { %v2922_v13 = vpop.f32.mrf.mxu1 }
 0x29b   :  { %v10016_v54 = vadd.f32 %v2922_v13, %v2313_v2  ;;  %v2315_v50 = vpop.f32.mrf.mxu0  ;;  %v8890_v13 = vld [vmem:[#allocation2 + $0x6e8] ss:$16 sps:$4 sm:$0xff]  }
 0x29c   :  { %v2924_v39 = vpop.f32.mrf.mxu1  ;;  %v8895_v50 = vld [vmem:[#allocation2 + $0x704] ss:$16 sps:$4 sm:$0xff]  }
 0x29d   :  { %11003 = vst [vmem:[#allocation50_spill] sm:$0xff] %v10016_v54  ;;  %v2318_v26 = vpop.f32.mrf.mxu0  ;;  %2509 = vmatmul.mubr.bf16.gmra.mxu0 %v8881_v0  ;;  %v8904_v54 = vld [vmem:[#allocation2 + $0x72c] ss:$16 sps:$4 sm:$0xff]  }
 0x29e   :  { %v2927_v17 = vpop.f32.mrf.mxu1  ;;  %3118 = vmatmul.mubr.bf16.gmra.mxu1 %v8884_v22  ;;  %2516 = vmatprep.mubr.bf16.mxu0 %v8889_v5 }
 0x29f   :  { %v10020_v14 = vadd.f32 %v2927_v17, %v2318_v26  ;;  %v2320_v30 = vpop.f32.mrf.mxu0  ;;  %3125 = vmatprep.mubr.bf16.mxu1 %v8892_v9 }
 0x2a0   :  { %v2929_v24 = vpop.f32.mrf.mxu1 }
 0x2a1   :  { %11004 = vst [vmem:[#allocation51_spill] sm:$0xff] %v10020_v14  ;;  %v2321_v45 = vpop.f32.mrf.mxu0  ;;  %v8893_v24 = vld [vmem:[#allocation2 + $0x700] ss:$16 sps:$4 sm:$0xff]  }
 0x2a2   :  { %v2930_v2 = vpop.f32.mrf.mxu1 }
 0x2a3   :  { %v10022_v33 = vadd.f32 %v2930_v2, %v2321_v45  ;;  %v2323_v39 = vpop.f32.mrf.mxu0  ;;  %v8896_v2 = vld [vmem:[#allocation2 + $0x708] ss:$16 sps:$4 sm:$0xff]  }
 0x2a4   :  { %v2932_v57 = vpop.f32.mrf.mxu1  ;;  %v8901_v39 = vld [vmem:[#allocation2 + $0x724] ss:$16 sps:$4 sm:$0xff]  }
 0x2a5   :  { %11005 = vst [vmem:[#allocation52_spill] sm:$0xff] %v10022_v33  ;;  %v2326_v22 = vpop.f32.mrf.mxu0  ;;  %2517 = vmatmul.mubr.bf16.gmra.mxu0 %v8887_v40  ;;  %v8910_v33 = vld [vmem:[#allocation2 + $0x74c] ss:$16 sps:$4 sm:$0xff]  }
 0x2a6   :  { %v2935_v5 = vpop.f32.mrf.mxu1  ;;  %3126 = vmatmul.mubr.bf16.gmra.mxu1 %v8890_v13  ;;  %2524 = vmatprep.mubr.bf16.mxu0 %v8895_v50 }
 0x2a7   :  { %v10026_v9 = vadd.f32 %v2935_v5, %v2326_v22  ;;  %v2328_v26 = vpop.f32.mrf.mxu0  ;;  %3133 = vmatprep.mubr.bf16.mxu1 %v8898_v43 }
 0x2a8   :  { %v2937_v17 = vpop.f32.mrf.mxu1 }
 0x2a9   :  { %11006 = vst [vmem:[#allocation53_spill] sm:$0xff] %v10026_v9  ;;  %v2329_v30 = vpop.f32.mrf.mxu0  ;;  %v8899_v17 = vld [vmem:[#allocation2 + $0x720] ss:$16 sps:$4 sm:$0xff]  }
 0x2aa   :  { %v2938_v45 = vpop.f32.mrf.mxu1 }
 0x2ab   :  { %v10028_v53 = vadd.f32 %v2938_v45, %v2329_v30  ;;  %v2331_v57 = vpop.f32.mrf.mxu0  ;;  %v8902_v45 = vld [vmem:[#allocation2 + $0x728] ss:$16 sps:$4 sm:$0xff]  }
 0x2ac   :  { %v2940_v0 = vpop.f32.mrf.mxu1  ;;  %v8907_v57 = vld [vmem:[#allocation2 + $0x744] ss:$16 sps:$4 sm:$0xff]  }
 0x2ad   :  { %11007 = vst [vmem:[#allocation54_spill] sm:$0xff] %v10028_v53  ;;  %v2334_v13 = vpop.f32.mrf.mxu0  ;;  %2525 = vmatmul.mubr.bf16.gmra.mxu0 %v8893_v24  ;;  %v8916_v53 = vld [vmem:[#allocation2 + $0x76c] ss:$16 sps:$4 sm:$0xff]  }
 0x2ae   :  { %v2943_v50 = vpop.f32.mrf.mxu1  ;;  %3134 = vmatmul.mubr.bf16.gmra.mxu1 %v8896_v2  ;;  %2532 = vmatprep.mubr.bf16.mxu0 %v8901_v39 }
 0x2af   :  { %v10032_v43 = vadd.f32 %v2943_v50, %v2334_v13  ;;  %v2336_v22 = vpop.f32.mrf.mxu0  ;;  %3141 = vmatprep.mubr.bf16.mxu1 %v8904_v54 }
 0x2b0   :  { %v2945_v5 = vpop.f32.mrf.mxu1 }
 0x2b1   :  { %11008 = vst [vmem:[#allocation55_spill] sm:$0xff] %v10032_v43  ;;  %v2337_v26 = vpop.f32.mrf.mxu0  ;;  %v8905_v5 = vld [vmem:[#allocation2 + $0x740] ss:$16 sps:$4 sm:$0xff]  }
 0x2b2   :  { %v2946_v30 = vpop.f32.mrf.mxu1 }
 0x2b3   :  { %v10034_v14 = vadd.f32 %v2946_v30, %v2337_v26  ;;  %v2339_v0 = vpop.f32.mrf.mxu0  ;;  %v8908_v30 = vld [vmem:[#allocation2 + $0x748] ss:$16 sps:$4 sm:$0xff]  }
 0x2b4   :  { %v2948_v40 = vpop.f32.mrf.mxu1  ;;  %v8913_v0 = vld [vmem:[#allocation2 + $0x764] ss:$16 sps:$4 sm:$0xff]  }
 0x2b5   :  { %11009 = vst [vmem:[#allocation56_spill] sm:$0xff] %v10034_v14  ;;  %v2342_v2 = vpop.f32.mrf.mxu0  ;;  %2533 = vmatmul.mubr.bf16.gmra.mxu0 %v8899_v17  ;;  %v8922_v14 = vld [vmem:[#allocation2 + $0x78c] ss:$16 sps:$4 sm:$0xff]  }
 0x2b6   :  { %v2951_v39 = vpop.f32.mrf.mxu1  ;;  %3142 = vmatmul.mubr.bf16.gmra.mxu1 %v8902_v45  ;;  %2540 = vmatprep.mubr.bf16.mxu0 %v8907_v57 }
 0x2b7   :  { %v10038_v54 = vadd.f32 %v2951_v39, %v2342_v2  ;;  %v2344_v13 = vpop.f32.mrf.mxu0  ;;  %3149 = vmatprep.mubr.bf16.mxu1 %v8910_v33 }
 0x2b8   :  { %v2953_v50 = vpop.f32.mrf.mxu1 }
 0x2b9   :  { %11010 = vst [vmem:[#allocation57_spill] sm:$0xff] %v10038_v54  ;;  %v2345_v22 = vpop.f32.mrf.mxu0  ;;  %v8911_v50 = vld [vmem:[#allocation2 + $0x760] ss:$16 sps:$4 sm:$0xff]  }
 0x2ba   :  { %v2954_v26 = vpop.f32.mrf.mxu1 }
 0x2bb   :  { %v10040_v9 = vadd.f32 %v2954_v26, %v2345_v22  ;;  %v2347_v40 = vpop.f32.mrf.mxu0  ;;  %v8914_v26 = vld [vmem:[#allocation2 + $0x768] ss:$16 sps:$4 sm:$0xff]  }
 0x2bc   :  { %v2956_v24 = vpop.f32.mrf.mxu1  ;;  %v8919_v40 = vld [vmem:[#allocation2 + $0x784] ss:$16 sps:$4 sm:$0xff]  }
 0x2bd   :  { %11011 = vst [vmem:[#allocation58_spill] sm:$0xff] %v10040_v9  ;;  %v2350_v45 = vpop.f32.mrf.mxu0  ;;  %2541 = vmatmul.mubr.bf16.gmra.mxu0 %v8905_v5  ;;  %v8923_v9 = vld [vmem:[#allocation2 + $0x7a0] ss:$16 sps:$4 sm:$0xff]  }
 0x2be   :  { %v2959_v57 = vpop.f32.mrf.mxu1  ;;  %3150 = vmatmul.mubr.bf16.gmra.mxu1 %v8908_v30  ;;  %2548 = vmatprep.mubr.bf16.mxu0 %v8913_v0 }
 0x2bf   :  { %v10044_v33 = vadd.f32 %v2959_v57, %v2350_v45  ;;  %v2352_v2 = vpop.f32.mrf.mxu0  ;;  %3157 = vmatprep.mubr.bf16.mxu1 %v8916_v53  ;;  %v3543_v57 = vld [vmem:[#allocation5 + $0x4] sm:$0x3] }
 0x2c0   :  { %v2961_v39 = vpop.f32.mrf.mxu1  ;;  %v3693_v2 = vld [vmem:[#allocation5 + $0x6] sm:$0x3] }
 0x2c1   :  { %11012 = vst [vmem:[#allocation59_spill] sm:$0xff] %v10044_v33  ;;  %v2353_v13 = vpop.f32.mrf.mxu0  ;;  %v8925_v33 = vld [vmem:[#allocation2 + $0x7a4] ss:$16 sps:$4 sm:$0xff]  }
 0x2c2   :  { %v2962_v22 = vpop.f32.mrf.mxu1 }
 0x2c3   :  { %v10046_v43 = vadd.f32 %v2962_v22, %v2353_v13  ;;  %v2355_v24 = vpop.f32.mrf.mxu0  ;;  %v10053_v13 = vand.u32 %v3543_v57, %v9834_v37 }
 0x2c4   :  { %v2964_v17 = vpop.f32.mrf.mxu1  ;;  %v8917_v24 = vld [vmem:[#allocation2 + $0x780] ss:$16 sps:$4 sm:$0xff]  }
 0x2c5   :  { %11013 = vst [vmem:[#allocation60_spill] sm:$0xff] %v10046_v43  ;;  %v2358_v30 = vpop.f32.mrf.mxu0  ;;  %2549 = vmatmul.mubr.bf16.gmra.mxu0 %v8911_v50  ;;  %v10056_v17 = vand.u32 %v3693_v2, %v9834_v37  ;;  %v8920_v50 = vld [vmem:[#allocation2 + $0x788] ss:$16 sps:$4 sm:$0xff]   ;;  %8133 = vmatprep.subr.bf16.mxu0 %v10053_v13 }
 0x2c6   :  { %v2967_v0 = vpop.f32.mrf.mxu1  ;;  %3158 = vmatmul.mubr.bf16.gmra.mxu1 %v8914_v26  ;;  %2556 = vmatprep.mubr.bf16.mxu0 %v8919_v40  ;;  %v8928_v40 = vld [vmem:[#allocation2 + $0x7ac] ss:$16 sps:$4 sm:$0xff]  }
 0x2c7   :  { %v10050_v53 = vadd.f32 %v2967_v0, %v2358_v30  ;;  %v2360_v45 = vpop.f32.mrf.mxu0  ;;  %3165 = vmatprep.mubr.bf16.mxu1 %v8922_v14  ;;  %8151 = vmatprep.subr.bf16.mxu1 %v10056_v17 }
 0x2c8   :  { %v2969_v39 = vpop.f32.mrf.mxu1 }
 0x2c9   :  { %11014 = vst [vmem:[#allocation61_spill] sm:$0xff] %v10050_v53  ;;  %v2361_v22 = vpop.f32.mrf.mxu0 }
 0x2ca   :  { %v2970_v5 = vpop.f32.mrf.mxu1 }
 0x2cb   :  { %v10060_v26 = vadd.f32 %v2970_v5, %v2361_v22  ;;  %v2363_v14 = vpop.f32.mrf.mxu0  ;;  %v8926_v22 = vld [vmem:[#allocation2 + $0x7a8] ss:$16 sps:$4 sm:$0xff]  }
 0x2cc   :  { %v2972_v30 = vpop.f32.mrf.mxu1  ;;  %v8931_v14 = vld [vmem:[#allocation2 + $0x7c4] ss:$16 sps:$4 sm:$0xff]  }
 0x2cd   :  { %11015 = vst [vmem:[#allocation62_spill] sm:$0xff] %v10060_v26  ;;  %v2366_v45 = vpop.f32.mrf.mxu0  ;;  %2557 = vmatmul.mubr.bf16.gmra.mxu0 %v8917_v24  ;;  %v8940_v26 = vld [vmem:[#allocation2 + $0x7ec] ss:$16 sps:$4 sm:$0xff]  }
 0x2ce   :  { %v2975_v57 = vpop.f32.mrf.mxu1  ;;  %3166 = vmatmul.mubr.bf16.gmra.mxu1 %v8920_v50  ;;  %2564 = vmatprep.mubr.bf16.mxu0 %v8925_v33 }
 0x2cf   :  { %v10064_v2 = vadd.f32 %v2975_v57, %v2366_v45  ;;  %v2368_v39 = vpop.f32.mrf.mxu0  ;;  %3173 = vmatprep.mubr.bf16.mxu1 %v8928_v40 }
 0x2d0   :  { %v2977_v43 = vpop.f32.mrf.mxu1  ;;  %v8929_v39 = vld [vmem:[#allocation2 + $0x7c0] ss:$16 sps:$4 sm:$0xff]  }
 0x2d1   :  { %11016 = vst [vmem:[#allocation63_spill] sm:$0xff] %v10064_v2  ;;  %v2369_v54 = vpop.f32.mrf.mxu0 }
 0x2d2   :  { %v2978_v5 = vpop.f32.mrf.mxu1 }
 0x2d3   :  { %v10066_v42 = vadd.f32 %v2978_v5, %v2369_v54  ;;  %v2371_v30 = vpop.f32.mrf.mxu0  ;;  %v8932_v5 = vld [vmem:[#allocation2 + $0x7c8] ss:$16 sps:$4 sm:$0xff]  }
 0x2d4   :  { %v2980_v0 = vpop.f32.mrf.mxu1  ;;  %v8937_v30 = vld [vmem:[#allocation2 + $0x7e4] ss:$16 sps:$4 sm:$0xff]  }
 0x2d5   :  { %11017 = vst [vmem:[#allocation64_spill] sm:$0xff] %v10066_v42  ;;  %v2374_v50 = vpop.f32.mrf.mxu0  ;;  %2565 = vmatmul.mubr.bf16.gmra.mxu0 %v8923_v9  ;;  %v8946_v42 = vld [vmem:[#allocation2 + $0x80c] ss:$16 sps:$4 sm:$0xff]  }
 0x2d6   :  { %v2983_v33 = vpop.f32.mrf.mxu1  ;;  %3174 = vmatmul.mubr.bf16.gmra.mxu1 %v8926_v22  ;;  %2572 = vmatprep.mubr.bf16.mxu0 %v8931_v14 }
 0x2d7   :  { %v10070_v40 = vadd.f32 %v2983_v33, %v2374_v50  ;;  %v2376_v43 = vpop.f32.mrf.mxu0  ;;  %3181 = vmatprep.mubr.bf16.mxu1 %v8934_v8 }
 0x2d8   :  { %v2985_v45 = vpop.f32.mrf.mxu1 }
 0x2d9   :  { %11018 = vst [vmem:[#allocation65_spill] sm:$0xff] %v10070_v40  ;;  %v2377_v57 = vpop.f32.mrf.mxu0  ;;  %v8935_v45 = vld [vmem:[#allocation2 + $0x7e0] ss:$16 sps:$4 sm:$0xff]  }
 0x2da   :  { %v2986_v54 = vpop.f32.mrf.mxu1 }
 0x2db   :  { %v10072_v53 = vadd.f32 %v2986_v54, %v2377_v57  ;;  %v2379_v0 = vpop.f32.mrf.mxu0  ;;  %v8938_v54 = vld [vmem:[#allocation2 + $0x7e8] ss:$16 sps:$4 sm:$0xff]  }
 0x2dc   :  { %v2988_v24 = vpop.f32.mrf.mxu1  ;;  %v8943_v0 = vld [vmem:[#allocation2 + $0x804] ss:$16 sps:$4 sm:$0xff]  }
 0x2dd   :  { %11019 = vst [vmem:[#allocation66_spill] sm:$0xff] %v10072_v53  ;;  %v2382_v22 = vpop.f32.mrf.mxu0  ;;  %2573 = vmatmul.mubr.bf16.gmra.mxu0 %v8929_v39  ;;  %v8952_v53 = vld [vmem:[#allocation2 + $0x82c] ss:$16 sps:$4 sm:$0xff]  }
 0x2de   :  { %v2991_v14 = vpop.f32.mrf.mxu1  ;;  %3182 = vmatmul.mubr.bf16.gmra.mxu1 %v8932_v5  ;;  %2580 = vmatprep.mubr.bf16.mxu0 %v8937_v30 }
 0x2df   :  { %v10076_v8 = vadd.f32 %v2991_v14, %v2382_v22  ;;  %v2384_v50 = vpop.f32.mrf.mxu0  ;;  %3189 = vmatprep.mubr.bf16.mxu1 %v8940_v26 }
 0x2e0   :  { %v2993_v33 = vpop.f32.mrf.mxu1 }
 0x2e1   :  { %11020 = vst [vmem:[#allocation67_spill] sm:$0xff] %v10076_v8  ;;  %v2385_v43 = vpop.f32.mrf.mxu0  ;;  %v8941_v33 = vld [vmem:[#allocation2 + $0x800] ss:$16 sps:$4 sm:$0xff]  }
 0x2e2   :  { %v2994_v57 = vpop.f32.mrf.mxu1 }
 0x2e3   :  { %v10078_v2 = vadd.f32 %v2994_v57, %v2385_v43  ;;  %v2387_v24 = vpop.f32.mrf.mxu0  ;;  %v8944_v57 = vld [vmem:[#allocation2 + $0x808] ss:$16 sps:$4 sm:$0xff]  }
 0x2e4   :  { %v2996_v9 = vpop.f32.mrf.mxu1  ;;  %v8949_v24 = vld [vmem:[#allocation2 + $0x824] ss:$16 sps:$4 sm:$0xff]  }
 0x2e5   :  { %11021 = vst [vmem:[#allocation68_spill] sm:$0xff] %v10078_v2  ;;  %v2390_v5 = vpop.f32.mrf.mxu0  ;;  %2581 = vmatmul.mubr.bf16.gmra.mxu0 %v8935_v45  ;;  %v8958_v2 = vld [vmem:[#allocation2 + $0x84c] ss:$16 sps:$4 sm:$0xff]  }
 0x2e6   :  { %v2999_v30 = vpop.f32.mrf.mxu1  ;;  %3190 = vmatmul.mubr.bf16.gmra.mxu1 %v8938_v54  ;;  %2588 = vmatprep.mubr.bf16.mxu0 %v8943_v0 }
 0x2e7   :  { %v10082_v26 = vadd.f32 %v2999_v30, %v2390_v5  ;;  %v2392_v22 = vpop.f32.mrf.mxu0  ;;  %3197 = vmatprep.mubr.bf16.mxu1 %v8946_v42 }
 0x2e8   :  { %v3001_v14 = vpop.f32.mrf.mxu1 }
 0x2e9   :  { %11022 = vst [vmem:[#allocation69_spill] sm:$0xff] %v10082_v26  ;;  %v2393_v50 = vpop.f32.mrf.mxu0  ;;  %v8947_v14 = vld [vmem:[#allocation2 + $0x820] ss:$16 sps:$4 sm:$0xff]  }
 0x2ea   :  { %v3002_v43 = vpop.f32.mrf.mxu1 }
 0x2eb   :  { %v10084_v40 = vadd.f32 %v3002_v43, %v2393_v50  ;;  %v2395_v9 = vpop.f32.mrf.mxu0  ;;  %v8950_v43 = vld [vmem:[#allocation2 + $0x828] ss:$16 sps:$4 sm:$0xff]  }
 0x2ec   :  { %v3004_v39 = vpop.f32.mrf.mxu1  ;;  %v8955_v9 = vld [vmem:[#allocation2 + $0x844] ss:$16 sps:$4 sm:$0xff]  }
 0x2ed   :  { %11023 = vst [vmem:[#allocation70_spill] sm:$0xff] %v10084_v40  ;;  %v2398_v54 = vpop.f32.mrf.mxu0  ;;  %2589 = vmatmul.mubr.bf16.gmra.mxu0 %v8941_v33  ;;  %v8964_v40 = vld [vmem:[#allocation2 + $0x86c] ss:$16 sps:$4 sm:$0xff]  }
 0x2ee   :  { %v3007_v0 = vpop.f32.mrf.mxu1  ;;  %3198 = vmatmul.mubr.bf16.gmra.mxu1 %v8944_v57  ;;  %2596 = vmatprep.mubr.bf16.mxu0 %v8949_v24 }
 0x2ef   :  { %v10088_v42 = vadd.f32 %v3007_v0, %v2398_v54  ;;  %v2400_v5 = vpop.f32.mrf.mxu0  ;;  %3205 = vmatprep.mubr.bf16.mxu1 %v8952_v53 }
 0x2f0   :  { %v3009_v30 = vpop.f32.mrf.mxu1 }
 0x2f1   :  { %11024 = vst [vmem:[#allocation71_spill] sm:$0xff] %v10088_v42  ;;  %v2401_v22 = vpop.f32.mrf.mxu0  ;;  %v8953_v30 = vld [vmem:[#allocation2 + $0x840] ss:$16 sps:$4 sm:$0xff]  }
 0x2f2   :  { %v3010_v50 = vpop.f32.mrf.mxu1 }
 0x2f3   :  { %v10090_v8 = vadd.f32 %v3010_v50, %v2401_v22  ;;  %v2403_v39 = vpop.f32.mrf.mxu0  ;;  %v8956_v50 = vld [vmem:[#allocation2 + $0x848] ss:$16 sps:$4 sm:$0xff]  }
 0x2f4   :  { %v3012_v45 = vpop.f32.mrf.mxu1  ;;  %v8961_v39 = vld [vmem:[#allocation2 + $0x864] ss:$16 sps:$4 sm:$0xff]  }
 0x2f5   :  { %11025 = vst [vmem:[#allocation72_spill] sm:$0xff] %v10090_v8  ;;  %v2406_v57 = vpop.f32.mrf.mxu0  ;;  %2597 = vmatmul.mubr.bf16.gmra.mxu0 %v8947_v14  ;;  %v8970_v8 = vld [vmem:[#allocation2 + $0x88c] ss:$16 sps:$4 sm:$0xff]  }
 0x2f6   :  { %v3015_v24 = vpop.f32.mrf.mxu1  ;;  %3206 = vmatmul.mubr.bf16.gmra.mxu1 %v8950_v43  ;;  %2604 = vmatprep.mubr.bf16.mxu0 %v8955_v9 }
 0x2f7   :  { %v10094_v53 = vadd.f32 %v3015_v24, %v2406_v57  ;;  %v2408_v54 = vpop.f32.mrf.mxu0  ;;  %3213 = vmatprep.mubr.bf16.mxu1 %v8958_v2 }
 0x2f8   :  { %v3017_v0 = vpop.f32.mrf.mxu1 }
 0x2f9   :  { %11026 = vst [vmem:[#allocation73_spill] sm:$0xff] %v10094_v53  ;;  %v2409_v5 = vpop.f32.mrf.mxu0  ;;  %v8959_v0 = vld [vmem:[#allocation2 + $0x860] ss:$16 sps:$4 sm:$0xff]  }
 0x2fa   :  { %v3018_v22 = vpop.f32.mrf.mxu1 }
 0x2fb   :  { %v10096_v26 = vadd.f32 %v3018_v22, %v2409_v5  ;;  %v2411_v45 = vpop.f32.mrf.mxu0  ;;  %v8962_v22 = vld [vmem:[#allocation2 + $0x868] ss:$16 sps:$4 sm:$0xff]  }
 0x2fc   :  { %v3020_v33 = vpop.f32.mrf.mxu1  ;;  %v8967_v45 = vld [vmem:[#allocation2 + $0x884] ss:$16 sps:$4 sm:$0xff]  }
 0x2fd   :  { %11027 = vst [vmem:[#allocation74_spill] sm:$0xff] %v10096_v26  ;;  %v2414_v43 = vpop.f32.mrf.mxu0  ;;  %2605 = vmatmul.mubr.bf16.gmra.mxu0 %v8953_v30  ;;  %v8976_v26 = vld [vmem:[#allocation2 + $0x8ac] ss:$16 sps:$4 sm:$0xff]  }
 0x2fe   :  { %v3023_v9 = vpop.f32.mrf.mxu1  ;;  %3214 = vmatmul.mubr.bf16.gmra.mxu1 %v8956_v50  ;;  %2612 = vmatprep.mubr.bf16.mxu0 %v8961_v39 }
 0x2ff   :  { %v10100_v2 = vadd.f32 %v3023_v9, %v2414_v43  ;;  %v2416_v57 = vpop.f32.mrf.mxu0  ;;  %3221 = vmatprep.mubr.bf16.mxu1 %v8964_v40 }
 0x300   :  { %v3025_v24 = vpop.f32.mrf.mxu1 }
 0x301   :  { %11028 = vst [vmem:[#allocation75_spill] sm:$0xff] %v10100_v2  ;;  %v2417_v54 = vpop.f32.mrf.mxu0  ;;  %v8965_v24 = vld [vmem:[#allocation2 + $0x880] ss:$16 sps:$4 sm:$0xff]  }
 0x302   :  { %v3026_v5 = vpop.f32.mrf.mxu1 }
 0x303   :  { %v10102_v42 = vadd.f32 %v3026_v5, %v2417_v54  ;;  %v2419_v33 = vpop.f32.mrf.mxu0  ;;  %v8968_v5 = vld [vmem:[#allocation2 + $0x888] ss:$16 sps:$4 sm:$0xff]  }
 0x304   :  { %v3028_v14 = vpop.f32.mrf.mxu1  ;;  %v8973_v33 = vld [vmem:[#allocation2 + $0x8a4] ss:$16 sps:$4 sm:$0xff]  }
 0x305   :  { %11029 = vst [vmem:[#allocation76_spill] sm:$0xff] %v10102_v42  ;;  %v2422_v50 = vpop.f32.mrf.mxu0  ;;  %2613 = vmatmul.mubr.bf16.gmra.mxu0 %v8959_v0  ;;  %v8982_v42 = vld [vmem:[#allocation2 + $0x8cc] ss:$16 sps:$4 sm:$0xff]  }
 0x306   :  { %v3031_v39 = vpop.f32.mrf.mxu1  ;;  %3222 = vmatmul.mubr.bf16.gmra.mxu1 %v8962_v22  ;;  %2620 = vmatprep.mubr.bf16.mxu0 %v8967_v45 }
 0x307   :  { %v10106_v40 = vadd.f32 %v3031_v39, %v2422_v50  ;;  %v2424_v43 = vpop.f32.mrf.mxu0  ;;  %3229 = vmatprep.mubr.bf16.mxu1 %v8970_v8 }
 0x308   :  { %v3033_v9 = vpop.f32.mrf.mxu1 }
 0x309   :  { %11030 = vst [vmem:[#allocation77_spill] sm:$0xff] %v10106_v40  ;;  %v2425_v57 = vpop.f32.mrf.mxu0  ;;  %v8971_v9 = vld [vmem:[#allocation2 + $0x8a0] ss:$16 sps:$4 sm:$0xff]  }
 0x30a   :  { %v3034_v54 = vpop.f32.mrf.mxu1 }
 0x30b   :  { %v10108_v53 = vadd.f32 %v3034_v54, %v2425_v57  ;;  %v2427_v14 = vpop.f32.mrf.mxu0  ;;  %v8974_v54 = vld [vmem:[#allocation2 + $0x8a8] ss:$16 sps:$4 sm:$0xff]  }
 0x30c   :  { %v3036_v30 = vpop.f32.mrf.mxu1  ;;  %v8979_v14 = vld [vmem:[#allocation2 + $0x8c4] ss:$16 sps:$4 sm:$0xff]  }
 0x30d   :  { %11031 = vst [vmem:[#allocation78_spill] sm:$0xff] %v10108_v53  ;;  %v2430_v22 = vpop.f32.mrf.mxu0  ;;  %2621 = vmatmul.mubr.bf16.gmra.mxu0 %v8965_v24  ;;  %v8988_v53 = vld [vmem:[#allocation2 + $0x8ec] ss:$16 sps:$4 sm:$0xff]  }
 0x30e   :  { %v3039_v45 = vpop.f32.mrf.mxu1  ;;  %3230 = vmatmul.mubr.bf16.gmra.mxu1 %v8968_v5  ;;  %2628 = vmatprep.mubr.bf16.mxu0 %v8973_v33 }
 0x30f   :  { %v10112_v8 = vadd.f32 %v3039_v45, %v2430_v22  ;;  %v2432_v50 = vpop.f32.mrf.mxu0  ;;  %3237 = vmatprep.mubr.bf16.mxu1 %v8976_v26 }
 0x310   :  { %v3041_v39 = vpop.f32.mrf.mxu1 }
 0x311   :  { %11032 = vst [vmem:[#allocation79_spill] sm:$0xff] %v10112_v8  ;;  %v2433_v43 = vpop.f32.mrf.mxu0  ;;  %v8977_v39 = vld [vmem:[#allocation2 + $0x8c0] ss:$16 sps:$4 sm:$0xff]  }
 0x312   :  { %v3042_v57 = vpop.f32.mrf.mxu1 }
 0x313   :  { %v10114_v2 = vadd.f32 %v3042_v57, %v2433_v43  ;;  %v2435_v30 = vpop.f32.mrf.mxu0  ;;  %v8980_v57 = vld [vmem:[#allocation2 + $0x8c8] ss:$16 sps:$4 sm:$0xff]  }
 0x314   :  { %v3044_v0 = vpop.f32.mrf.mxu1  ;;  %v8985_v30 = vld [vmem:[#allocation2 + $0x8e4] ss:$16 sps:$4 sm:$0xff]  }
 0x315   :  { %v2438_v5 = vpop.f32.mrf.mxu0  ;;  %2629 = vmatmul.mubr.bf16.gmra.mxu0 %v8971_v9 }
 0x316   :  { %v3047_v33 = vpop.f32.mrf.mxu1  ;;  %3238 = vmatmul.mubr.bf16.gmra.mxu1 %v8974_v54  ;;  %2636 = vmatprep.mubr.bf16.mxu0 %v8979_v14 }
 0x317   :  { %v10118_v26 = vadd.f32 %v3047_v33, %v2438_v5  ;;  %v2440_v22 = vpop.f32.mrf.mxu0  ;;  %3245 = vmatprep.mubr.bf16.mxu1 %v8982_v42 }
 0x318   :  { %v3049_v45 = vpop.f32.mrf.mxu1 }
 0x319   :  { %v2441_v50 = vpop.f32.mrf.mxu0  ;;  %v8983_v45 = vld [vmem:[#allocation2 + $0x8e0] ss:$16 sps:$4 sm:$0xff]  }
 0x31a   :  { %v3050_v43 = vpop.f32.mrf.mxu1 }
 0x31b   :  { %v10120_v40 = vadd.f32 %v3050_v43, %v2441_v50  ;;  %v2443_v0 = vpop.f32.mrf.mxu0  ;;  %v8986_v43 = vld [vmem:[#allocation2 + $0x8e8] ss:$16 sps:$4 sm:$0xff]  }
 0x31c   :  { %v3052_v24 = vpop.f32.mrf.mxu1 }
 0x31d   :  { %v2446_v54 = vpop.f32.mrf.mxu0  ;;  %2637 = vmatmul.mubr.bf16.gmra.mxu0 %v8977_v39 }
 0x31e   :  { %v3055_v14 = vpop.f32.mrf.mxu1  ;;  %3246 = vmatmul.mubr.bf16.gmra.mxu1 %v8980_v57  ;;  %2644 = vmatprep.mubr.bf16.mxu0 %v8985_v30 }
 0x31f   :  { %v10124_v42 = vadd.f32 %v3055_v14, %v2446_v54  ;;  %v2448_v5 = vpop.f32.mrf.mxu0  ;;  %3253 = vmatprep.mubr.bf16.mxu1 %v8988_v53  ;;  %v11033_v53 = vpack.c.bf16 %v9890_v46, %v9888_v34  ;;  %v11034_v54 = vpack.c.bf16 %v9842_v28, %v9840_v20  ;;  %v11035_v20 = vpack.c.bf16 %v9896_v7, %v9894_v58 }
 0x320   :  { %v3057_v33 = vpop.f32.mrf.mxu1  ;;  %v11038_v58 = vpack.c.bf16 %v9854_v59, %v9852_v51 }
 0x321   :  { %v2449_v22 = vpop.f32.mrf.mxu0  ;;  %v3843_v33 = vld [vmem:[#allocation5 + $0x8] sm:$0x3] }
 0x322   :  { %v3058_v50 = vpop.f32.mrf.mxu1  ;;  %v10143_v34 = vand.u32 %v3843_v33, %v9834_v37  ;;  %v11040_v33 = vpack.c.bf16 %v9860_v11, %v9858_v3 }
 0x323   :  { %v10126_v0 = vadd.f32 %v3058_v50, %v2449_v22  ;;  %v2451_v24 = vpop.f32.mrf.mxu0 }
 0x324   :  { %v3060_v8 = vpop.f32.mrf.mxu1 }
 0x325   :  { %v3990_v39 = vpack.c.bf16 %v10126_v0, %v10124_v42  ;;  %v2454_v9 = vpop.f32.mrf.mxu0  ;;  %2645 = vmatmul.mubr.bf16.gmra.mxu0 %v8983_v45  ;;  %v3993_v45 = vld [vmem:[#allocation5 + $0xa] sm:$0x3] }
 0x326   :  { %v3063_v57 = vpop.f32.mrf.mxu1  ;;  %3254 = vmatmul.mubr.bf16.gmra.mxu1 %v8986_v43  ;;  %8099 = vmatprep.mubr.msk.bf16.mxu0 %vm3281_vm2, %v11033_v53  ;;  %v10152_v28 = vand.u32 %v3993_v45, %v9834_v37  ;;  %v11036_v53 = vpack.c.bf16 %v9848_v44, %v9846_v35 }
 0x327   :  { %v10134_v30 = vadd.f32 %v3063_v57, %v2454_v9  ;;  %8117 = vmatprep.mubr.msk.bf16.mxu1 %vm3281_vm2, %v11034_v54  ;;  %v2456_v8 = vpop.f32.mrf.mxu0  ;;  %v11037_v54 = vpack.c.bf16 %v9902_v36, %v9900_v19 }
 0x328   :  { %v3065_v14 = vpop.f32.mrf.mxu1 }
 0x329   :  { %v2457_v5 = vpop.f32.mrf.mxu0 }
 0x32a   :  { %v3066_v22 = vpop.f32.mrf.mxu1 }
 0x32b   :  { %v10140_v50 = vadd.f32 %v3066_v22, %v2457_v5  ;;  %v2459_v43 = vpop.f32.mrf.mxu0  ;;  %v11041_v22 = vpack.c.bf16 %v9914_v31, %v9912_v16 }
 0x32c   :  { %v3068_v24 = vpop.f32.mrf.mxu1  ;;  %v11042_v43 = vpack.c.bf16 %v9866_v27, %v9864_v18  ;;  %v11044_v27 = vpack.c.bf16 %v9872_v47, %v9870_v38 }
 0x32d   :  { %v3991_v46 = vpack.c.bf16 %v10140_v50, %v10134_v30  ;;  %v2462_v9 = vpop.f32.mrf.mxu0  ;;  %8100 = vmatmul.mubr.msk.bf16.vlgmr.msra.gmra.mxu0 %vm3281_vm2, %v11035_v20 }
 0x32e   :  { %v3071_v57 = vpop.f32.mrf.mxu1  ;;  %8118 = vmatmul.mubr.msk.bf16.vlgmr.msra.gmra.mxu1 %vm3281_vm2, %v11036_v53  ;;  %8103 = vmatprep.mubr.msk.bf16.mxu0 %vm3281_vm2, %v11037_v54  ;;  %v11045_v53 = vpack.c.bf16 %v9926_v55, %v9924_v25 }
 0x32f   :  { %v10162_v8 = vadd.f32 %v3071_v57, %v2462_v9  ;;  %8121 = vmatprep.mubr.msk.bf16.mxu1 %vm3281_vm2, %v11038_v58  ;;  %v2464_v7 = vpop.f32.mrf.mxu0  ;;  %8134 = vmatpush3.bf16.msra.mxu0 %v10053_v13  ;;  %v11039_v13 = vpack.c.bf16 %v9908_v1, %v9906_v49  ;;  %v11043_v57 = vpack.c.bf16 %v9920_v6, %v9918_v52 }
 0x330   :  { %v3073_v14 = vpop.f32.mrf.mxu1  ;;  %8152 = vmatpush3.bf16.msra.mxu1 %v10056_v17  ;;  %8169 = vmatprep.subr.bf16.mxu0 %v10143_v34  ;;  %v11046_v58 = vpack.c.bf16 %v9878_v4, %v9876_v56  ;;  %v11048_v4 = vpack.c.bf16 %v9884_v23, %v9882_v12  ;;  %v4293_v12 = vld [vmem:[#allocation5 + $0xe] sm:$0x3] }
 0x331   :  { %v2465_v35 = vpop.f32.mrf.mxu0  ;;  %8187 = vmatprep.subr.bf16.mxu1 %v10152_v28 }
 0x332   :  { %v3074_v44 = vpop.f32.mrf.mxu1 }
 0x333   :  { %v10172_v19 = vadd.f32 %v3074_v44, %v2465_v35  ;;  %v2467_v36 = vpop.f32.mrf.mxu0  ;;  %v11047_v44 = vpack.c.bf16 %v9932_v41, %v9930_v10 }
 0x334   :  { %v3076_v5 = vpop.f32.mrf.mxu1  ;;  %v11049_v36 = vpack.c.bf16 %v9938_v29, %v9936_v60 }
 0x335   :  { %v4134_v51 = vpack.c.bf16 %v10172_v19, %v10162_v8  ;;  %v2470_v59 = vpop.f32.mrf.mxu0  ;;  %8104 = vmatmul.mubr.msk.bf16.gmra.mxu0 %vm3281_vm2, %v11039_v13 }
 0x336   :  { %v3079_v17 = vpop.f32.mrf.mxu1  ;;  %8122 = vmatmul.mubr.msk.bf16.gmra.mxu1 %vm3281_vm2, %v11040_v33  ;;  %8107 = vmatprep.mubr.msk.bf16.mxu0 %vm3281_vm2, %v11041_v22 }
 0x337   :  { %v10188_v45 = vadd.f32 %v3079_v17, %v2470_v59  ;;  %8125 = vmatprep.mubr.msk.bf16.mxu1 %vm3281_vm2, %v11042_v43  ;;  %v2472_v49 = vpop.f32.mrf.mxu0  ;;  %v11050_v59 = vpack.c.bf16 %v9986_v63, %v9984_v32  ;;  %v4143_v17 = vld [vmem:[#allocation5 + $0xc] sm:$0x3]  ;;  %v11051_v63 = vpack.c.bf16 %v9944_v61, %v9942_v62  ;;  %v10250_v32 = vand.u32 %v4293_v12, %v9834_v37  ;;  %v11056_v61 = vld [vmem:[#allocation43_spill] sm:$0xff] }
 0x338   :  { %v3081_v1 = vpop.f32.mrf.mxu1  ;;  %v10241_v29 = vand.u32 %v4143_v17, %v9834_v37 }
 0x339   :  { %v2473_v24 = vpop.f32.mrf.mxu0 }
 0x33a   :  { %v3082_v9 = vpop.f32.mrf.mxu1 }
 0x33b   :  { %v10194_v20 = vadd.f32 %v3082_v9, %v2473_v24  ;;  %v2475_v3 = vpop.f32.mrf.mxu0  ;;  %v11052_v24 = vpack.c.bf16 %v9992_v48, %v9990_v15  ;;  %v11053_v9 = vld [vmem:[#allocation32_spill] sm:$0xff] }
 0x33c   :  { %v3084_v11 = vpop.f32.mrf.mxu1  ;;  %v11054_v3 = vpack.c.bf16 %v9950_v21, %v11053_v9  ;;  %v11073_v9 = vld [vmem:[#allocation50_spill] sm:$0xff] }
 0x33d   :  { %v4135_v16 = vpack.c.bf16 %v10194_v20, %v10188_v45  ;;  %v2478_v31 = vpop.f32.mrf.mxu0  ;;  %8108 = vmatmul.mubr.msk.bf16.gmra.mxu0 %vm3281_vm2, %v11043_v57 }
 0x33e   :  { %v3087_v18 = vpop.f32.mrf.mxu1  ;;  %8126 = vmatmul.mubr.msk.bf16.gmra.mxu1 %vm3281_vm2, %v11044_v27  ;;  %8111 = vmatprep.mubr.msk.bf16.mxu0 %vm3281_vm2, %v11045_v53 }
 0x33f   :  { %v10210_v54 = vadd.f32 %v3087_v18, %v2478_v31  ;;  %8129 = vmatprep.mubr.msk.bf16.mxu1 %vm3281_vm2, %v11046_v58  ;;  %v2480_v52 = vpop.f32.mrf.mxu0  ;;  %v11055_v31 = vld [vmem:[#allocation44_spill] sm:$0xff] }
 0x340   :  { %v3089_v6 = vpop.f32.mrf.mxu1  ;;  %v11057_v62 = vpack.c.bf16 %v11055_v31, %v11056_v61  ;;  %v11076_v61 = vld [vmem:[#allocation40_spill] sm:$0xff] }
 0x341   :  { %v2481_v7 = vpop.f32.mrf.mxu0  ;;  %v11058_v6 = vld [vmem:[#allocation34_spill] sm:$0xff] }
 0x342   :  { %v3090_v14 = vpop.f32.mrf.mxu1 }
 0x343   :  { %v10216_v35 = vadd.f32 %v3090_v14, %v2481_v7  ;;  %v2483_v38 = vpop.f32.mrf.mxu0  ;;  %v11059_v7 = vld [vmem:[#allocation33_spill] sm:$0xff]  ;;  %v11061_v14 = vld [vmem:[#allocation46_spill] sm:$0xff] }
 0x344   :  { %v3092_v47 = vpop.f32.mrf.mxu1  ;;  %v11062_v38 = vld [vmem:[#allocation45_spill] sm:$0xff] }
 0x345   :  { %v4136_v25 = vpack.c.bf16 %v10216_v35, %v10210_v54  ;;  %v2486_v55 = vpop.f32.mrf.mxu0  ;;  %8112 = vmatmul.mubr.msk.bf16.gmra.mxu0 %vm3281_vm2, %v11047_v44  ;;  %v11063_v47 = vpack.c.bf16 %v11061_v14, %v11062_v38  ;;  %v11065_v44 = vld [vmem:[#allocation35_spill] sm:$0xff]  ;;  %v11082_v14 = vld [vmem:[#allocation42_spill] sm:$0xff]  ;;  %v11083_v38 = vld [vmem:[#allocation41_spill] sm:$0xff] }
 0x346   :  { %v3095_v56 = vpop.f32.mrf.mxu1  ;;  %8130 = vmatmul.mubr.msk.bf16.gmra.mxu1 %vm3281_vm2, %v11048_v4  ;;  %8135 = vmatprep.mubr.msk.bf16.mxu0 %vm3281_vm2, %v11049_v36  ;;  %v11067_v36 = vld [vmem:[#allocation48_spill] sm:$0xff] }
 0x347   :  { %v10232_v5 = vadd.f32 %v3095_v56, %v2486_v55  ;;  %8153 = vmatprep.mubr.msk.bf16.mxu1 %vm3281_vm2, %v11050_v59  ;;  %v2488_v10 = vpop.f32.mrf.mxu0  ;;  %v11064_v55 = vld [vmem:[#allocation36_spill] sm:$0xff]  ;;  %v11068_v59 = vld [vmem:[#allocation47_spill] sm:$0xff] }
 0x348   :  { %v3097_v41 = vpop.f32.mrf.mxu1  ;;  %v11066_v56 = vpack.c.bf16 %v11064_v55, %v11065_v44  ;;  %v11069_v10 = vpack.c.bf16 %v11067_v36, %v11068_v59  ;;  %v11085_v44 = vld [vmem:[#allocation54_spill] sm:$0xff]  ;;  %v11088_v59 = vld [vmem:[#allocation56_spill] sm:$0xff] }
 0x349   :  { %v2489_v13 = vpop.f32.mrf.mxu0 }
 0x34a   :  { %v3098_v33 = vpop.f32.mrf.mxu1 }
 0x34b   :  { %v10238_v23 = vadd.f32 %v3098_v33, %v2489_v13  ;;  %v2491_v22 = vpop.f32.mrf.mxu0 }
 0x34c   :  { %v3100_v43 = vpop.f32.mrf.mxu1 }
 0x34d   :  { %v4137_v60 = vpack.c.bf16 %v10238_v23, %v10232_v5  ;;  %v2494_v49 = vpop.f32.mrf.mxu0  ;;  %8136 = vmatmul.mubr.msk.bf16.vlgmr.msra.gmra.mxu0 %vm3281_vm2, %v11051_v63  ;;  %v11071_v63 = vld [vmem:[#allocation37_spill] sm:$0xff] }
 0x34e   :  { %v3103_v1 = vpop.f32.mrf.mxu1  ;;  %8154 = vmatmul.mubr.msk.bf16.vlgmr.msra.gmra.mxu1 %vm3281_vm2, %v11052_v24  ;;  %8139 = vmatprep.mubr.msk.bf16.mxu0 %vm3281_vm2, %v11054_v3  ;;  %v11074_v3 = vld [vmem:[#allocation49_spill] sm:$0xff] }
 0x34f   :  { %v10260_v11 = vadd.f32 %v3103_v1, %v2494_v49  ;;  %8157 = vmatprep.mubr.msk.bf16.mxu1 %vm3281_vm2, %v11057_v62  ;;  %v2496_v57 = vpop.f32.mrf.mxu0  ;;  %8170 = vmatpush3.bf16.msra.mxu0 %v10143_v34  ;;  %v11060_v34 = vpack.c.bf16 %v11058_v6, %v11059_v7  ;;  %v11070_v49 = vld [vmem:[#allocation38_spill] sm:$0xff]  ;;  %v11075_v31 = vpack.c.bf16 %v11073_v9, %v11074_v3  ;;  %v11077_v62 = vld [vmem:[#allocation39_spill] sm:$0xff]  ;;  %v4443_v9 = vld [vmem:[#allocation5 + $0x10] sm:$0x3] }
 0x350   :  { %v3105_v18 = vpop.f32.mrf.mxu1  ;;  %8188 = vmatpush3.bf16.msra.mxu1 %v10152_v28  ;;  %8205 = vmatprep.subr.bf16.mxu0 %v10241_v29  ;;  %v11072_v1 = vpack.c.bf16 %v11070_v49, %v11071_v63  ;;  %v11078_v57 = vpack.c.bf16 %v11076_v61, %v11077_v62  ;;  %v10345_v62 = vand.u32 %v4443_v9, %v9834_v37  ;;  %v11104_v37 = vld [vmem:[#allocation75_spill] sm:$0xff] }
 0x351   :  { %v2497_v48 = vpop.f32.mrf.mxu0  ;;  %8223 = vmatprep.subr.bf16.mxu1 %v10250_v32  ;;  %v11079_v18 = vld [vmem:[#allocation52_spill] sm:$0xff] }
 0x352   :  { %v3106_v21 = vpop.f32.mrf.mxu1 }
 0x353   :  { %v10270_v15 = vadd.f32 %v3106_v21, %v2497_v48  ;;  %v2499_v27 = vpop.f32.mrf.mxu0  ;;  %v11080_v48 = vld [vmem:[#allocation51_spill] sm:$0xff] }
 0x354   :  { %v3108_v53 = vpop.f32.mrf.mxu1  ;;  %v11081_v21 = vpack.c.bf16 %v11079_v18, %v11080_v48  ;;  %v11094_v18 = vld [vmem:[#allocation58_spill] sm:$0xff]  ;;  %v11095_v48 = vld [vmem:[#allocation57_spill] sm:$0xff] }
 0x355   :  { %v4138_v58 = vpack.c.bf16 %v10270_v15, %v10260_v11  ;;  %v2502_v52 = vpop.f32.mrf.mxu0  ;;  %8140 = vmatmul.mubr.msk.bf16.gmra.mxu0 %vm3281_vm2, %v11060_v34 }
 0x356   :  { %v3111_v28 = vpop.f32.mrf.mxu1  ;;  %8158 = vmatmul.mubr.msk.bf16.gmra.mxu1 %vm3281_vm2, %v11063_v47  ;;  %8143 = vmatprep.mubr.msk.bf16.mxu0 %vm3281_vm2, %v11066_v56  ;;  %v11084_v47 = vpack.c.bf16 %v11082_v14, %v11083_v38  ;;  %v11086_v56 = vld [vmem:[#allocation53_spill] sm:$0xff]  ;;  %v11100_v14 = vld [vmem:[#allocation60_spill] sm:$0xff]  ;;  %v11101_v38 = vld [vmem:[#allocation59_spill] sm:$0xff] }
 0x357   :  { %v10286_v4 = vadd.f32 %v3111_v28, %v2502_v52  ;;  %8161 = vmatprep.mubr.msk.bf16.mxu1 %vm3281_vm2, %v11069_v10  ;;  %v2504_v41 = vpop.f32.mrf.mxu0  ;;  %v11087_v36 = vpack.c.bf16 %v11085_v44, %v11086_v56  ;;  %v11089_v10 = vld [vmem:[#allocation55_spill] sm:$0xff]  ;;  %v11103_v44 = vld [vmem:[#allocation76_spill] sm:$0xff] }
 0x358   :  { %v3113_v13 = vpop.f32.mrf.mxu1  ;;  %v11090_v41 = vpack.c.bf16 %v11088_v59, %v11089_v10  ;;  %v11105_v56 = vpack.c.bf16 %v11103_v44, %v11104_v37 }
 0x359   :  { %v10292_v17 = vpop.f32.mrf.mxu0  ;;  %v11091_v13 = vld [vmem:[#allocation72_spill] sm:$0xff] }
 0x35a   :  { %v10294_v33 = vpop.f32.mrf.mxu1 }
 0x35b   :  { %v2507_v12 = vpop.f32.mrf.mxu0  ;;  %v3115_v35 = vadd.f32 %v10294_v33, %v10292_v17 }
 0x35c   :  { %v3116_v22 = vpop.f32.mrf.mxu1  ;;  %v11092_v12 = vld [vmem:[#allocation71_spill] sm:$0xff] }
 0x35d   :  { %v10296_v43 = vpop.f32.mrf.mxu0  ;;  %8144 = vmatmul.mubr.msk.bf16.gmra.mxu0 %vm3281_vm2, %v11072_v1  ;;  %v11093_v22 = vpack.c.bf16 %v11091_v13, %v11092_v12 }
 0x35e   :  { %v10302_v24 = vpop.f32.mrf.mxu1  ;;  %8162 = vmatmul.mubr.msk.bf16.gmra.mxu1 %vm3281_vm2, %v11075_v31  ;;  %8147 = vmatprep.mubr.msk.bf16.mxu0 %vm3281_vm2, %v11078_v57 }
 0x35f   :  { %8165 = vmatprep.mubr.msk.bf16.mxu1 %vm3281_vm2, %v11081_v21  ;;  %v2512_v27 = vpop.f32.mrf.mxu0  ;;  %v11096_v21 = vpack.c.bf16 %v11094_v18, %v11095_v48  ;;  %v11110_v18 = vld [vmem:[#allocation77_spill] sm:$0xff] }
 0x360   :  { %v3121_v53 = vpop.f32.mrf.mxu1 }
 0x361   :  { %v10316_v52 = vpop.f32.mrf.mxu0  ;;  %v11097_v53 = vld [vmem:[#allocation74_spill] sm:$0xff] }
 0x362   :  { %v10318_v6 = vpop.f32.mrf.mxu1 }
 0x363   :  { %v2515_v7 = vpop.f32.mrf.mxu0 }
 0x364   :  { %v3124_v34 = vpop.f32.mrf.mxu1  ;;  %v11098_v7 = vld [vmem:[#allocation73_spill] sm:$0xff] }
 0x365   :  { %v10320_v28 = vpop.f32.mrf.mxu0  ;;  %8148 = vmatmul.mubr.msk.bf16.gmra.mxu0 %vm3281_vm2, %v11084_v47  ;;  %v11099_v34 = vpack.c.bf16 %v11097_v53, %v11098_v7  ;;  %v11102_v47 = vpack.c.bf16 %v11100_v14, %v11101_v38  ;;  %v11115_v53 = vld [vmem:[#allocation79_spill] sm:$0xff] }
 0x366   :  { %v10326_v55 = vpop.f32.mrf.mxu1  ;;  %8166 = vmatmul.mubr.msk.bf16.gmra.mxu1 %vm3281_vm2, %v11087_v36  ;;  %8171 = vmatprep.mubr.msk.bf16.mxu0 %vm3281_vm2, %v11090_v41  ;;  %v11116_v7 = vpack.c.bf16 %v10114_v2, %v11115_v53  ;;  %v11121_v2 = vld [vmem:[#allocation68_spill] sm:$0xff] }
 0x367   :  { %8189 = vmatprep.mubr.msk.bf16.mxu1 %vm3281_vm2, %v11093_v22  ;;  %v2520_v49 = vpop.f32.mrf.mxu0 }
 0x368   :  { %v3129_v63 = vpop.f32.mrf.mxu1  ;;  %v11106_v49 = vld [vmem:[#allocation62_spill] sm:$0xff] }
 0x369   :  { %v10340_v1 = vpop.f32.mrf.mxu0  ;;  %v11107_v63 = vld [vmem:[#allocation61_spill] sm:$0xff] }
 0x36a   :  { %v10342_v3 = vpop.f32.mrf.mxu1  ;;  %v11108_v9 = vpack.c.bf16 %v11106_v49, %v11107_v63  ;;  %v11120_v49 = vpack.c.bf16 %v10120_v40, %v10118_v26  ;;  %v11122_v63 = vld [vmem:[#allocation67_spill] sm:$0xff] }
 0x36b   :  { %v2523_v31 = vpop.f32.mrf.mxu0 }
 0x36c   :  { %v3132_v61 = vpop.f32.mrf.mxu1 }
 0x36d   :  { %v2526_v57 = vpop.f32.mrf.mxu0  ;;  %8172 = vmatmul.mubr.msk.bf16.vlgmr.msra.gmra.mxu0 %vm3281_vm2, %v11096_v21  ;;  %v11109_v61 = vld [vmem:[#allocation78_spill] sm:$0xff] }
 0x36e   :  { %v3135_v27 = vpop.f32.mrf.mxu1  ;;  %8190 = vmatmul.mubr.msk.bf16.vlgmr.msra.gmra.mxu1 %vm3281_vm2, %v11099_v34  ;;  %8175 = vmatprep.mubr.msk.bf16.mxu0 %vm3281_vm2, %v11102_v47  ;;  %v11111_v48 = vpack.c.bf16 %v11109_v61, %v11110_v18 }
 0x36f   :  { %8193 = vmatprep.mubr.msk.bf16.mxu1 %vm3281_vm2, %v11105_v56  ;;  %v2528_v36 = vpop.f32.mrf.mxu0  ;;  %8206 = vmatpush3.bf16.msra.mxu0 %v10241_v29  ;;  %v11112_v29 = vld [vmem:[#allocation64_spill] sm:$0xff] }
 0x370   :  { %v3137_v59 = vpop.f32.mrf.mxu1  ;;  %8224 = vmatpush3.bf16.msra.mxu1 %v10250_v32  ;;  %8241 = vmatprep.subr.bf16.mxu0 %v10345_v62  ;;  %v11113_v32 = vld [vmem:[#allocation63_spill] sm:$0xff]  ;;  %v11117_v36 = vld [vmem:[#allocation66_spill] sm:$0xff] }
 0x371   :  { %v2529_v10 = vpop.f32.mrf.mxu0  ;;  %v11114_v21 = vpack.c.bf16 %v11112_v29, %v11113_v32  ;;  %v11118_v59 = vld [vmem:[#allocation65_spill] sm:$0xff] }
 0x372   :  { %v3138_v41 = vpop.f32.mrf.mxu1 }
 0x373   :  { %v2531_v13 = vpop.f32.mrf.mxu0 }
 0x374   :  { %v3140_v12 = vpop.f32.mrf.mxu1  ;;  %v11119_v13 = vpack.c.bf16 %v11117_v36, %v11118_v59 }
 0x375   :  { %v2534_v22 = vpop.f32.mrf.mxu0  ;;  %8176 = vmatmul.mubr.msk.bf16.gmra.mxu0 %vm3281_vm2, %v11108_v9  ;;  %v11123_v9 = vpack.c.bf16 %v11121_v2, %v11122_v63 }
 0x376   :  { %v3143_v31 = vpop.f32.mrf.mxu1  ;;  %8194 = vmatmul.mubr.msk.bf16.gmra.mxu1 %vm3281_vm2, %v11111_v48  ;;  %8179 = vmatprep.mubr.msk.bf16.mxu0 %vm3281_vm2, %v11114_v21  ;;  %v3139_v48 = vadd.f32 %v3138_v41, %v2529_v10  ;;  %v3136_v21 = vadd.f32 %v3135_v27, %v2526_v57 }
 0x377   :  { %8197 = vmatprep.mubr.msk.bf16.mxu1 %vm3281_vm2, %v11116_v7  ;;  %v2536_v34 = vpop.f32.mrf.mxu0  ;;  %v3144_v10 = vadd.f32 %v3143_v31, %v2534_v22 }
 0x378   :  { %v3145_v14 = vpop.f32.mrf.mxu1  ;;  %v4284_v26 = vpack.c.bf16 %v3139_v48, %v3136_v21  ;;  %v11124_v34 = vld [vmem:[#allocation70_spill] sm:$0xff] }
 0x379   :  { %v2537_v38 = vpop.f32.mrf.mxu0  ;;  %v11125_v14 = vld [vmem:[#allocation69_spill] sm:$0xff] }
 0x37a   :  { %v3146_v47 = vpop.f32.mrf.mxu1 }
 0x37b   :  { %v2539_v44 = vpop.f32.mrf.mxu0  ;;  %v3147_v0 = vadd.f32 %v3146_v47, %v2537_v38 }
 0x37c   :  { %v3148_v37 = vpop.f32.mrf.mxu1  ;;  %v11126_v44 = vpack.c.bf16 %v11124_v34, %v11125_v14 }
 0x37d   :  { %v2542_v56 = vpop.f32.mrf.mxu0  ;;  %8180 = vmatmul.mubr.msk.bf16.gmra.mxu0 %vm3281_vm2, %v11119_v13  ;;  %v4285_v13 = vpack.c.bf16 %v3147_v0, %v3144_v10 }
 0x37e   :  { %v3151_v12 = vpop.f32.mrf.mxu1  ;;  %8198 = vmatmul.mubr.msk.bf16.gmra.mxu1 %vm3281_vm2, %v11120_v49  ;;  %8183 = vmatprep.mubr.msk.bf16.mxu0 %vm3281_vm2, %v11123_v9  ;;  %v4139_v9 = vpack.c.bf16 %v3115_v35, %v10286_v4  ;;  %v3128_v4 = vadd.f32 %v10326_v55, %v10320_v28 }
 0x37f   :  { %8201 = vmatprep.mubr.msk.bf16.mxu1 %vm3281_vm2, %v3990_v39  ;;  %v2544_v61 = vpop.f32.mrf.mxu0  ;;  %v3152_v36 = vadd.f32 %v3151_v12, %v2542_v56 }
 0x380   :  { %v3153_v18 = vpop.f32.mrf.mxu1 }
 0x381   :  { %v2545_v29 = vpop.f32.mrf.mxu0 }
 0x382   :  { %v3154_v32 = vpop.f32.mrf.mxu1 }
 0x383   :  { %v2547_v53 = vpop.f32.mrf.mxu0  ;;  %v3155_v57 = vadd.f32 %v3154_v32, %v2545_v29 }
 0x384   :  { %v3156_v40 = vpop.f32.mrf.mxu1 }
 0x385   :  { %v2550_v7 = vpop.f32.mrf.mxu0  ;;  %8184 = vmatmul.mubr.msk.bf16.gmra.mxu0 %vm3281_vm2, %v11126_v44  ;;  %v4286_v50 = vpack.c.bf16 %v3155_v57, %v3152_v36 }
 0x386   :  { %v3159_v37 = vpop.f32.mrf.mxu1  ;;  %8202 = vmatmul.mubr.msk.bf16.gmra.mxu1 %vm3281_vm2, %v3991_v46  ;;  %8207 = vmatprep.mubr.msk.bf16.mxu0 %vm3281_vm2, %v4134_v51 }
 0x387   :  { %8225 = vmatprep.mubr.msk.bf16.mxu1 %vm3281_vm2, %v4284_v26  ;;  %v2552_v42 = vpop.f32.mrf.mxu0  ;;  %v3160_v38 = vadd.f32 %v3159_v37, %v2550_v7 }
 0x388   :  { %v3161_v39 = vpop.f32.mrf.mxu1 }
 0x389   :  { %v2553_v27 = vpop.f32.mrf.mxu0 }
 0x38a   :  { %v3162_v41 = vpop.f32.mrf.mxu1 }
 0x38b   :  { %v2555_v59 = vpop.f32.mrf.mxu0  ;;  %v3163_v51 = vadd.f32 %v3162_v41, %v2553_v27 }
 0x38c   :  { %v3164_v30 = vpop.f32.mrf.mxu1 }
 0x38d   :  { %v2558_v46 = vpop.f32.mrf.mxu0  ;;  %8208 = vmatmul.mubr.msk.bf16.vlgmr.msra.gmra.mxu0 %vm3281_vm2, %v4135_v16  ;;  %v4287_v56 = vpack.c.bf16 %v3163_v51, %v3160_v38 }
 0x38e   :  { %v3167_v8 = vpop.f32.mrf.mxu1  ;;  %8226 = vmatmul.mubr.msk.bf16.vlgmr.msra.gmra.mxu1 %vm3281_vm2, %v4285_v13  ;;  %8211 = vmatprep.mubr.msk.bf16.mxu0 %vm3281_vm2, %v4136_v25 }
 0x38f   :  { %8229 = vmatprep.mubr.msk.bf16.mxu1 %vm3281_vm2, %v4286_v50  ;;  %v2560_v19 = vpop.f32.mrf.mxu0  ;;  %8242 = vmatpush3.bf16.msra.mxu0 %v10345_v62  ;;  %v3168_v20 = vadd.f32 %v3167_v8, %v2558_v46  ;;  %v3123_v62 = vadd.f32 %v10318_v6, %v10316_v52  ;;  %v3131_v52 = vadd.f32 %v10342_v3, %v10340_v1 }
 0x390   :  { %v3169_v22 = vpop.f32.mrf.mxu1 }
 0x391   :  { %v2561_v31 = vpop.f32.mrf.mxu0  ;;  %v4141_v32 = vpack.c.bf16 %v3131_v52, %v3128_v4 }
 0x392   :  { %v3170_v45 = vpop.f32.mrf.mxu1 }
 0x393   :  { %v3171_v16 = vadd.f32 %v3170_v45, %v2561_v31  ;;  %v2563_v47 = vpop.f32.mrf.mxu0 }
 0x394   :  { %v3172_v12 = vpop.f32.mrf.mxu1 }
 0x395   :  { %v4288_v49 = vpack.c.bf16 %v3171_v16, %v3168_v20  ;;  %v2566_v2 = vpop.f32.mrf.mxu0  ;;  %8212 = vmatmul.mubr.msk.bf16.gmra.mxu0 %vm3281_vm2, %v4137_v60  ;;  %v3120_v60 = vadd.f32 %v10302_v24, %v10296_v43 }
 0x396   :  { %v3175_v54 = vpop.f32.mrf.mxu1  ;;  %8230 = vmatmul.mubr.msk.bf16.gmra.mxu1 %vm3281_vm2, %v4287_v56  ;;  %8215 = vmatprep.mubr.msk.bf16.mxu0 %vm3281_vm2, %v4138_v58 }
 0x397   :  { %8233 = vmatprep.mubr.msk.bf16.mxu1 %vm3281_vm2, %v4288_v49  ;;  %v2568_v25 = vpop.f32.mrf.mxu0  ;;  %v3176_v11 = vadd.f32 %v3175_v54, %v2566_v2  ;;  %v4140_v61 = vpack.c.bf16 %v3123_v62, %v3120_v60 }
 0x398   :  { %v3177_v5 = vpop.f32.mrf.mxu1 }
 0x399   :  { %v2569_v23 = vpop.f32.mrf.mxu0 }
 0x39a   :  { %v3178_v63 = vpop.f32.mrf.mxu1 }
 0x39b   :  { %v3179_v15 = vadd.f32 %v3178_v63, %v2569_v23  ;;  %v2571_v58 = vpop.f32.mrf.mxu0 }
 0x39c   :  { %v3180_v18 = vpop.f32.mrf.mxu1 }
 0x39d   :  { %v4289_v17 = vpack.c.bf16 %v3179_v15, %v3176_v11  ;;  %v2574_v33 = vpop.f32.mrf.mxu0  ;;  %8216 = vmatmul.mubr.msk.bf16.gmra.mxu0 %vm3281_vm2, %v4139_v9 }
 0x39e   :  { %v3183_v48 = vpop.f32.mrf.mxu1  ;;  %8219 = vmatprep.mubr.msk.bf16.mxu0 %vm3281_vm2, %v4140_v61 }
 0x39f   :  { %8234 = vmatmul.mubr.msk.bf16.gmra.mxu1 %vm3281_vm2, %v4289_v17  ;;  %v2576_v43 = vpop.f32.mrf.mxu0  ;;  %v3184_v21 = vadd.f32 %v3183_v48, %v2574_v33 }
 0x3a0   :  { %v3185_v24 = vpop.f32.mrf.mxu1 }
 0x3a1   :  { %v2577_v6 = vpop.f32.mrf.mxu0 }
 0x3a2   :  { %v3186_v29 = vpop.f32.mrf.mxu1 }
 0x3a3   :  { %v3187_v53 = vadd.f32 %v3186_v29, %v2577_v6  ;;  %v2579_v40 = vpop.f32.mrf.mxu0 }
 0x3a4   :  { %v3188_v26 = vpop.f32.mrf.mxu1 }
 0x3a5   :  { %v4290_v7 = vpack.c.bf16 %v3187_v53, %v3184_v21  ;;  %v2582_v34 = vpop.f32.mrf.mxu0  ;;  %8220 = vmatmul.mubr.msk.bf16.gmra.mxu0 %vm3281_vm2, %v4141_v32 }
 0x3a6   :  { %v3191_v14 = vpop.f32.mrf.mxu1 }
 0x3a7   :  { %8237 = vmatprep.mubr.msk.bf16.mxu1 %vm3281_vm2, %v4290_v7  ;;  %v2584_v1 = vpop.f32.mrf.mxu0  ;;  %v3192_v42 = vadd.f32 %v3191_v14, %v2582_v34 }
 0x3a8   :  { %v3193_v3 = vpop.f32.mrf.mxu1 }
 0x3a9   :  { %v2585_v44 = vpop.f32.mrf.mxu0 }
 0x3aa   :  { %v3194_v37 = vpop.f32.mrf.mxu1 }
 0x3ab   :  { %v3195_v28 = vadd.f32 %v3194_v37, %v2585_v44  ;;  %v2587_v55 = vpop.f32.mrf.mxu0 }
 0x3ac   :  { %v3196_v0 = vpop.f32.mrf.mxu1 }
 0x3ad   :  { %v4291_v39 = vpack.c.bf16 %v3195_v28, %v3192_v42  ;;  %v2590_v57 = vpop.f32.mrf.mxu0 }
 0x3ae   :  { %v3199_v27 = vpop.f32.mrf.mxu1 }
 0x3af   :  { %8238 = vmatmul.mubr.msk.bf16.gmra.mxu1 %vm3281_vm2, %v4291_v39  ;;  %v2592_v10 = vpop.f32.mrf.mxu0  ;;  %v3200_v13 = vadd.f32 %v3199_v27, %v2590_v57 }
 0x3b0   :  { %v3201_v41 = vpop.f32.mrf.mxu1 }
 0x3b1   :  { %v2593_v36 = vpop.f32.mrf.mxu0 }
 0x3b2   :  { %v3202_v59 = vpop.f32.mrf.mxu1 }
 0x3b3   :  { %v3203_v30 = vadd.f32 %v3202_v59, %v2593_v36  ;;  %v2595_v50 = vpop.f32.mrf.mxu0 }
 0x3b4   :  { %v3204_v46 = vpop.f32.mrf.mxu1 }
 0x3b5   :  { %v4434_v8 = vpack.c.bf16 %v3203_v30, %v3200_v13  ;;  %v2598_v19 = vpop.f32.mrf.mxu0 }
 0x3b6   :  { %v3207_v51 = vpop.f32.mrf.mxu1 }
 0x3b7   :  { %8243 = vmatprep.mubr.msk.bf16.mxu0 %vm3281_vm2, %v4434_v8  ;;  %v2600_v22 = vpop.f32.mrf.mxu0  ;;  %v3208_v20 = vadd.f32 %v3207_v51, %v2598_v19 }
 0x3b8   :  { %v3209_v31 = vpop.f32.mrf.mxu1 }
 0x3b9   :  { %v2601_v38 = vpop.f32.mrf.mxu0 }
 0x3ba   :  { %v3210_v45 = vpop.f32.mrf.mxu1 }
 0x3bb   :  { %v3211_v16 = vadd.f32 %v3210_v45, %v2601_v38  ;;  %v2603_v47 = vpop.f32.mrf.mxu0 }
 0x3bc   :  { %v3212_v56 = vpop.f32.mrf.mxu1 }
 0x3bd   :  { %v4435_v12 = vpack.c.bf16 %v3211_v16, %v3208_v20  ;;  %v2606_v49 = vpop.f32.mrf.mxu0 }
 0x3be   :  { %v3215_v2 = vpop.f32.mrf.mxu1 }
 0x3bf   :  { %8244 = vmatmul.mubr.msk.bf16.vlgmr.msra.gmra.mxu0 %vm3281_vm2, %v4435_v12  ;;  %v2608_v54 = vpop.f32.mrf.mxu0  ;;  %v3216_v5 = vadd.f32 %v3215_v2, %v2606_v49 }
 0x3c0   :  { %v3217_v35 = vpop.f32.mrf.mxu1 }
 0x3c1   :  { %v2609_v25 = vpop.f32.mrf.mxu0 }
 0x3c2   :  { %v3218_v62 = vpop.f32.mrf.mxu1 }
 0x3c3   :  { %v3219_v23 = vadd.f32 %v3218_v62, %v2609_v25  ;;  %v2611_v60 = vpop.f32.mrf.mxu0 }
 0x3c4   :  { %v3220_v63 = vpop.f32.mrf.mxu1 }
 0x3c5   :  { %v4436_v9 = vpack.c.bf16 %v3219_v23, %v3216_v5  ;;  %v2614_v11 = vpop.f32.mrf.mxu0 }
 0x3c6   :  { %v3223_v15 = vpop.f32.mrf.mxu1 }
 0x3c7   :  { %8247 = vmatprep.mubr.msk.bf16.mxu0 %vm3281_vm2, %v4436_v9  ;;  %v2616_v58 = vpop.f32.mrf.mxu0  ;;  %v3224_v33 = vadd.f32 %v3223_v15, %v2614_v11 }
 0x3c8   :  { %v3225_v61 = vpop.f32.mrf.mxu1 }
 0x3c9   :  { %v2617_v18 = vpop.f32.mrf.mxu0 }
 0x3ca   :  { %v3226_v17 = vpop.f32.mrf.mxu1 }
 0x3cb   :  { %v3227_v48 = vadd.f32 %v3226_v17, %v2617_v18  ;;  %v2619_v52 = vpop.f32.mrf.mxu0 }
 0x3cc   :  { %v3228_v43 = vpop.f32.mrf.mxu1 }
 0x3cd   :  { %v4437_v24 = vpack.c.bf16 %v3227_v48, %v3224_v33  ;;  %v2622_v4 = vpop.f32.mrf.mxu0 }
 0x3ce   :  { %v3231_v6 = vpop.f32.mrf.mxu1 }
 0x3cf   :  { %8248 = vmatmul.mubr.msk.bf16.gmra.mxu0 %vm3281_vm2, %v4437_v24  ;;  %v2624_v29 = vpop.f32.mrf.mxu0  ;;  %v3232_v40 = vadd.f32 %v3231_v6, %v2622_v4 }
 0x3d0   :  { %v3233_v32 = vpop.f32.mrf.mxu1 }
 0x3d1   :  { %v2625_v21 = vpop.f32.mrf.mxu0 }
 0x3d2   :  { %v3234_v53 = vpop.f32.mrf.mxu1 }
 0x3d3   :  { %v3235_v26 = vadd.f32 %v3234_v53, %v2625_v21  ;;  %v2627_v7 = vpop.f32.mrf.mxu0 }
 0x3d4   :  { %v3236_v34 = vpop.f32.mrf.mxu1 }
 0x3d5   :  { %v4438_v14 = vpack.c.bf16 %v3235_v26, %v3232_v40  ;;  %v2630_v1 = vpop.f32.mrf.mxu0 }
 0x3d6   :  { %v3239_v3 = vpop.f32.mrf.mxu1 }
 0x3d7   :  { %8251 = vmatprep.mubr.msk.bf16.mxu0 %vm3281_vm2, %v4438_v14  ;;  %v2632_v44 = vpop.f32.mrf.mxu0  ;;  %v3240_v55 = vadd.f32 %v3239_v3, %v2630_v1 }
 0x3d8   :  { %v3241_v37 = vpop.f32.mrf.mxu1 }
 0x3d9   :  { %v2633_v42 = vpop.f32.mrf.mxu0 }
 0x3da   :  { %v3242_v28 = vpop.f32.mrf.mxu1 }
 0x3db   :  { %v3243_v0 = vadd.f32 %v3242_v28, %v2633_v42  ;;  %v2635_v39 = vpop.f32.mrf.mxu0 }
 0x3dc   :  { %v3244_v57 = vpop.f32.mrf.mxu1 }
 0x3dd   :  { %v4439_v27 = vpack.c.bf16 %v3243_v0, %v3240_v55  ;;  %v2638_v10 = vpop.f32.mrf.mxu0 }
 0x3de   :  { %v3247_v41 = vpop.f32.mrf.mxu1 }
 0x3df   :  { %8252 = vmatmul.mubr.msk.bf16.gmra.mxu0 %vm3281_vm2, %v4439_v27  ;;  %v2640_v36 = vpop.f32.mrf.mxu0  ;;  %v3248_v50 = vadd.f32 %v3247_v41, %v2638_v10 }
 0x3e0   :  { %v3249_v59 = vpop.f32.mrf.mxu1 }
 0x3e1   :  { %v2641_v13 = vpop.f32.mrf.mxu0 }
 0x3e2   :  { %v3250_v30 = vpop.f32.mrf.mxu1 }
 0x3e3   :  { %v3251_v46 = vadd.f32 %v3250_v30, %v2641_v13  ;;  %v2643_v8 = vpop.f32.mrf.mxu0 }
 0x3e4   :  { %v3252_v19 = vpop.f32.mrf.mxu1 }
 0x3e5   :  { %v4440_v51 = vpack.c.bf16 %v3251_v46, %v3248_v50  ;;  %v2646_v22 = vpop.f32.mrf.mxu0 }
 0x3e6   :  { %v3255_v31 = vpop.f32.mrf.mxu1 }
 0x3e7   :  { %8255 = vmatprep.mubr.msk.bf16.mxu0 %vm3281_vm2, %v4440_v51  ;;  %v2648_v38 = vpop.f32.mrf.mxu0  ;;  %v3256_v47 = vadd.f32 %v3255_v31, %v2646_v22 }
 0x3e8   :  { %v3257_v45 = vpop.f32.mrf.mxu1 }
 0x3e9   :  { %v2649_v20 = vpop.f32.mrf.mxu0 }
 0x3ea   :  { %v3258_v16 = vpop.f32.mrf.mxu1 }
 0x3eb   :  { %v3259_v56 = vadd.f32 %v3258_v16, %v2649_v20  ;;  %v2651_v12 = vpop.f32.mrf.mxu0 }
 0x3ec   :  { %v3260_v49 = vpop.f32.mrf.mxu1 }
 0x3ed   :  { %v4441_v2 = vpack.c.bf16 %v3259_v56, %v3256_v47  ;;  %v8101_v54 = vpop.f32.mrf.mxu0 }
 0x3ee   :  { %v8119_v35 = vpop.f32.mrf.mxu1 }
 0x3ef   :  { %v3480_v25 = vadd.f32 %v8119_v35, %v8101_v54  ;;  %8256 = vmatmul.mubr.msk.bf16.gmra.mxu0 %vm3281_vm2, %v4441_v2  ;;  %v3347_v62 = vpop.f32.mrf.mxu0 }
 0x3f0   :  { %v3471_v5 = vpop.f32.mrf.mxu1 }
 0x3f1   :  { %v3472_v23 = vadd.f32 %v3471_v5, %v3347_v62  ;;  %v8102_v60 = vpop.f32.mrf.mxu0 }
 0x3f2   :  { %v8120_v63 = vpop.f32.mrf.mxu1 }
 0x3f3   :  { %v3483_v9 = vadd.f32 %v8120_v63, %v8102_v60  ;;  %v10457_v11 = vpop.f32.mrf.mxu0 }
 0x3f4   :  { %v10459_v15 = vpop.f32.mrf.mxu1 }
 0x3f5   :  { %v8105_v58 = vpop.f32.mrf.mxu0 }
 0x3f6   :  { %v8123_v61 = vpop.f32.mrf.mxu1 }
 0x3f7   :  { %v3496_v18 = vadd.f32 %v8123_v61, %v8105_v58  ;;  %v3363_v17 = vpop.f32.mrf.mxu0 }
 0x3f8   :  { %v3487_v33 = vpop.f32.mrf.mxu1 }
 0x3f9   :  { %v3488_v48 = vadd.f32 %v3487_v33, %v3363_v17  ;;  %v8106_v52 = vpop.f32.mrf.mxu0 }
 0x3fa   :  { %v8124_v43 = vpop.f32.mrf.mxu1 }
 0x3fb   :  { %v3499_v24 = vadd.f32 %v8124_v43, %v8106_v52  ;;  %v10461_v4 = vpop.f32.mrf.mxu0 }
 0x3fc   :  { %v10463_v6 = vpop.f32.mrf.mxu1 }
 0x3fd   :  { %v8109_v29 = vpop.f32.mrf.mxu0 }
 0x3fe   :  { %v8127_v32 = vpop.f32.mrf.mxu1 }
 0x3ff   :  { %v3512_v21 = vadd.f32 %v8127_v32, %v8109_v29  ;;  %v3379_v53 = vpop.f32.mrf.mxu0 }
 0x400   :  { %v3503_v40 = vpop.f32.mrf.mxu1 }
 0x401   :  { %v3504_v26 = vadd.f32 %v3503_v40, %v3379_v53  ;;  %v8110_v7 = vpop.f32.mrf.mxu0 }
 0x402   :  { %v8128_v34 = vpop.f32.mrf.mxu1 }
 0x403   :  { %v3515_v14 = vadd.f32 %v8128_v34, %v8110_v7  ;;  %v10465_v1 = vpop.f32.mrf.mxu0 }
 0x404   :  { %v10467_v3 = vpop.f32.mrf.mxu1 }
 0x405   :  { %v8113_v44 = vpop.f32.mrf.mxu0 }
 0x406   :  { %v8131_v37 = vpop.f32.mrf.mxu1 }
 0x407   :  { %v3528_v42 = vadd.f32 %v8131_v37, %v8113_v44  ;;  %v3395_v28 = vpop.f32.mrf.mxu0 }
 0x408   :  { %v3519_v55 = vpop.f32.mrf.mxu1 }
 0x409   :  { %v3520_v0 = vadd.f32 %v3519_v55, %v3395_v28  ;;  %v8114_v39 = vpop.f32.mrf.mxu0 }
 0x40a   :  { %v8132_v57 = vpop.f32.mrf.mxu1 }
 0x40b   :  { %v3531_v27 = vadd.f32 %v8132_v57, %v8114_v39  ;;  %v10469_v10 = vpop.f32.mrf.mxu0 }
 0x40c   :  { %v10471_v41 = vpop.f32.mrf.mxu1 }
 0x40d   :  { %v8137_v36 = vpop.f32.mrf.mxu0 }
 0x40e   :  { %v3670_v59 = vadd.f32 %v8137_v36, %v3480_v25  ;;  %v8155_v13 = vpop.f32.mrf.mxu1 }
 0x40f   :  { %v3605_v30 = vpop.f32.mrf.mxu0 }
 0x410   :  { %v3820_v50 = vadd.f32 %v8155_v13, %v3670_v59  ;;  %v3668_v46 = vadd.f32 %v3605_v30, %v3472_v23  ;;  %v3755_v8 = vpop.f32.mrf.mxu1 }
 0x411   :  { %v8138_v19 = vpop.f32.mrf.mxu0 }
 0x412   :  { %v3818_v51 = vadd.f32 %v3755_v8, %v3668_v46  ;;  %v3671_v22 = vadd.f32 %v8138_v19, %v3483_v9  ;;  %v8156_v31 = vpop.f32.mrf.mxu1 }
 0x413   :  { %v10473_v38 = vpop.f32.mrf.mxu0 }
 0x414   :  { %v3821_v45 = vadd.f32 %v8156_v31, %v3671_v22  ;;  %v10475_v20 = vpop.f32.mrf.mxu1 }
 0x415   :  { %v8141_v16 = vpop.f32.mrf.mxu0 }
 0x416   :  { %v3674_v47 = vadd.f32 %v8141_v16, %v3496_v18  ;;  %v8159_v56 = vpop.f32.mrf.mxu1 }
 0x417   :  { %v3621_v12 = vpop.f32.mrf.mxu0 }
 0x418   :  { %v3824_v49 = vadd.f32 %v8159_v56, %v3674_v47  ;;  %v3672_v2 = vadd.f32 %v3621_v12, %v3488_v48  ;;  %v3771_v54 = vpop.f32.mrf.mxu1 }
 0x419   :  { %v8142_v35 = vpop.f32.mrf.mxu0 }
 0x41a   :  { %v3822_v25 = vadd.f32 %v3771_v54, %v3672_v2  ;;  %v3675_v62 = vadd.f32 %v8142_v35, %v3499_v24  ;;  %v8160_v5 = vpop.f32.mrf.mxu1 }
 0x41b   :  { %v10477_v23 = vpop.f32.mrf.mxu0 }
 0x41c   :  { %11127 = vst [vmem:[#allocation32_spill] sm:$0xff] %v10477_v23  ;;  %v3825_v60 = vadd.f32 %v8160_v5, %v3675_v62  ;;  %v10479_v63 = vpop.f32.mrf.mxu1 }
 0x41d   :  { %11128 = vst [vmem:[#allocation44_spill] sm:$0xff] %v10479_v63  ;;  %v8145_v9 = vpop.f32.mrf.mxu0 }
 0x41e   :  { %v3678_v58 = vadd.f32 %v8145_v9, %v3512_v21  ;;  %v8163_v61 = vpop.f32.mrf.mxu1 }
 0x41f   :  { %v3637_v17 = vpop.f32.mrf.mxu0 }
 0x420   :  { %v3828_v33 = vadd.f32 %v8163_v61, %v3678_v58  ;;  %v3676_v18 = vadd.f32 %v3637_v17, %v3504_v26  ;;  %v3787_v52 = vpop.f32.mrf.mxu1 }
 0x421   :  { %v8146_v43 = vpop.f32.mrf.mxu0 }
 0x422   :  { %v3826_v29 = vadd.f32 %v3787_v52, %v3676_v18  ;;  %v3679_v48 = vadd.f32 %v8146_v43, %v3515_v14  ;;  %v8164_v32 = vpop.f32.mrf.mxu1 }
 0x423   :  { %v10481_v53 = vpop.f32.mrf.mxu0 }
 0x424   :  { %v3829_v24 = vadd.f32 %v8164_v32, %v3679_v48  ;;  %v10483_v40 = vpop.f32.mrf.mxu1 }
 0x425   :  { %v8149_v7 = vpop.f32.mrf.mxu0 }
 0x426   :  { %v10485_v34 = vadd.f32 %v8149_v7, %v3528_v42  ;;  %v10487_v44 = vpop.f32.mrf.mxu1 }
 0x427   :  { %v3653_v21 = vpop.f32.mrf.mxu0 }
 0x428   :  { %v10489_v37 = vadd.f32 %v3653_v21, %v3520_v0  ;;  %v10491_v28 = vpop.f32.mrf.mxu1 }
 0x429   :  { %v8150_v26 = vpop.f32.mrf.mxu0 }
 0x42a   :  { %v10493_v55 = vadd.f32 %v8150_v26, %v3531_v27  ;;  %v10495_v14 = vpop.f32.mrf.mxu1 }
 0x42b   :  { %v10497_v39 = vpop.f32.mrf.mxu0 }
 0x42c   :  { %v10499_v57 = vpop.f32.mrf.mxu1 }
 0x42d   :  { %v8173_v36 = vpop.f32.mrf.mxu0 }
 0x42e   :  { %v3970_v59 = vadd.f32 %v8173_v36, %v3820_v50  ;;  %v8191_v42 = vpop.f32.mrf.mxu1 }
 0x42f   :  { %v3905_v13 = vpop.f32.mrf.mxu0 }
 0x430   :  { %v4120_v30 = vadd.f32 %v8191_v42, %v3970_v59  ;;  %v3968_v46 = vadd.f32 %v3905_v13, %v3818_v51  ;;  %v4055_v8 = vpop.f32.mrf.mxu1 }
 0x431   :  { %v8174_v0 = vpop.f32.mrf.mxu0 }
 0x432   :  { %v4118_v19 = vadd.f32 %v4055_v8, %v3968_v46  ;;  %v3971_v22 = vadd.f32 %v8174_v0, %v3821_v45  ;;  %v8192_v31 = vpop.f32.mrf.mxu1 }
 0x433   :  { %v3908_v16 = vpop.f32.mrf.mxu0 }
 0x434   :  { %v4121_v27 = vadd.f32 %v8192_v31, %v3971_v22  ;;  %v4058_v47 = vpop.f32.mrf.mxu1 }
 0x435   :  { %v8177_v56 = vpop.f32.mrf.mxu0 }
 0x436   :  { %v10501_v12 = vadd.f32 %v8177_v56, %v3824_v49  ;;  %v10503_v2 = vpop.f32.mrf.mxu1 }
 0x437   :  { %v3921_v54 = vpop.f32.mrf.mxu0 }
 0x438   :  { %v3972_v35 = vadd.f32 %v3921_v54, %v3822_v25  ;;  %v4071_v50 = vpop.f32.mrf.mxu1  ;;  %v3475_v25 = vadd.f32 %v10459_v15, %v10457_v11 }
 0x439   :  { %v8178_v62 = vpop.f32.mrf.mxu0 }
 0x43a   :  { %v4122_v5 = vadd.f32 %v4071_v50, %v3972_v35  ;;  %v10505_v9 = vadd.f32 %v8178_v62, %v3825_v60  ;;  %v3669_v48 = vadd.f32 %v10473_v38, %v3475_v25  ;;  %v10529_v7 = vpop.f32.mrf.mxu1 }
 0x43b   :  { %v10507_v51 = vpop.f32.mrf.mxu0 }
 0x43c   :  { %11129 = vst [vmem:[#allocation43_spill] sm:$0xff] %v10507_v51  ;;  %v10531_v42 = vpop.f32.mrf.mxu1 }
 0x43d   :  { %v8181_v58 = vpop.f32.mrf.mxu0  ;;  %11130 = vst [vmem:[#allocation34_spill] sm:$0xff] %v10531_v42 }
 0x43e   :  { %v10509_v45 = vadd.f32 %v8181_v58, %v3828_v33  ;;  %v10533_v8 = vpop.f32.mrf.mxu1 }
 0x43f   :  { %v3937_v61 = vpop.f32.mrf.mxu0 }
 0x440   :  { %v10511_v17 = vadd.f32 %v3937_v61, %v3826_v29  ;;  %v3819_v29 = vadd.f32 %v10475_v20, %v3669_v48  ;;  %v10537_v20 = vpop.f32.mrf.mxu1 }
 0x441   :  { %v8182_v18 = vpop.f32.mrf.mxu0 }
 0x442   :  { %v10513_v49 = vadd.f32 %v8182_v18, %v3829_v24  ;;  %v3969_v21 = vadd.f32 %v3908_v16, %v3819_v29  ;;  %v8989_v16 = vld [vmem:[#allocation8] sm:$0xff]  }
 0x443   :  { %v10515_v52 = vpop.f32.mrf.mxu0  ;;  %8275 = vmatprep.mubr.bf16.mxu1 %v8989_v16 }
 0x444   :  { %v4119_v15 = vadd.f32 %v4058_v47, %v3969_v21 }
 0x445   :  { %v10517_v43 = vpop.f32.mrf.mxu0 }
 0x447   :  { %v10521_v60 = vpop.f32.mrf.mxu0 }
 0x449   :  { %v10524_v32 = vpop.f32.mrf.mxu0 }
 0x44b   :  { %v10526_v33 = vpop.f32.mrf.mxu0 }
 0x44d   :  { %v8209_v24 = vpop.f32.mrf.mxu0 }
 0x44e   :  { %v4270_v26 = vadd.f32 %v8209_v24, %v4120_v30  ;;  %v10539_v30 = vpop.f32.mrf.mxu1 }
 0x44f   :  { %v4205_v36 = vpop.f32.mrf.mxu0 }
 0x450   :  { %v4268_v59 = vadd.f32 %v4205_v36, %v4118_v19  ;;  %v10543_v54 = vpop.f32.mrf.mxu1 }
 0x451   :  { %v8210_v11 = vpop.f32.mrf.mxu0 }
 0x452   :  { %v4271_v13 = vadd.f32 %v8210_v11, %v4121_v27  ;;  %v10547_v47 = vpop.f32.mrf.mxu1 }
 0x453   :  { %v4208_v46 = vpop.f32.mrf.mxu0 }
 0x454   :  { %v4269_v38 = vadd.f32 %v4208_v46, %v4119_v15  ;;  %v10551_v50 = vpop.f32.mrf.mxu1 }
 0x455   :  { %v8213_v0 = vpop.f32.mrf.mxu0 }
 0x457   :  { %v4221_v22 = vpop.f32.mrf.mxu0 }
 0x458   :  { %v10535_v31 = vadd.f32 %v4221_v22, %v4122_v5  ;;  %v10555_v5 = vpop.f32.mrf.mxu1 }
 0x459   :  { %v8214_v56 = vpop.f32.mrf.mxu0  ;;  %11133 = vst [vmem:[#allocation45_spill] sm:$0xff] %v10555_v5 }
 0x45a   :  { %11131 = vst [vmem:[#allocation33_spill] sm:$0xff] %v10535_v31  ;;  %v10559_v61 = vpop.f32.mrf.mxu1  ;;  %v10569_v31 = vld [vmem:[#allocation7] ss:$0 sm:$0xff] }
 0x45b   :  { %v10541_v19 = vpop.f32.mrf.mxu0  ;;  %11134 = vst [vmem:[#allocation36_spill] sm:$0xff] %v10559_v61 }
 0x45c   :  { %11132 = vst [vmem:[#allocation46_spill] sm:$0xff] %v10541_v19  ;;  %v8227_v25 = vpop.f32.mrf.mxu1 }
 0x45d   :  { %v10545_v27 = vpop.f32.mrf.mxu0  ;;  %v4420_v11 = vadd.f32 %v8227_v25, %v4270_v26 }
 0x45e   :  { %v4355_v29 = vpop.f32.mrf.mxu1 }
 0x45f   :  { %v10549_v35 = vpop.f32.mrf.mxu0  ;;  %v4418_v46 = vadd.f32 %v4355_v29, %v4268_v59  ;;  %v4124_v59 = vadd.f32 %v10503_v2, %v10501_v12 }
 0x460   :  { %v8228_v21 = vpop.f32.mrf.mxu1 }
 0x461   :  { %v10553_v62 = vpop.f32.mrf.mxu0  ;;  %v4421_v42 = vadd.f32 %v8228_v21, %v4271_v13 }
 0x462   :  { %v4358_v16 = vpop.f32.mrf.mxu1 }
 0x463   :  { %v10557_v58 = vpop.f32.mrf.mxu0  ;;  %v4419_v61 = vadd.f32 %v4358_v16, %v4269_v38  ;;  %v4274_v38 = vadd.f32 %v8213_v0, %v4124_v59  ;;  %v3507_v0 = vadd.f32 %v10467_v3, %v10465_v1  ;;  %v4126_v1 = vadd.f32 %v10537_v20, %v10511_v17 }
 0x464   :  { %v8231_v23 = vpop.f32.mrf.mxu1 }
 0x465   :  { %v10561_v18 = vpop.f32.mrf.mxu0  ;;  %v3677_v16 = vadd.f32 %v10481_v53, %v3507_v0 }
 0x466   :  { %11135 = vst [vmem:[#allocation35_spill] sm:$0xff] %v10561_v18 }
 0x467   :  { %v10563_v48 = vpop.f32.mrf.mxu0 }
 0x468   :  { %11136 = vst [vmem:[#allocation48_spill] sm:$0xff] %v10563_v48 }
 0x469   :  { %v10565_v24 = vpop.f32.mrf.mxu0 }
 0x46a   :  { %11137 = vst [vmem:[#allocation47_spill] sm:$0xff] %v10565_v24 }
 0x46b   :  { %v10567_v36 = vpop.f32.mrf.mxu0 }
 0x47f   :  { %v8245_v15 = vpop.f32.mrf.mxu0 }
 0x480   :  { %v4570_v22 = vadd.f32 %v8245_v15, %v4420_v11 }
 0x481   :  { %v4505_v19 = vpop.f32.mrf.mxu0 }
 0x482   :  { %v4568_v51 = vadd.f32 %v4505_v19, %v4418_v46  ;;  %v4593_v48 = vadd.f32 %v10569_v31, %v4570_v22  ;;  %v10577_v19 = vpop.f32.mrf.mxu1 }
 0x483   :  { %v8246_v63 = vpop.f32.mrf.mxu0 }
 0x484   :  { %v4571_v5 = vadd.f32 %v8246_v63, %v4421_v42  ;;  %v4591_v18 = vadd.f32 %v10569_v31, %v4568_v51  ;;  %v4609_v29 = vmax.f32 %v4593_v48, 0.0  ;;  %v4125_v51 = vadd.f32 %v10529_v7, %v10505_v9 }
 0x485   :  { %v4508_v24 = vpop.f32.mrf.mxu0 }
 0x486   :  { %v4594_v26 = vadd.f32 %v10569_v31, %v4571_v5  ;;  %v4569_v25 = vadd.f32 %v4508_v24, %v4419_v61  ;;  %v4607_v21 = vmax.f32 %v4591_v18, 0.0  ;;  %v8232_v5 = vpop.f32.mrf.mxu1  ;;  %v4424_v61 = vadd.f32 %v8231_v23, %v4274_v38 }
 0x487   :  { %v4275_v24 = vadd.f32 %v8214_v56, %v4125_v51  ;;  %v3827_v56 = vadd.f32 %v10483_v40, %v3677_v16  ;;  %v4129_v38 = vadd.f32 %v10539_v30, %v10513_v49  ;;  %v4276_v40 = vadd.f32 %v10549_v35, %v4126_v1 }
 0x488   :  { %v4610_v11 = vmax.f32 %v4594_v26, 0.0  ;;  %v4592_v13 = vadd.f32 %v10569_v31, %v4569_v25  ;;  %v10585_v48 = vpop.f32.mrf.mxu1  ;;  %v4128_v25 = vadd.f32 %v10533_v8, %v10509_v45 }
 0x489   :  { %v4425_v18 = vadd.f32 %v8232_v5, %v4275_v24  ;;  %v3977_v3 = vadd.f32 %v10515_v52, %v3827_v56  ;;  %v4279_v17 = vadd.f32 %v10553_v62, %v4129_v38  ;;  %v3523_v24 = vadd.f32 %v10471_v41, %v10469_v10 }
 0x48a   :  { %v4608_v15 = vmax.f32 %v4592_v13, 0.0  ;;  %v10579_v63 = vpack.c.bf16 %v4610_v11, %v4609_v29  ;;  %v8235_v26 = vpop.f32.mrf.mxu1  ;;  %v4278_v53 = vadd.f32 %v10545_v27, %v4128_v25 }
 0x48b   :  { %v4127_v8 = vadd.f32 %v10543_v54, %v3977_v3  ;;  %v3832_v54 = vadd.f32 %v10487_v44, %v10485_v34  ;;  %v3833_v34 = vadd.f32 %v10495_v14, %v10493_v55 }
 0x48c   :  { %v10583_v42 = vpack.c.bf16 %v4608_v15, %v4607_v21  ;;  %v4387_v11 = vpop.f32.mrf.mxu1  ;;  %v9007_v21 = vld [vmem:[#allocation10 + $0x18] sm:$0xff]   ;;  %v4428_v51 = vadd.f32 %v8235_v26, %v4278_v53 }
 0x48d   :  { %8311 = vmatprep.subr.bf16.mxu0 %v9007_v21  ;;  %v4426_v20 = vadd.f32 %v4387_v11, %v4276_v40  ;;  %v4277_v27 = vadd.f32 %v10557_v58, %v4127_v8  ;;  %v3982_v58 = vadd.f32 %v10517_v43, %v3832_v54  ;;  %v3491_v11 = vadd.f32 %v10463_v6, %v10461_v4 }
 0x48e   :  { %v8236_v15 = vpop.f32.mrf.mxu1  ;;  %8312 = vmatpush3.bf16.msra.mxu0 %v9007_v21  ;;  %v11141_v21 = vld [vmem:[#allocation48_spill] sm:$0xff] }
 0x48f   :  { %v8249_v12 = vpop.f32.mrf.mxu0  ;;  %v4429_v30 = vadd.f32 %v8236_v15, %v4279_v17  ;;  %v4132_v56 = vadd.f32 %v10547_v47, %v3982_v58  ;;  %v11140_v47 = vld [vmem:[#allocation45_spill] sm:$0xff] }
 0x490   :  { %v4574_v2 = vadd.f32 %v8249_v12, %v4424_v61  ;;  %v4390_v61 = vpop.f32.mrf.mxu1 }
 0x491   :  { %v10587_v46 = vpop.f32.mrf.mxu0 }
 0x492   :  { %v4597_v9 = vadd.f32 %v10569_v31, %v4574_v2  ;;  %v4427_v2 = vadd.f32 %v4390_v61, %v4277_v27  ;;  %v11144_v27 = vld [vmem:[#allocation44_spill] sm:$0xff] }
 0x493   :  { %v8250_v22 = vpop.f32.mrf.mxu0 }
 0x494   :  { %v4575_v7 = vadd.f32 %v8250_v22, %v4425_v18  ;;  %v4613_v59 = vmax.f32 %v4597_v9, 0.0  ;;  %v3681_v18 = vadd.f32 %v10497_v39, %v3523_v24  ;;  %v8239_v22 = vpop.f32.mrf.mxu1  ;;  %v3830_v9 = vadd.f32 %v10491_v28, %v10489_v37  ;;  %v11145_v24 = vld [vmem:[#allocation43_spill] sm:$0xff] }
 0x495   :  { %v10606_v45 = vpop.f32.mrf.mxu0  ;;  %v3983_v37 = vadd.f32 %v10524_v32, %v3833_v34 }
 0x496   :  { %v4598_v23 = vadd.f32 %v10569_v31, %v4575_v7  ;;  %v3980_v44 = vadd.f32 %v10521_v60, %v3830_v9  ;;  %v3831_v43 = vadd.f32 %v10499_v57, %v3681_v18  ;;  %v4403_v25 = vpop.f32.mrf.mxu1  ;;  %v11138_v60 = vld [vmem:[#allocation35_spill] sm:$0xff]  ;;  %v11139_v57 = vld [vmem:[#allocation32_spill] sm:$0xff] }
 0x497   :  { %v4282_v1 = vadd.f32 %v11138_v60, %v4132_v56  ;;  %v3673_v38 = vadd.f32 %v11139_v57, %v3491_v11  ;;  %v4133_v40 = vadd.f32 %v11140_v47, %v3983_v37  ;;  %v11148_v56 = vld [vmem:[#allocation33_spill] sm:$0xff]  ;;  %v8995_v60 = vld [vmem:[#allocation8 + $0x30] sm:$0xff]   ;;  %v9001_v57 = vld [vmem:[#allocation8 + $0x60] sm:$0xff]  }
 0x498   :  { %v4614_v29 = vmax.f32 %v4598_v23, 0.0  ;;  %v4130_v55 = vadd.f32 %v10551_v50, %v3980_v44  ;;  %v3981_v14 = vadd.f32 %v10526_v33, %v3831_v43  ;;  %v8240_v53 = vpop.f32.mrf.mxu1  ;;  %v9003_v47 = vld [vmem:[#allocation8 + $0x70] sm:$0xff]  }
 0x499   :  { %v4432_v15 = vadd.f32 %v8239_v22, %v4282_v1  ;;  %v8997_v1 = vld [vmem:[#allocation8 + $0x40] sm:$0xff]  }
 0x49a   :  { %v10601_v13 = vpack.c.bf16 %v4614_v29, %v4613_v59  ;;  %v4280_v32 = vadd.f32 %v11141_v21, %v4130_v55  ;;  %v9005_v21 = vld [vmem:[#allocation8 + $0x80] sm:$0xff]  }
 0x49c   :  { %v4430_v6 = vadd.f32 %v4403_v25, %v4280_v32  ;;  %v4422_v25 = vadd.f32 %v10577_v19, %v11148_v56  ;;  %v9008_v19 = vld [vmem:[#allocation10 + $0x68] sm:$0xff]   ;;  %v9006_v32 = vld [vmem:[#allocation8 + $0x88] sm:$0xff]  }
 0x49f   :  { %v8253_v52 = vpop.f32.mrf.mxu0 }
 0x4a0   :  { %v4578_v5 = vadd.f32 %v8253_v52, %v4428_v51  ;;  %v11142_v51 = vld [vmem:[#allocation36_spill] sm:$0xff]  ;;  %v11143_v52 = vld [vmem:[#allocation47_spill] sm:$0xff] }
 0x4a1   :  { %v4537_v49 = vpop.f32.mrf.mxu0  ;;  %v4131_v17 = vadd.f32 %v11142_v51, %v3981_v14  ;;  %v4283_v4 = vadd.f32 %v11143_v52, %v4133_v40  ;;  %v9004_v40 = vld [vmem:[#allocation8 + $0x78] sm:$0xff]   ;;  %v9015_v51 = vld [vmem:[#allocation10 + $0x60] sm:$0xff]  }
 0x4a2   :  { %v4576_v35 = vadd.f32 %v4537_v49, %v4426_v20  ;;  %v4601_v62 = vadd.f32 %v10569_v31, %v4578_v5  ;;  %v4406_v20 = vpop.f32.mrf.mxu1  ;;  %v3823_v5 = vadd.f32 %v11144_v27, %v3673_v38  ;;  %v9002_v38 = vld [vmem:[#allocation8 + $0x68] sm:$0xff]  }
 0x4a3   :  { %v8254_v12 = vpop.f32.mrf.mxu0  ;;  %v4281_v61 = vadd.f32 %v10567_v36, %v4131_v17  ;;  %v4433_v49 = vadd.f32 %v8240_v53, %v4283_v4  ;;  %v8999_v53 = vld [vmem:[#allocation8 + $0x50] sm:$0xff]   ;;  %v10661_v17 = vld [vmem:[#allocation10 + $0x88] sm:$0xff]  }
 0x4a4   :  { %v4579_v0 = vadd.f32 %v8254_v12, %v4429_v30  ;;  %v4599_v7 = vadd.f32 %v10569_v31, %v4576_v35  ;;  %v4617_v26 = vmax.f32 %v4601_v62, 0.0  ;;  %v3973_v54 = vadd.f32 %v11145_v24, %v3823_v5 }
 0x4a5   :  { %v4540_v16 = vpop.f32.mrf.mxu0  ;;  %v4431_v12 = vadd.f32 %v4406_v20, %v4281_v61 }
 0x4a6   :  { %v4602_v10 = vadd.f32 %v10569_v31, %v4579_v0  ;;  %v4577_v41 = vadd.f32 %v4540_v16, %v4427_v2  ;;  %v4615_v28 = vmax.f32 %v4599_v7, 0.0  ;;  %v11146_v16 = vld [vmem:[#allocation34_spill] sm:$0xff] }
 0x4a7   :  { %v4123_v9 = vadd.f32 %v11146_v16, %v3973_v54 }
 0x4a8   :  { %v4618_v23 = vmax.f32 %v4602_v10, 0.0  ;;  %v4600_v39 = vadd.f32 %v10569_v31, %v4577_v41  ;;  %v11147_v41 = vld [vmem:[#allocation46_spill] sm:$0xff] }
 0x4a9   :  { %v4273_v34 = vadd.f32 %v11147_v41, %v4123_v9 }
 0x4aa   :  { %v4616_v59 = vmax.f32 %v4600_v39, 0.0  ;;  %v4664_v29 = vpack.c.bf16 %v4618_v23, %v4617_v26 }
 0x4ab   :  { %v4423_v43 = vadd.f32 %v10585_v48, %v4273_v34  ;;  %v9016_v34 = vld [vmem:[#allocation10 + $0x30] sm:$0xff]  }
 0x4ac   :  { %v4663_v3 = vpack.c.bf16 %v4616_v59, %v4615_v28  ;;  %v4572_v28 = vadd.f32 %v10587_v46, %v4422_v25  ;;  %v8990_v46 = vld [vmem:[#allocation8 + $0x8] sm:$0xff]  }
 0x4ad   :  { %v4573_v37 = vadd.f32 %v10606_v45, %v4423_v43  ;;  %v8992_v45 = vld [vmem:[#allocation8 + $0x18] sm:$0xff]  }
 0x4ae   :  { %v4595_v11 = vadd.f32 %v10569_v31, %v4572_v28 }
 0x4af   :  { %v8257_v8 = vpop.f32.mrf.mxu0  ;;  %v4596_v59 = vadd.f32 %v10569_v31, %v4573_v37  ;;  %v9018_v37 = vld [vmem:[#allocation10 + $0x40] sm:$0xff]  }
 0x4b0   :  { %v4582_v50 = vadd.f32 %v8257_v8, %v4432_v15  ;;  %v4611_v14 = vmax.f32 %v4595_v11, 0.0  ;;  %v9009_v15 = vld [vmem:[#allocation10 + $0x10] sm:$0xff]   ;;  %v9010_v8 = vld [vmem:[#allocation10 + $0x8] sm:$0xff]  }
 0x4b1   :  { %v4553_v33 = vpop.f32.mrf.mxu0  ;;  %v4612_v55 = vmax.f32 %v4596_v59, 0.0  ;;  %8313 = vmatprep.subr.bf16.mxu0 %v9009_v15 }
 0x4b2   :  { %v4580_v30 = vadd.f32 %v4553_v33, %v4430_v6  ;;  %v4605_v2 = vadd.f32 %v10569_v31, %v4582_v50  ;;  %8314 = vmatpush3.bf16.msra.mxu0 %v9009_v15 }
 0x4b3   :  { %v8258_v35 = vpop.f32.mrf.mxu0  ;;  %v4661_v48 = vpack.c.bf16 %v4612_v55, %v4611_v14  ;;  %8319 = vmatprep.subr.bf16.mxu0 %v9010_v8  ;;  %v9019_v55 = vld [vmem:[#allocation10 + $0x58] sm:$0xff]  }
 0x4b4   :  { %v4583_v62 = vadd.f32 %v8258_v35, %v4433_v49  ;;  %v4603_v18 = vadd.f32 %v10569_v31, %v4580_v30  ;;  %v4621_v7 = vmax.f32 %v4605_v2, 0.0  ;;  %v9011_v35 = vld [vmem:[#allocation10] sm:$0xff]   ;;  %v9012_v2 = vld [vmem:[#allocation10 + $0x28] sm:$0xff]  }
 0x4b5   :  { %v4556_v0 = vpop.f32.mrf.mxu0 }
 0x4b6   :  { %v4606_v58 = vadd.f32 %v10569_v31, %v4583_v62  ;;  %v4581_v22 = vadd.f32 %v4556_v0, %v4431_v12  ;;  %v4619_v44 = vmax.f32 %v4603_v18, 0.0 }
 0x4b8   :  { %v4622_v10 = vmax.f32 %v4606_v58, 0.0  ;;  %v4604_v36 = vadd.f32 %v10569_v31, %v4581_v22  ;;  %v8991_v31 = vld [vmem:[#allocation8 + $0x10] sm:$0xff]  }
 0x4b9   :  { %v9013_v58 = vld [vmem:[#allocation10 + $0x20] sm:$0xff]  }
 0x4ba   :  { %v4620_v26 = vmax.f32 %v4604_v36, 0.0  ;;  %v4666_v23 = vpack.c.bf16 %v4622_v10, %v4621_v7  ;;  %v9014_v7 = vld [vmem:[#allocation10 + $0x38] sm:$0xff]  }
 0x4bc   :  { %8259 = vmatprep.subr.bf16.mxu1 %v4666_v23  ;;  %v4665_v39 = vpack.c.bf16 %v4620_v26, %v4619_v44 }
 0x4bd   :  { %8260 = vmatpush3.bf16.msra.mxu1 %v4666_v23 }
 0x4be   :  { %8261 = vmatprep.subr.bf16.mxu1 %v4665_v39 }
 0x4c1   :  { %8262 = vmatpush3.bf16.msra.mxu1 %v4665_v39  ;;  %v9017_v39 = vld [vmem:[#allocation10 + $0x48] sm:$0xff]  }
 0x4c2   :  { %8263 = vmatprep.subr.bf16.mxu1 %v4664_v29 }
 0x4c5   :  { %8264 = vmatpush3.bf16.msra.mxu1 %v4664_v29  ;;  %v8993_v29 = vld [vmem:[#allocation8 + $0x20] sm:$0xff]  }
 0x4c6   :  { %8265 = vmatprep.subr.bf16.mxu1 %v4663_v3 }
 0x4c9   :  { %8266 = vmatpush3.bf16.msra.mxu1 %v4663_v3  ;;  %v8998_v3 = vld [vmem:[#allocation8 + $0x48] sm:$0xff]  }
 0x4ca   :  { %8267 = vmatprep.subr.bf16.mxu1 %v10601_v13 }
 0x4cd   :  { %8268 = vmatpush3.bf16.msra.mxu1 %v10601_v13  ;;  %v8994_v13 = vld [vmem:[#allocation8 + $0x28] sm:$0xff]  }
 0x4ce   :  { %8269 = vmatprep.subr.bf16.mxu1 %v4661_v48 }
 0x4d1   :  { %8270 = vmatpush3.bf16.msra.mxu1 %v4661_v48 }
 0x4d2   :  { %8271 = vmatprep.subr.bf16.mxu1 %v10579_v63 }
 0x4d5   :  { %8272 = vmatpush3.bf16.msra.mxu1 %v10579_v63  ;;  %v8996_v63 = vld [vmem:[#allocation8 + $0x38] sm:$0xff]  }
 0x4d6   :  { %8273 = vmatprep.subr.bf16.mxu1 %v10583_v42 }
 0x4d9   :  { %8274 = vmatpush3.bf16.msra.mxu1 %v10583_v42  ;;  %v9000_v42 = vld [vmem:[#allocation8 + $0x58] sm:$0xff]  }
 0x4da   :  { %8359 = vmatprep.subr.bf16.mxu1 %v9008_v19 }
 0x4dc   :  { %8276 = vmatmul.mubr.bf16.vlgmr.msra.gmra.mxu1 %v8990_v46  ;;  %v9020_v46 = vld [vmem:[#allocation10 + $0x50] sm:$0xff]  }
 0x4dd   :  { %8279 = vmatprep.mubr.bf16.mxu1 %v8991_v31  ;;  %8360 = vmatpush3.bf16.msra.mxu1 %v9008_v19 }
 0x4de   :  { %8361 = vmatprep.subr.bf16.mxu1 %v9015_v51 }
 0x4e1   :  { %8362 = vmatpush3.bf16.msra.mxu1 %v9015_v51 }
 0x4e2   :  { %8375 = vmatprep.subr.bf16.mxu1 %v10661_v17 }
 0x4e4   :  { %8280 = vmatmul.mubr.bf16.gmra.mxu1 %v8992_v45 }
 0x4e5   :  { %8283 = vmatprep.mubr.bf16.mxu1 %v8993_v29 }
 0x4ec   :  { %8284 = vmatmul.mubr.bf16.gmra.mxu1 %v8994_v13  ;;  %v9021_v13 = vld [vmem:[#allocation10 + $0x78] sm:$0xff]  }
 0x4ed   :  { %8287 = vmatprep.mubr.bf16.mxu1 %v8995_v60 }
 0x4f4   :  { %8288 = vmatmul.mubr.bf16.gmra.mxu1 %v8996_v63 }
 0x4f5   :  { %8291 = vmatprep.mubr.bf16.mxu1 %v8997_v1 }
 0x4fc   :  { %8292 = vmatmul.mubr.bf16.gmra.mxu1 %v8998_v3 }
 0x4fd   :  { %8295 = vmatprep.mubr.bf16.mxu1 %v8999_v53 }
 0x504   :  { %8296 = vmatmul.mubr.bf16.gmra.mxu1 %v9000_v42  ;;  %v9022_v42 = vld [vmem:[#allocation10 + $0x70] sm:$0xff]  }
 0x505   :  { %8299 = vmatprep.mubr.bf16.mxu1 %v9001_v57  ;;  %v9024_v57 = vld [vmem:[#allocation10 + $0x80] sm:$0xff]  }
 0x50c   :  { %8300 = vmatmul.mubr.bf16.gmra.mxu1 %v9002_v38 }
 0x50d   :  { %8303 = vmatprep.mubr.bf16.mxu1 %v9003_v47 }
 0x514   :  { %8304 = vmatmul.mubr.bf16.gmra.mxu1 %v9004_v40 }
 0x515   :  { %8307 = vmatprep.mubr.bf16.mxu1 %v9005_v21 }
 0x51c   :  { %8308 = vmatmul.mubr.bf16.gmra.mxu1 %v9006_v32 }
 0x59c   :  { %v8277_v52 = vpop.f32.mrf.mxu1 }
 0x59e   :  { %v4809_v4 = vpop.f32.mrf.mxu1 }
 0x5a0   :  { %v8278_v6 = vpop.f32.mrf.mxu1 }
 0x5a1   :  { %v4953_v0 = vpack.c.bf16 %v8278_v6, %v8277_v52 }
 0x5a2   :  { %v4812_v50 = vpop.f32.mrf.mxu1 }
 0x5a3   :  { %v4952_v24 = vpack.c.bf16 %v4812_v50, %v4809_v4  ;;  %v9031_v50 = vld [vmem:[#allocation13 + $0x38] sm:$0xff]  }
 0x5a4   :  { %v8281_v20 = vpop.f32.mrf.mxu1 }
 0x5a6   :  { %v4825_v33 = vpop.f32.mrf.mxu1 }
 0x5a8   :  { %v8282_v27 = vpop.f32.mrf.mxu1 }
 0x5a9   :  { %v4959_v49 = vpack.c.bf16 %v8282_v27, %v8281_v20  ;;  %v9032_v20 = vld [vmem:[#allocation13 + $0x30] sm:$0xff]  }
 0x5aa   :  { %v4828_v5 = vpop.f32.mrf.mxu1 }
 0x5ab   :  { %v4958_v61 = vpack.c.bf16 %v4828_v5, %v4825_v33  ;;  %v9033_v33 = vld [vmem:[#allocation13 + $0x28] sm:$0xff]  }
 0x5ac   :  { %v8285_v30 = vpop.f32.mrf.mxu1 }
 0x5ad   :  { %8315 = vmatprep.mubr.msk.bf16.mxu0 %vm4977_vm3, %v4958_v61 }
 0x5ae   :  { %v4841_v54 = vpop.f32.mrf.mxu1  ;;  %8316 = vmatmul.mubr.msk.bf16.vlgmr.msra.gmra.mxu0 %vm4977_vm3, %v4959_v49 }
 0x5af   :  { %8320 = vmatpush3.bf16.msra.mxu0 %v9010_v8  ;;  %8323 = vmatprep.mubr.msk.bf16.mxu0 %vm4977_vm3, %v4952_v24 }
 0x5b0   :  { %v8286_v12 = vpop.f32.mrf.mxu1  ;;  %8321 = vmatprep.subr.bf16.mxu0 %v9011_v35 }
 0x5b1   :  { %v5101_v36 = vpack.c.bf16 %v8286_v12, %v8285_v30 }
 0x5b2   :  { %v4844_v62 = vpop.f32.mrf.mxu1 }
 0x5b3   :  { %8322 = vmatpush3.bf16.msra.mxu0 %v9011_v35  ;;  %v5100_v22 = vpack.c.bf16 %v4844_v62, %v4841_v54 }
 0x5b4   :  { %v8289_v18 = vpop.f32.mrf.mxu1  ;;  %8327 = vmatprep.subr.bf16.mxu0 %v9012_v2 }
 0x5b6   :  { %v4857_v16 = vpop.f32.mrf.mxu1  ;;  %8324 = vmatmul.mubr.msk.bf16.vlgmr.msra.gmra.mxu0 %vm4977_vm3, %v4953_v0 }
 0x5b7   :  { %8328 = vmatpush3.bf16.msra.mxu0 %v9012_v2  ;;  %8331 = vmatprep.mubr.msk.bf16.mxu0 %vm4977_vm3, %v5100_v22 }
 0x5b8   :  { %v8290_v9 = vpop.f32.mrf.mxu1  ;;  %8329 = vmatprep.subr.bf16.mxu0 %v9013_v58 }
 0x5b9   :  { %v5179_v56 = vpack.c.bf16 %v8290_v9, %v8289_v18 }
 0x5ba   :  { %v4860_v10 = vpop.f32.mrf.mxu1 }
 0x5bb   :  { %8330 = vmatpush3.bf16.msra.mxu0 %v9013_v58  ;;  %v5178_v44 = vpack.c.bf16 %v4860_v10, %v4857_v16 }
 0x5bc   :  { %v8293_v41 = vpop.f32.mrf.mxu1  ;;  %8335 = vmatprep.subr.bf16.mxu0 %v9014_v7 }
 0x5be   :  { %v4873_v26 = vpop.f32.mrf.mxu1  ;;  %8332 = vmatmul.mubr.msk.bf16.vlgmr.msra.gmra.mxu0 %vm4977_vm3, %v5101_v36 }
 0x5bf   :  { %8336 = vmatpush3.bf16.msra.mxu0 %v9014_v7  ;;  %8339 = vmatprep.mubr.msk.bf16.mxu0 %vm4977_vm3, %v5178_v44 }
 0x5c0   :  { %v8294_v23 = vpop.f32.mrf.mxu1  ;;  %8337 = vmatprep.subr.bf16.mxu0 %v9016_v34 }
 0x5c1   :  { %v5257_v48 = vpack.c.bf16 %v8294_v23, %v8293_v41 }
 0x5c2   :  { %v4876_v43 = vpop.f32.mrf.mxu1 }
 0x5c3   :  { %8338 = vmatpush3.bf16.msra.mxu0 %v9016_v34  ;;  %v5256_v28 = vpack.c.bf16 %v4876_v43, %v4873_v26 }
 0x5c4   :  { %v8297_v25 = vpop.f32.mrf.mxu1  ;;  %8343 = vmatprep.subr.bf16.mxu0 %v9017_v39 }
 0x5c6   :  { %v4889_v59 = vpop.f32.mrf.mxu1  ;;  %8340 = vmatmul.mubr.msk.bf16.vlgmr.msra.gmra.mxu0 %vm4977_vm3, %v5179_v56 }
 0x5c7   :  { %8344 = vmatpush3.bf16.msra.mxu0 %v9017_v39  ;;  %8347 = vmatprep.mubr.msk.bf16.mxu0 %vm4977_vm3, %v5256_v28 }
 0x5c8   :  { %v8298_v11 = vpop.f32.mrf.mxu1  ;;  %8345 = vmatprep.subr.bf16.mxu0 %v9018_v37 }
 0x5c9   :  { %v5335_v1 = vpack.c.bf16 %v8298_v11, %v8297_v25 }
 0x5ca   :  { %v4892_v14 = vpop.f32.mrf.mxu1 }
 0x5cb   :  { %8346 = vmatpush3.bf16.msra.mxu0 %v9018_v37  ;;  %v5334_v31 = vpack.c.bf16 %v4892_v14, %v4889_v59 }
 0x5cc   :  { %v8301_v19 = vpop.f32.mrf.mxu1  ;;  %8351 = vmatprep.subr.bf16.mxu0 %v9019_v55 }
 0x5ce   :  { %v4905_v45 = vpop.f32.mrf.mxu1  ;;  %8348 = vmatmul.mubr.msk.bf16.vlgmr.msra.gmra.mxu0 %vm4977_vm3, %v5257_v48 }
 0x5cf   :  { %8352 = vmatpush3.bf16.msra.mxu0 %v9019_v55  ;;  %8355 = vmatprep.mubr.msk.bf16.mxu0 %vm4977_vm3, %v5334_v31 }
 0x5d0   :  { %v8302_v29 = vpop.f32.mrf.mxu1  ;;  %8353 = vmatprep.subr.bf16.mxu0 %v9020_v46 }
 0x5d1   :  { %v5413_v3 = vpack.c.bf16 %v8302_v29, %v8301_v19 }
 0x5d2   :  { %v4908_v60 = vpop.f32.mrf.mxu1 }
 0x5d3   :  { %v5412_v63 = vpack.c.bf16 %v4908_v60, %v4905_v45  ;;  %8354 = vmatpush3.bf16.msra.mxu0 %v9020_v46 }
 0x5d4   :  { %v8305_v53 = vpop.f32.mrf.mxu1  ;;  %8367 = vmatprep.subr.bf16.mxu0 %v9021_v13 }
 0x5d5   :  { %8363 = vmatprep.mubr.msk.bf16.mxu1 %vm4977_vm3, %v5412_v63 }
 0x5d6   :  { %v4921_v38 = vpop.f32.mrf.mxu1  ;;  %8356 = vmatmul.mubr.msk.bf16.vlgmr.msra.gmra.mxu0 %vm4977_vm3, %v5335_v1  ;;  %8364 = vmatmul.mubr.msk.bf16.vlgmr.msra.gmra.mxu1 %vm4977_vm3, %v5413_v3 }
 0x5d7   :  { %8368 = vmatpush3.bf16.msra.mxu0 %v9021_v13  ;;  %8376 = vmatpush3.bf16.msra.mxu1 %v10661_v17  ;;  %v9471_v17 = vmov 0.0  }
 0x5d8   :  { %v8306_v47 = vpop.f32.mrf.mxu1  ;;  %8369 = vmatprep.subr.bf16.mxu0 %v9022_v42  ;;  %8377 = vmatprep.subr.bf16.mxu1 %v9024_v57 }
 0x5d9   :  { %v5491_v32 = vpack.c.bf16 %v8306_v47, %v8305_v53 }
 0x5da   :  { %v4924_v40 = vpop.f32.mrf.mxu1 }
 0x5db   :  { %v5490_v21 = vpack.c.bf16 %v4924_v40, %v4921_v38  ;;  %8370 = vmatpush3.bf16.msra.mxu0 %v9022_v42  ;;  %8378 = vmatpush3.bf16.msra.mxu1 %v9024_v57 }
 0x5dc   :  { %v8309_v15 = vpop.f32.mrf.mxu1  ;;  %8383 = vmatprep.subr.bf16.mxu0 %v9471_v17  ;;  %8407 = vmatprep.subr.bf16.mxu1 %v9471_v17 }
 0x5dd   :  { %8371 = vmatprep.mubr.msk.bf16.mxu0 %vm4977_vm3, %v5490_v21 }
 0x5de   :  { %v4937_v8 = vpop.f32.mrf.mxu1  ;;  %8372 = vmatmul.mubr.msk.bf16.vlgmr.msra.gmra.mxu0 %vm4977_vm3, %v5491_v32 }
 0x5df   :  { %8387 = vmatprep.mubr.msk.bf16.mxu0 %vm9472_vm4, %v9471_v17 }
 0x5e0   :  { %v8310_v51 = vpop.f32.mrf.mxu1 }
 0x5e1   :  { %v5569_v6 = vpack.c.bf16 %v8310_v51, %v8309_v15 }
 0x5e2   :  { %v4940_v52 = vpop.f32.mrf.mxu1 }
 0x5e3   :  { %v5568_v4 = vpack.c.bf16 %v4940_v52, %v4937_v8 }
 0x5e5   :  { %8379 = vmatprep.mubr.msk.bf16.mxu1 %vm4977_vm3, %v5568_v4  ;;  %v7722_v4 = vld [vmem:[#allocation11] ss:$0 sm:$0xff] }
 0x5e6   :  { %8380 = vmatmul.mubr.msk.bf16.vlgmr.msra.gmra.mxu1 %vm4977_vm3, %v5569_v6 }
 0x5e7   :  { %8415 = vmatprep.mubr.msk.bf16.mxu1 %vm9472_vm4, %v9471_v17  ;;  %8408 = vmatpush3.bf16.msra.mxu1 %v9031_v50 }
 0x5e8   :  { %8409 = vmatprep.subr.bf16.mxu1 %v9471_v17 }
 0x5eb   :  { %8410 = vmatpush3.bf16.msra.mxu1 %v9032_v20 }
 0x5ec   :  { %8411 = vmatprep.subr.bf16.mxu1 %v9471_v17 }
 0x5ef   :  { %8412 = vmatpush3.bf16.msra.mxu1 %v9033_v33 }
 0x5f0   :  { %8413 = vmatprep.subr.bf16.mxu1 %v9471_v17 }
 0x66e   :  { %v8317_v27 = vpop.f32.mrf.mxu0 }
 0x670   :  { %v5018_v5 = vpop.f32.mrf.mxu0 }
 0x672   :  { %v8318_v61 = vpop.f32.mrf.mxu0 }
 0x674   :  { %v5021_v49 = vpop.f32.mrf.mxu0 }
 0x676   :  { %v8325_v30 = vpop.f32.mrf.mxu0 }
 0x677   :  { %v5094_v34 = vadd.f32 %v8325_v30, %v8317_v27 }
 0x678   :  { %v5085_v35 = vpop.f32.mrf.mxu0 }
 0x679   :  { %v5086_v43 = vadd.f32 %v5085_v35, %v5018_v5 }
 0x67a   :  { %v8326_v24 = vpop.f32.mrf.mxu0 }
 0x67b   :  { %v5097_v56 = vadd.f32 %v8326_v24, %v8318_v61 }
 0x67c   :  { %v5088_v54 = vpop.f32.mrf.mxu0 }
 0x67d   :  { %v5089_v59 = vadd.f32 %v5088_v54, %v5021_v49 }
 0x67e   :  { %v8333_v12 = vpop.f32.mrf.mxu0 }
 0x67f   :  { %v5176_v23 = vadd.f32 %v8333_v12, %v5094_v34  ;;  %v9029_v34 = vld [vmem:[%s10919_s7 + $0x20] ss:$0 sps:$4 sm:$0xff]  }
 0x680   :  { %v5159_v2 = vpop.f32.mrf.mxu0 }
 0x681   :  { %v5174_v11 = vadd.f32 %v5159_v2, %v5086_v43 }
 0x682   :  { %v8334_v62 = vpop.f32.mrf.mxu0 }
 0x683   :  { %v5177_v55 = vadd.f32 %v8334_v62, %v5097_v56 }
 0x684   :  { %v5162_v0 = vpop.f32.mrf.mxu0 }
 0x685   :  { %v5175_v19 = vadd.f32 %v5162_v0, %v5089_v59 }
 0x686   :  { %v8341_v18 = vpop.f32.mrf.mxu0 }
 0x687   :  { %v5254_v25 = vadd.f32 %v8341_v18, %v5176_v23  ;;  %v9037_v23 = vld [vmem:[#allocation13 + $0x48] sm:$0xff]  }
 0x688   :  { %v5237_v58 = vpop.f32.mrf.mxu0 }
 0x689   :  { %v5252_v46 = vadd.f32 %v5237_v58, %v5174_v11  ;;  %v9038_v11 = vld [vmem:[#allocation13 + $0x10] sm:$0xff]  }
 0x68a   :  { %v8342_v22 = vpop.f32.mrf.mxu0 }
 0x68b   :  { %v5255_v31 = vadd.f32 %v8342_v22, %v5177_v55 }
 0x68c   :  { %v5240_v16 = vpop.f32.mrf.mxu0 }
 0x68d   :  { %v5253_v60 = vadd.f32 %v5240_v16, %v5175_v19 }
 0x68e   :  { %v8349_v9 = vpop.f32.mrf.mxu0 }
 0x68f   :  { %v5332_v14 = vadd.f32 %v8349_v9, %v5254_v25  ;;  %v9025_v9 = vld [vmem:[%s10919_s7] sm:$0xff]  }
 0x690   :  { %v5315_v7 = vpop.f32.mrf.mxu0 }
 0x691   :  { %v5330_v63 = vadd.f32 %v5315_v7, %v5252_v46  ;;  %v9030_v7 = vld [vmem:[#allocation13 + $0x58] sm:$0xff]   ;;  %v9039_v46 = vld [vmem:[#allocation13 + $0x8] sm:$0xff]  }
 0x692   :  { %v8350_v10 = vpop.f32.mrf.mxu0 }
 0x693   :  { %v5333_v1 = vadd.f32 %v8350_v10, %v5255_v31  ;;  %v9026_v10 = vld [vmem:[%s10919_s7 + $0x8] sm:$0xff]  }
 0x694   :  { %v5318_v36 = vpop.f32.mrf.mxu0 }
 0x695   :  { %v5331_v3 = vadd.f32 %v5318_v36, %v5253_v60  ;;  %v9027_v36 = vld [vmem:[%s10919_s7 + $0x10] sm:$0xff]   ;;  %v9046_v60 = vld [vmem:[#allocation13 + $0x88] sm:$0xff]  }
 0x696   :  { %v8357_v41 = vpop.f32.mrf.mxu0  ;;  %v8365_v44 = vpop.f32.mrf.mxu1 }
 0x697   :  { %v5410_v45 = vadd.f32 %v8357_v41, %v5332_v14  ;;  %v9028_v41 = vld [vmem:[%s10919_s7 + $0x18] sm:$0xff]   ;;  %v9042_v14 = vld [vmem:[#allocation13 + $0x98] sm:$0xff]  }
 0x698   :  { %v5393_v26 = vpop.f32.mrf.mxu0  ;;  %v5471_v37 = vpop.f32.mrf.mxu1 }
 0x699   :  { %v5488_v53 = vadd.f32 %v8365_v44, %v5410_v45  ;;  %v5408_v42 = vadd.f32 %v5393_v26, %v5330_v63  ;;  %v9034_v44 = vld [vmem:[#allocation13 + $0x50] sm:$0xff]   ;;  %v9035_v26 = vld [vmem:[#allocation13 + $0x20] sm:$0xff]  }
 0x69a   :  { %v8358_v39 = vpop.f32.mrf.mxu0  ;;  %v8366_v29 = vpop.f32.mrf.mxu1  ;;  %8414 = vmatpush3.bf16.msra.mxu1 %v9035_v26  ;;  %v9044_v45 = vld [vmem:[#allocation13 + $0x90] sm:$0xff]  }
 0x69b   :  { %v5411_v57 = vadd.f32 %v8358_v39, %v5333_v1  ;;  %v5486_v15 = vadd.f32 %v5471_v37, %v5408_v42  ;;  %8419 = vmatprep.subr.bf16.mxu1 %v9471_v17  ;;  %v9040_v39 = vld [vmem:[#allocation13 + $0x40] sm:$0xff]   ;;  %v9036_v37 = vld [vmem:[#allocation13 + $0x18] sm:$0xff]  }
 0x69c   :  { %v5396_v28 = vpop.f32.mrf.mxu0  ;;  %v5474_v38 = vpop.f32.mrf.mxu1  ;;  %v9077_v26 = vld [vmem:[#allocation17 + $0xcc] ss:$16 sps:$4 sm:$0xff]  }
 0x69d   :  { %v5409_v40 = vadd.f32 %v5396_v28, %v5331_v3  ;;  %v5489_v8 = vadd.f32 %v8366_v29, %v5411_v57  ;;  %v9043_v3 = vld [vmem:[#allocation13 + $0x78] sm:$0xff]  }
 0x69e   :  { %v8373_v48 = vpop.f32.mrf.mxu0 }
 0x69f   :  { %v5566_v21 = vadd.f32 %v8373_v48, %v5488_v53  ;;  %v5487_v50 = vadd.f32 %v5474_v38, %v5409_v40  ;;  %v9048_v53 = vld [vmem:[#allocation13 + $0x80] sm:$0xff]   ;;  %v9045_v40 = vld [vmem:[#allocation13 + $0x70] sm:$0xff]  }
 0x6a0   :  { %v5549_v13 = vpop.f32.mrf.mxu0 }
 0x6a1   :  { %v5564_v20 = vadd.f32 %v5549_v13, %v5486_v15  ;;  %v9041_v13 = vld [vmem:[#allocation13] sm:$0xff]  }
 0x6a2   :  { %v8374_v47 = vpop.f32.mrf.mxu0 }
 0x6a3   :  { %v5567_v33 = vadd.f32 %v8374_v47, %v5489_v8  ;;  %v9047_v8 = vld [vmem:[#allocation13 + $0x68] sm:$0xff]  }
 0x6a4   :  { %v5552_v52 = vpop.f32.mrf.mxu0 }
 0x6a5   :  { %v5565_v5 = vadd.f32 %v5552_v52, %v5487_v50  ;;  %v9054_v50 = vld [vmem:[#allocation13 + $0xc8] sm:$0xff]  }
 0x6a6   :  { %v8381_v32 = vpop.f32.mrf.mxu1 }
 0x6a7   :  { %v5644_v51 = vadd.f32 %v8381_v32, %v5566_v21  ;;  %v9050_v21 = vld [vmem:[#allocation13 + $0xd8] sm:$0xff]  }
 0x6a8   :  { %v5627_v6 = vpop.f32.mrf.mxu1 }
 0x6a9   :  { %v5655_v61 = vadd.f32 %v7722_v4, %v5644_v51  ;;  %v5642_v49 = vadd.f32 %v5627_v6, %v5564_v20  ;;  %v9052_v51 = vld [vmem:[#allocation13 + $0xd0] sm:$0xff]   ;;  %v9049_v6 = vld [vmem:[#allocation13 + $0x60] sm:$0xff]  }
 0x6aa   :  { %v8382_v27 = vpop.f32.mrf.mxu1 }
 0x6ab   :  { %v5645_v30 = vadd.f32 %v8382_v27, %v5567_v33  ;;  %v5659_v12 = vmax.f32 %v5655_v61, 0.0  ;;  %v5653_v2 = vadd.f32 %v7722_v4, %v5642_v49  ;;  %v9051_v27 = vld [vmem:[#allocation13 + $0xb8] sm:$0xff]  }
 0x6ac   :  { %v5630_v35 = vpop.f32.mrf.mxu1 }
 0x6ad   :  { %v5656_v24 = vadd.f32 %v7722_v4, %v5645_v30  ;;  %v5643_v54 = vadd.f32 %v5630_v35, %v5565_v5  ;;  %v5657_v22 = vmax.f32 %v5653_v2, 0.0  ;;  %v9056_v5 = vld [vmem:[#allocation13 + $0xc0] sm:$0xff]   ;;  %v9060_v2 = vld [vmem:[#allocation13 + $0x110] sm:$0xff]  }
 0x6af   :  { %v5660_v62 = vmax.f32 %v5656_v24, 0.0  ;;  %v5654_v0 = vadd.f32 %v7722_v4, %v5643_v54  ;;  %v9053_v24 = vld [vmem:[#allocation13 + $0xb0] sm:$0xff]   ;;  %v9058_v54 = vld [vmem:[#allocation13 + $0x118] sm:$0xff]  }
 0x6b1   :  { %v5671_v18 = vpack.c.bf16 %v5660_v62, %v5659_v12  ;;  %v5658_v58 = vmax.f32 %v5654_v0, 0.0  ;;  %v9055_v12 = vld [vmem:[#allocation13 + $0xa8] sm:$0xff]   ;;  %v9057_v62 = vld [vmem:[#allocation13 + $0xa0] sm:$0xff]  }
 0x6b2   :  { %v9062_v0 = vld [vmem:[#allocation13 + $0x108] sm:$0xff]  }
 0x6b3   :  { %8384 = vmatpush3.bf16.msra.mxu0 %v5671_v18  ;;  %v5670_v16 = vpack.c.bf16 %v5658_v58, %v5657_v22  ;;  %v9059_v18 = vld [vmem:[#allocation13 + $0xf8] sm:$0xff]   ;;  %v9064_v58 = vld [vmem:[#allocation13 + $0x100] sm:$0xff]  }
 0x6b4   :  { %8385 = vmatprep.subr.bf16.mxu0 %v9471_v17 }
 0x6b7   :  { %8386 = vmatpush3.bf16.msra.mxu0 %v5670_v16 }
 0x6b8   :  { %8431 = vmatprep.subr.bf16.mxu0 %v9471_v17 }
 0x6ba   :  { %8388 = vmatmul.mubr.msk.bf16.vlgmr.msra.gmra.mxu0 %vm4977_vm3, %v9025_v9  ;;  %v9061_v9 = vld [vmem:[#allocation13 + $0xf0] sm:$0xff]  }
 0x6bb   :  { %8391 = vmatprep.mubr.msk.bf16.mxu0 %vm9472_vm4, %v9471_v17  ;;  %8432 = vmatpush3.bf16.msra.mxu0 %v9030_v7  ;;  %v9063_v7 = vld [vmem:[#allocation13 + $0xe8] sm:$0xff]  }
 0x6bc   :  { %8433 = vmatprep.subr.bf16.mxu0 %v9471_v17 }
 0x6bf   :  { %8434 = vmatpush3.bf16.msra.mxu0 %v9034_v44  ;;  %v9071_v44 = vld [vmem:[#allocation17 + $0xec] ss:$16 sps:$4 sm:$0xff]  }
 0x6c0   :  { %8435 = vmatprep.subr.bf16.mxu0 %v9471_v17 }
 0x6c2   :  { %8392 = vmatmul.mubr.msk.bf16.gmra.mxu0 %vm4977_vm3, %v9026_v10  ;;  %v11149_v10 = vmov 0  }
 0x6c3   :  { %8395 = vmatprep.mubr.msk.bf16.mxu0 %vm9472_vm4, %v9471_v17  ;;  %8436 = vmatpush3.bf16.msra.mxu0 %v9037_v23  ;;  %v9075_v23 = vld [vmem:[#allocation17 + $0xc8] ss:$16 sps:$4 sm:$0xff]  }
 0x6c4   :  { %8437 = vmatprep.subr.bf16.mxu0 %v9471_v17 }
 0x6c7   :  { %8438 = vmatpush3.bf16.msra.mxu0 %v9040_v39  ;;  %v9083_v39 = vld [vmem:[#allocation17 + $0xac] ss:$16 sps:$4 sm:$0xff]  }
 0x6c8   :  { %8455 = vmatprep.subr.bf16.mxu0 %v9471_v17 }
 0x6ca   :  { %8396 = vmatmul.mubr.msk.bf16.gmra.mxu0 %vm4977_vm3, %v9027_v36  ;;  %v9065_v36 = vld [vmem:[#allocation13 + $0xe0] sm:$0xff]  }
 0x6cb   :  { %8399 = vmatprep.mubr.msk.bf16.mxu0 %vm9472_vm4, %v9471_v17 }
 0x6d2   :  { %8400 = vmatmul.mubr.msk.bf16.gmra.mxu0 %vm4977_vm3, %v9028_v41 }
 0x6d3   :  { %8403 = vmatprep.mubr.msk.bf16.mxu0 %vm9472_vm4, %v9471_v17 }
 0x6da   :  { %8404 = vmatmul.mubr.msk.bf16.gmra.mxu0 %vm4977_vm3, %v9029_v34  ;;  %v9069_v34 = vld [vmem:[#allocation17 + $0xe8] ss:$16 sps:$4 sm:$0xff]  }
 0x6db   :  { %8439 = vmatprep.mubr.msk.bf16.mxu0 %vm9472_vm4, %v9471_v17 }
 0x77a   :  { %v5744_v43 = vpop.f32.mrf.mxu0 }
 0x77b   :  { %v5782_v57 = vpack.c.bf16 %v5744_v43, %v5744_v43  ;;  %v9081_v43 = vld [vmem:[#allocation17 + $0xa8] ss:$16 sps:$4 sm:$0xff]  }
 0x77c   :  { %v8389_v56 = vpop.f32.mrf.mxu0 }
 0x77d   :  { %v9089_v56 = vld [vmem:[#allocation17 + $0x8c] ss:$16 sps:$4 sm:$0xff]  }
 0x77e   :  { %v5747_v25 = vpop.f32.mrf.mxu0 }
 0x77f   :  { %v5791_v28 = vpack.c.bf16 %v5747_v25, %v5747_v25  ;;  %v9087_v25 = vld [vmem:[#allocation17 + $0x88] ss:$16 sps:$4 sm:$0xff]  }
 0x780   :  { %v8390_v59 = vpop.f32.mrf.mxu0 }
 0x781   :  { %8416 = vmatmul.mubr.msk.bf16.vlgmr.msra.gmra.mxu1 %vm5825_vm5, %v5791_v28  ;;  %v9093_v28 = vld [vmem:[#allocation17 + $0x68] ss:$16 sps:$4 sm:$0xff]   ;;  %v9101_v59 = vld [vmem:[#allocation17 + $0x4c] ss:$16 sps:$4 sm:$0xff]  }
 0x782   :  { %8420 = vmatpush3.bf16.msra.mxu1 %v9036_v37  ;;  %v5752_v55 = vpop.f32.mrf.mxu0  ;;  %8427 = vmatprep.mubr.msk.bf16.mxu1 %vm9472_vm4, %v9471_v17  ;;  %v9095_v37 = vld [vmem:[#allocation17 + $0x6c] ss:$16 sps:$4 sm:$0xff]  }
 0x783   :  { %8421 = vmatprep.subr.bf16.mxu1 %v9471_v17  ;;  %v5936_v48 = vpack.c.bf16 %v5752_v55, %v5752_v55  ;;  %v9107_v55 = vld [vmem:[#allocation17 + $0x2c] ss:$16 sps:$4 sm:$0xff]  }
 0x784   :  { %v8393_v19 = vpop.f32.mrf.mxu0 }
 0x785   :  { %8440 = vmatmul.mubr.msk.bf16.vlgmr.msra.gmra.mxu0 %vm5825_vm5, %v5936_v48  ;;  %v9113_v48 = vld [vmem:[#allocation17 + $0xc] ss:$16 sps:$4 sm:$0xff]   ;;  %v9111_v19 = vld [vmem:[#allocation17 + $0x8] ss:$16 sps:$4 sm:$0xff]  }
 0x786   :  { %8422 = vmatpush3.bf16.msra.mxu1 %v9038_v11  ;;  %8456 = vmatpush3.bf16.msra.mxu0 %v9042_v14  ;;  %v5755_v31 = vpop.f32.mrf.mxu0  ;;  %v9099_v11 = vld [vmem:[#allocation17 + $0x48] ss:$16 sps:$4 sm:$0xff]  }
 0x787   :  { %8423 = vmatprep.subr.bf16.mxu1 %v9471_v17  ;;  %8457 = vmatprep.subr.bf16.mxu0 %v9471_v17  ;;  %v6014_v49 = vpack.c.bf16 %v5755_v31, %v5755_v31  ;;  %v9105_v14 = vld [vmem:[#allocation17 + $0x28] ss:$16 sps:$4 sm:$0xff]  }
 0x788   :  { %v8394_v29 = vpop.f32.mrf.mxu0  ;;  %8463 = vmatprep.mubr.msk.bf16.mxu0 %vm9472_vm4, %v9471_v17 }
 0x78a   :  { %8424 = vmatpush3.bf16.msra.mxu1 %v9039_v46  ;;  %8458 = vmatpush3.bf16.msra.mxu0 %v9044_v45  ;;  %v5760_v63 = vpop.f32.mrf.mxu0 }
 0x78b   :  { %8425 = vmatprep.subr.bf16.mxu1 %v9471_v17  ;;  %8459 = vmatprep.subr.bf16.mxu0 %v9471_v17  ;;  %v6092_v47 = vpack.c.bf16 %v5760_v63, %v5760_v63 }
 0x78c   :  { %v8397_v1 = vpop.f32.mrf.mxu0 }
 0x78e   :  { %8426 = vmatpush3.bf16.msra.mxu1 %v9041_v13  ;;  %8460 = vmatpush3.bf16.msra.mxu0 %v9046_v60  ;;  %v10740_v42 = vpop.f32.mrf.mxu0 }
 0x78f   :  { %8443 = vmatprep.subr.bf16.mxu1 %v9471_v17  ;;  %8461 = vmatprep.subr.bf16.mxu0 %v9471_v17  ;;  %v6170_v22 = vpack.c.bf16 %v10740_v42, %v10740_v42 }
 0x790   :  { %v8398_v38 = vpop.f32.mrf.mxu0 }
 0x791   :  { %8428 = vmatmul.mubr.msk.bf16.vlgmr.msra.gmra.mxu1 %vm5825_vm5, %v5782_v57 }
 0x792   :  { %8444 = vmatpush3.bf16.msra.mxu1 %v9043_v3  ;;  %8462 = vmatpush3.bf16.msra.mxu0 %v9048_v53  ;;  %v5768_v32 = vpop.f32.mrf.mxu0 }
 0x793   :  { %8445 = vmatprep.subr.bf16.mxu1 %v9471_v17  ;;  %8479 = vmatprep.subr.bf16.mxu0 %v9471_v17  ;;  %v6248_v35 = vpack.c.bf16 %v5768_v32, %v5768_v32 }
 0x794   :  { %8451 = vmatprep.mubr.msk.bf16.mxu1 %vm9472_vm4, %v9471_v17  ;;  %v8401_v15 = vpop.f32.mrf.mxu0 }
 0x795   :  { %8464 = vmatmul.mubr.msk.bf16.vlgmr.msra.gmra.mxu0 %vm5825_vm5, %v6092_v47 }
 0x796   :  { %8446 = vmatpush3.bf16.msra.mxu1 %v9045_v40  ;;  %8480 = vmatpush3.bf16.msra.mxu0 %v9050_v21  ;;  %v10750_v52 = vpop.f32.mrf.mxu0 }
 0x797   :  { %8447 = vmatprep.subr.bf16.mxu1 %v9471_v17  ;;  %8481 = vmatprep.subr.bf16.mxu0 %v9471_v17  ;;  %v6326_v41 = vpack.c.bf16 %v10750_v52, %v10750_v52 }
 0x798   :  { %8487 = vmatprep.mubr.msk.bf16.mxu0 %vm9472_vm4, %v9471_v17  ;;  %v8402_v4 = vpop.f32.mrf.mxu0 }
 0x79a   :  { %8448 = vmatpush3.bf16.msra.mxu1 %v9047_v8  ;;  %8482 = vmatpush3.bf16.msra.mxu0 %v9052_v51  ;;  %v5776_v20 = vpop.f32.mrf.mxu0 }
 0x79b   :  { %8449 = vmatprep.subr.bf16.mxu1 %v9471_v17  ;;  %8483 = vmatprep.subr.bf16.mxu0 %v9471_v17  ;;  %v6404_v16 = vpack.c.bf16 %v5776_v20, %v5776_v20 }
 0x79c   :  { %v8405_v33 = vpop.f32.mrf.mxu0 }
 0x79e   :  { %8450 = vmatpush3.bf16.msra.mxu1 %v9049_v6  ;;  %8484 = vmatpush3.bf16.msra.mxu0 %v9054_v50  ;;  %v5779_v61 = vpop.f32.mrf.mxu0 }
 0x79f   :  { %8467 = vmatprep.subr.bf16.mxu1 %v9471_v17  ;;  %8485 = vmatprep.subr.bf16.mxu0 %v9471_v17 }
 0x7a0   :  { %v8406_v30 = vpop.f32.mrf.mxu0 }
 0x7a1   :  { %8452 = vmatmul.mubr.msk.bf16.vlgmr.msra.gmra.mxu1 %vm5825_vm5, %v6014_v49 }
 0x7a2   :  { %8468 = vmatpush3.bf16.msra.mxu1 %v9051_v27  ;;  %8486 = vmatpush3.bf16.msra.mxu0 %v9056_v5 }
 0x7a3   :  { %8469 = vmatprep.subr.bf16.mxu1 %v9471_v17  ;;  %8503 = vmatprep.subr.bf16.mxu0 %v9471_v17 }
 0x7a4   :  { %8475 = vmatprep.mubr.msk.bf16.mxu1 %vm9472_vm4, %v9471_v17 }
 0x7a5   :  { %8488 = vmatmul.mubr.msk.bf16.vlgmr.msra.gmra.mxu0 %vm5825_vm5, %v6248_v35 }
 0x7a6   :  { %8470 = vmatpush3.bf16.msra.mxu1 %v9053_v24  ;;  %8504 = vmatpush3.bf16.msra.mxu0 %v9058_v54 }
 0x7a7   :  { %8471 = vmatprep.subr.bf16.mxu1 %v9471_v17  ;;  %8505 = vmatprep.subr.bf16.mxu0 %v9471_v17 }
 0x7a8   :  { %8511 = vmatprep.mubr.msk.bf16.mxu0 %vm9472_vm4, %v9471_v17 }
 0x7aa   :  { %8472 = vmatpush3.bf16.msra.mxu1 %v9055_v12  ;;  %8506 = vmatpush3.bf16.msra.mxu0 %v9060_v2 }
 0x7ab   :  { %8473 = vmatprep.subr.bf16.mxu1 %v9471_v17  ;;  %8507 = vmatprep.subr.bf16.mxu0 %v9471_v17 }
 0x7ae   :  { %8474 = vmatpush3.bf16.msra.mxu1 %v9057_v62  ;;  %8508 = vmatpush3.bf16.msra.mxu0 %v9062_v0 }
 0x7af   :  { %8491 = vmatprep.subr.bf16.mxu1 %v9471_v17  ;;  %8509 = vmatprep.subr.bf16.mxu0 %v9471_v17 }
 0x7b1   :  { %8476 = vmatmul.mubr.msk.bf16.vlgmr.msra.gmra.mxu1 %vm5825_vm5, %v6170_v22  ;;  %v7778_v22 = vld [vmem:[#allocation14] ss:$0 sm:$0xff] }
 0x7b2   :  { %8492 = vmatpush3.bf16.msra.mxu1 %v9059_v18  ;;  %8510 = vmatpush3.bf16.msra.mxu0 %v9064_v58 }
 0x7b3   :  { %8493 = vmatprep.subr.bf16.mxu1 %v9471_v17  ;;  %8499 = vmatprep.mubr.msk.bf16.mxu1 %vm9472_vm4, %v9471_v17 }
 0x7b4   :  { %6797 = vmatprep.subr.bf16.mxu0 %v9071_v44 }
 0x7b5   :  { %8512 = vmatmul.mubr.msk.bf16.vlgmr.msra.gmra.mxu0 %vm5825_vm5, %v6404_v16 }
 0x7b6   :  { %8494 = vmatpush3.bf16.msra.mxu1 %v9061_v9  ;;  %6829 = vmatprep.mubr.bf16.mxu0 %v11149_v10 }
 0x7b7   :  { %8495 = vmatprep.subr.bf16.mxu1 %v9471_v17  ;;  %6798 = vmatpush1.bf16.msra.mxu0 %v9069_v34 }
 0x7b8   :  { %6799 = vmatprep.subr.bf16.mxu0 %v9077_v26  ;;  %v9068_v26 = vld [vmem:[#allocation17 + $0xe4] ss:$16 sps:$4 sm:$0xff]  }
 0x7ba   :  { %8496 = vmatpush3.bf16.msra.mxu1 %v9063_v7 }
 0x7bb   :  { %8497 = vmatprep.subr.bf16.mxu1 %v9471_v17  ;;  %6800 = vmatpush1.bf16.msra.mxu0 %v9075_v23 }
 0x7bc   :  { %6801 = vmatprep.subr.bf16.mxu0 %v9083_v39  ;;  %v6491_v39 = vld [vmem:[#allocation16] sm:$0x1] }
 0x7be   :  { %8498 = vmatpush3.bf16.msra.mxu1 %v9065_v36 }
 0x7bf   :  { %8515 = vmatprep.subr.bf16.mxu1 %v9471_v17  ;;  %6802 = vmatpush1.bf16.msra.mxu0 %v9081_v43  ;;  %v9066_v43 = vld [vmem:[#allocation17 + $0xe0] ss:$16 sps:$4 sm:$0xff]  }
 0x7c0   :  { %6803 = vmatprep.subr.bf16.mxu0 %v9089_v56  ;;  %v9074_v56 = vld [vmem:[#allocation17 + $0xc4] ss:$16 sps:$4 sm:$0xff]  }
 0x7c1   :  { %8500 = vmatmul.mubr.msk.bf16.vlgmr.msra.gmra.mxu1 %vm5825_vm5, %v6326_v41 }
 0x7c2   :  { %8517 = vmatprep.mubr.msk.bf16.mxu1 %vm9472_vm4, %v9471_v17 }
 0x7c3   :  { %6804 = vmatpush1.bf16.msra.mxu0 %v9087_v25  ;;  %v9072_v25 = vld [vmem:[#allocation17 + $0xc0] ss:$16 sps:$4 sm:$0xff]  }
 0x7c4   :  { %6805 = vmatprep.subr.bf16.mxu0 %v9095_v37  ;;  %v9080_v37 = vld [vmem:[#allocation17 + $0xa4] ss:$16 sps:$4 sm:$0xff]  }
 0x7c7   :  { %6806 = vmatpush1.bf16.msra.mxu0 %v9093_v28  ;;  %v9078_v28 = vld [vmem:[#allocation17 + $0xa0] ss:$16 sps:$4 sm:$0xff]  }
 0x7c8   :  { %6807 = vmatprep.subr.bf16.mxu0 %v9101_v59  ;;  %v9086_v59 = vld [vmem:[#allocation17 + $0x84] ss:$16 sps:$4 sm:$0xff]  }
 0x7cb   :  { %6808 = vmatpush1.bf16.msra.mxu0 %v9099_v11  ;;  %v9084_v11 = vld [vmem:[#allocation17 + $0x80] ss:$16 sps:$4 sm:$0xff]  }
 0x7cc   :  { %6809 = vmatprep.subr.bf16.mxu0 %v9107_v55  ;;  %v9092_v55 = vld [vmem:[#allocation17 + $0x64] ss:$16 sps:$4 sm:$0xff]  }
 0x7cf   :  { %6810 = vmatpush1.bf16.msra.mxu0 %v9105_v14  ;;  %v9090_v14 = vld [vmem:[#allocation17 + $0x60] ss:$16 sps:$4 sm:$0xff]  }
 0x7d0   :  { %6811 = vmatprep.subr.bf16.mxu0 %v9113_v48  ;;  %v9098_v48 = vld [vmem:[#allocation17 + $0x44] ss:$16 sps:$4 sm:$0xff]  }
 0x7d3   :  { %6812 = vmatpush1.bf16.msra.mxu0 %v9111_v19  ;;  %v9096_v19 = vld [vmem:[#allocation17 + $0x40] ss:$16 sps:$4 sm:$0xff]  }
 0x841   :  { %v5863_v46 = vpop.f32.mrf.mxu1 }
 0x843   :  { %v8417_v31 = vpop.f32.mrf.mxu1 }
 0x844   :  { %v9110_v31 = vld [vmem:[#allocation17 + $0x4] ss:$16 sps:$4 sm:$0xff]  }
 0x845   :  { %v5866_v45 = vpop.f32.mrf.mxu1  ;;  %v6007_v29 = vpop.f32.mrf.mxu0 }
 0x846   :  { %v9108_v45 = vld [vmem:[#allocation17] ss:$16 sps:$4 sm:$0xff]  }
 0x847   :  { %v8418_v13 = vpop.f32.mrf.mxu1  ;;  %v8441_v60 = vpop.f32.mrf.mxu0 }
 0x848   :  { %v9115_v13 = vld [vmem:[%s10925_s13 + $0xf8] sm:$0xff]  }
 0x849   :  { %v6010_v63 = vpop.f32.mrf.mxu0  ;;  %8070 = vmatprep.subr.bf16.mxu0 %v9115_v13 }
 0x84a   :  { %v9116_v63 = vld [vmem:[%s10925_s13 + $0x38] sm:$0xff]  }
 0x84b   :  { %v8442_v1 = vpop.f32.mrf.mxu0 }
 0x84c   :  { %v9117_v1 = vld [vmem:[%s10925_s13 + $0xb8] sm:$0xff]  }
 0x851   :  { %v5930_v3 = vpop.f32.mrf.mxu1 }
 0x852   :  { %v5931_v20 = vadd.f32 %v5930_v3, %v5863_v46  ;;  %v9104_v46 = vld [vmem:[#allocation17 + $0x24] ss:$16 sps:$4 sm:$0xff]  }
 0x853   :  { %v8429_v53 = vpop.f32.mrf.mxu1 }
 0x854   :  { %v6013_v5 = vadd.f32 %v6007_v29, %v5931_v20  ;;  %v9114_v29 = vld [vmem:[%s10925_s13 + $0x78] sm:$0xff]   ;;  %v9118_v53 = vld [vmem:[%s10925_s13 + $0x70] sm:$0xff]  }
 0x855   :  { %v5933_v42 = vpop.f32.mrf.mxu1  ;;  %v6163_v57 = vpop.f32.mrf.mxu0  ;;  %v9130_v20 = vld [vmem:[%s10925_s13 + $0x58] sm:$0xff]  }
 0x856   :  { %v9119_v42 = vld [vmem:[%s10925_s13 + $0xf0] sm:$0xff]  }
 0x857   :  { %v8430_v38 = vpop.f32.mrf.mxu1  ;;  %v8465_v47 = vpop.f32.mrf.mxu0 }
 0x858   :  { %v9120_v47 = vld [vmem:[%s10925_s13 + $0x30] sm:$0xff]  }
 0x859   :  { %v6166_v40 = vpop.f32.mrf.mxu0 }
 0x85a   :  { %v9121_v40 = vld [vmem:[%s10925_s13 + $0xb0] sm:$0xff]  }
 0x85b   :  { %v8466_v21 = vpop.f32.mrf.mxu0 }
 0x85c   :  { %v9122_v21 = vld [vmem:[%s10925_s13 + $0x68] sm:$0xff]  }
 0x861   :  { %v6085_v32 = vpop.f32.mrf.mxu1 }
 0x862   :  { %v6091_v30 = vadd.f32 %v6085_v32, %v6013_v5  ;;  %v9123_v32 = vld [vmem:[%s10925_s13 + $0xe8] sm:$0xff]   ;;  %v9133_v5 = vld [vmem:[%s10925_s13 + $0x98] sm:$0xff]  }
 0x863   :  { %v8453_v15 = vpop.f32.mrf.mxu1 }
 0x864   :  { %v6169_v12 = vadd.f32 %v6163_v57, %v6091_v30  ;;  %v9136_v30 = vld [vmem:[%s10925_s13 + $0x10] sm:$0xff]  }
 0x865   :  { %v6088_v8 = vpop.f32.mrf.mxu1  ;;  %v6319_v51 = vpop.f32.mrf.mxu0 }
 0x866   :  { %v9124_v8 = vld [vmem:[%s10925_s13 + $0x28] sm:$0xff]  }
 0x867   :  { %v8454_v52 = vpop.f32.mrf.mxu1  ;;  %v8489_v4 = vpop.f32.mrf.mxu0 }
 0x868   :  { %v9126_v52 = vld [vmem:[%s10925_s13 + $0x60] sm:$0xff]  }
 0x869   :  { %v6322_v6 = vpop.f32.mrf.mxu0  ;;  %v9127_v4 = vld [vmem:[%s10925_s13 + $0xe0] sm:$0xff]  }
 0x86a   :  { %v9128_v6 = vld [vmem:[%s10925_s13 + $0x20] sm:$0xff]  }
 0x86b   :  { %v8490_v50 = vpop.f32.mrf.mxu0 }
 0x86c   :  { %v9129_v50 = vld [vmem:[%s10925_s13 + $0xa0] sm:$0xff]  }
 0x871   :  { %v6241_v33 = vpop.f32.mrf.mxu1 }
 0x872   :  { %v6247_v62 = vadd.f32 %v6241_v33, %v6169_v12  ;;  %v9131_v33 = vld [vmem:[%s10925_s13 + $0xd8] sm:$0xff]   ;;  %v9140_v12 = vld [vmem:[%s10925_s13 + $0x8] sm:$0xff]  }
 0x873   :  { %v8477_v27 = vpop.f32.mrf.mxu1 }
 0x874   :  { %v6325_v0 = vadd.f32 %v6319_v51, %v6247_v62  ;;  %v9125_v51 = vld [vmem:[%s10925_s13 + $0xa8] sm:$0xff]   ;;  %v9132_v27 = vld [vmem:[%s10925_s13 + $0x18] sm:$0xff]   ;;  %v9142_v62 = vld [vmem:[%s10925_s13 + $0x40] sm:$0xff]  }
 0x875   :  { %v6244_v61 = vpop.f32.mrf.mxu1  ;;  %v6475_v49 = vpop.f32.mrf.mxu0 }
 0x876   :  { %v9134_v61 = vld [vmem:[%s10925_s13 + $0x50] sm:$0xff]  }
 0x877   :  { %v8478_v35 = vpop.f32.mrf.mxu1  ;;  %v8513_v24 = vpop.f32.mrf.mxu0 }
 0x878   :  { %v9137_v35 = vld [vmem:[%s10925_s13 + $0x90] sm:$0xff]   ;;  %v9138_v24 = vld [vmem:[%s10925_s13 + $0x48] sm:$0xff]  }
 0x879   :  { %v6478_v54 = vpop.f32.mrf.mxu0 }
 0x87a   :  { %v9139_v54 = vld [vmem:[%s10925_s13 + $0xc8] sm:$0xff]  }
 0x87b   :  { %v8514_v2 = vpop.f32.mrf.mxu0 }
 0x87c   :  { %v9141_v2 = vld [vmem:[%s10925_s13 + $0x88] sm:$0xff]  }
 0x881   :  { %v6397_v18 = vpop.f32.mrf.mxu1 }
 0x882   :  { %v6403_v58 = vadd.f32 %v6397_v18, %v6325_v0  ;;  %v9143_v0 = vld [vmem:[%s10925_s13 + $0xc0] sm:$0xff]  }
 0x883   :  { %v8501_v16 = vpop.f32.mrf.mxu1  ;;  %v9144_v18 = vld [vmem:[%s10925_s13] sm:$0xff]  }
 0x884   :  { %v6481_v9 = vadd.f32 %v6475_v49, %v6403_v58  ;;  %v9135_v49 = vld [vmem:[%s10925_s13 + $0xd0] sm:$0xff]   ;;  %v9145_v58 = vld [vmem:[%s10925_s13 + $0x80] sm:$0xff]  }
 0x885   :  { %v6400_v7 = vpop.f32.mrf.mxu1 }
 0x886   :  { %v6489_v36 = vadd.f32 %v7778_v22, %v6481_v9  ;;  %v6576_v22 = vlaneseq }
 0x887   :  { %v8502_v41 = vpop.f32.mrf.mxu1 }
 0x888   :  { %v6490_v34 = vmax.f32 %v6489_v36, 0.0  ;;  %v6577_v16 = vshrl.u32 %v6576_v22, 7  ;;  %v6574_v36 = vld [vmem:[#allocation19] sm:$0xf] }
 0x88a   :  { %v6492_v44 = vpack.c.bf16 %v6490_v34, %v6490_v34  ;;  %v6578_v9 = vsub.s32 0, %v6577_v16  ;;  %v6586_v7 = vsub.s32 2, %v6577_v16  ;;  %v6582_v41 = vsub.s32 1, %v6577_v16 }
 0x88b   :  { %v6590_v34 = vsub.s32 3, %v6577_v16 }
 0x88c   :  { %v6499_v23 = vsel %vm6497_vm6, %v6492_v44, 0  ;;  %v6579_v44 = vrot.slane %v6574_v36, %v6578_v9 }
 0x88d   :  { %8516 = vmatpush3.bf16.msra.mxu1 %v6499_v23  ;;  %v6583_v23 = vrot.slane %v6574_v36, %v6582_v41 }
 0x88e   :  { %6756 = vmatprep.subr.bf16.mxu1 %v9068_v26  ;;  %v6587_v26 = vrot.slane %v6574_v36, %v6586_v7 }
 0x890   :  { %8518 = vmatmul.mubr.msk.bf16.vlgmr.msra.gmra.mxu1 %vm6493_vm7, %v6491_v39  ;;  %v6591_v39 = vrot.slane %v6574_v36, %v6590_v34 }
 0x891   :  { %6757 = vmatpush1.bf16.msra.mxu1 %v9066_v43  ;;  %6788 = vmatprep.mubr.bf16.mxu1 %v11149_v10  ;;  %v9102_v10 = vld [vmem:[#allocation17 + $0x20] ss:$16 sps:$4 sm:$0xff]  }
 0x892   :  { %6758 = vmatprep.subr.bf16.mxu1 %v9074_v56 }
 0x895   :  { %6759 = vmatpush1.bf16.msra.mxu1 %v9072_v25 }
 0x896   :  { %6760 = vmatprep.subr.bf16.mxu1 %v9080_v37 }
 0x899   :  { %6761 = vmatpush1.bf16.msra.mxu1 %v9078_v28 }
 0x89a   :  { %6762 = vmatprep.subr.bf16.mxu1 %v9086_v59 }
 0x89d   :  { %6763 = vmatpush1.bf16.msra.mxu1 %v9084_v11 }
 0x89e   :  { %6764 = vmatprep.subr.bf16.mxu1 %v9092_v55 }
 0x8a1   :  { %6765 = vmatpush1.bf16.msra.mxu1 %v9090_v14 }
 0x8a2   :  { %6766 = vmatprep.subr.bf16.mxu1 %v9098_v48 }
 0x8a5   :  { %6767 = vmatpush1.bf16.msra.mxu1 %v9096_v19 }
 0x8a6   :  { %6768 = vmatprep.subr.bf16.mxu1 %v9104_v46 }
 0x8a9   :  { %6769 = vmatpush1.bf16.msra.mxu1 %v9102_v10 }
 0x8aa   :  { %6770 = vmatprep.subr.bf16.mxu1 %v9110_v31 }
 0x8ad   :  { %6771 = vmatpush1.bf16.msra.mxu1 %v9108_v45 }
 0x8ae   :  { %8048 = vmatprep.subr.bf16.mxu1 %v9114_v29 }
 0x950   :  { %v6535_v60 = vpop.f32.mrf.mxu1 }
 0x951   :  { %v6541_v3 = vpack.c.bf16 %v6535_v60, %v6535_v60 }
 0x952   :  { %v8519_v57 = vpop.f32.mrf.mxu1 }
 0x953   :  { %6789 = vmatmul.mubr.bf16.vlgmr.msra.gmra.mxu1 %v6541_v3  ;;  %6830 = vmatmul.mubr.bf16.vlgmr.msra.gmra.mxu0 %v6541_v3  ;;  %v9149_v57 = vld [vmem:[%s10927_s15] sm:$0xff]  }
 0x954   :  { %v6538_v38 = vpop.f32.mrf.mxu1  ;;  %8049 = vmatpush3.bf16.msra.mxu1 %v9116_v63  ;;  %8071 = vmatpush3.bf16.msra.mxu0 %v9117_v1  ;;  %v9146_v63 = vld [vmem:[%s10927_s15 + $0x18] sm:$0xff]  }
 0x955   :  { %8050 = vmatprep.subr.bf16.mxu1 %v9118_v53  ;;  %8072 = vmatprep.subr.bf16.mxu0 %v9119_v42  ;;  %v9147_v53 = vld [vmem:[%s10927_s15 + $0x10] sm:$0xff]   ;;  %v9148_v42 = vld [vmem:[%s10927_s15 + $0x8] sm:$0xff]   ;;  %s9473_s15 = smov [#allocation23]  }
 0x956   :  { %v8520_v15 = vpop.f32.mrf.mxu1  ;;  %s7292_s2 = sshll.u32 %s9473_s15, 4  ;;  %s7293_s2 = int_to_ptr.vmem [resolvable:$true] %s7292_s2 }
 0x957   :  { %s9414_s26 = scalar_lea.vmem %s7293_s2, 32  ;;  %p9419_p10 = scmp.lt.s32.totalorder %s7293_s2, %s7293_s2 }
 0x958   :  { %8051 = vmatpush3.bf16.msra.mxu1 %v9120_v47  ;;  %8073 = vmatpush3.bf16.msra.mxu0 %v9121_v40  ;;  %v7812_v40 = vld [vmem:[#allocation20] ss:$0 sm:$0xff]  ;;  %p9415_p9 = scmp.ne.s32.totalorder %s7293_s2, %s9414_s26  ;;  %p9420_p11 = scmp.lt.s32.totalorder %s9414_s26, %s9414_s26 }
 0x959   :  { %8052 = vmatprep.subr.bf16.mxu1 %v9122_v21  ;;  %8074 = vmatprep.subr.bf16.mxu0 %v9123_v32 }
 0x95a   :  { %p9421_p12 = por %p9420_p11, %p9419_p10 }
 0x95c   :  { %8053 = vmatpush3.bf16.msra.mxu1 %v9124_v8  ;;  %8075 = vmatpush3.bf16.msra.mxu0 %v9125_v51  ;;  %p9422_p13 = pnand %p9421_p12, %p9415_p9 }
 0x95d   :  { %8054 = vmatprep.subr.bf16.mxu1 %v9126_v52  ;;  %8076 = vmatprep.subr.bf16.mxu0 %v9127_v4 }
 0x960   :  { %8055 = vmatpush3.bf16.msra.mxu1 %v9128_v6  ;;  %8077 = vmatpush3.bf16.msra.mxu0 %v9129_v50 }
 0x961   :  { %8056 = vmatprep.subr.bf16.mxu1 %v9130_v20  ;;  %8078 = vmatprep.subr.bf16.mxu0 %v9131_v33 }
 0x964   :  { %8057 = vmatpush3.bf16.msra.mxu1 %v9132_v27  ;;  %8079 = vmatpush3.bf16.msra.mxu0 %v9133_v5  ;;  %v7845_v27 = vld [vmem:[#allocation22] ss:$0 sm:$0xff] }
 0x965   :  { %8058 = vmatprep.subr.bf16.mxu1 %v9134_v61  ;;  %8080 = vmatprep.subr.bf16.mxu0 %v9135_v49 }
 0x968   :  { %8059 = vmatpush3.bf16.msra.mxu1 %v9136_v30  ;;  %8081 = vmatpush3.bf16.msra.mxu0 %v9137_v35 }
 0x969   :  { %8060 = vmatprep.subr.bf16.mxu1 %v9138_v24  ;;  %8082 = vmatprep.subr.bf16.mxu0 %v9139_v54 }
 0x96c   :  { %8061 = vmatpush3.bf16.msra.mxu1 %v9140_v12  ;;  %8083 = vmatpush3.bf16.msra.mxu0 %v9141_v2 }
 0x96d   :  { %8062 = vmatprep.subr.bf16.mxu1 %v9142_v62  ;;  %8084 = vmatprep.subr.bf16.mxu0 %v9143_v0 }
 0x970   :  { %8063 = vmatpush3.bf16.msra.mxu1 %v9144_v18  ;;  %8085 = vmatpush3.bf16.msra.mxu0 %v9145_v58 }
 0x971   :  { %8521 = vmatprep.subr.bf16.mxu1 %v9471_v17 }
 0xa13   :  { %v6790_v43 = vpop.f32.mrf.mxu1  ;;  %v6831_v56 = vpop.f32.mrf.mxu0 }
 0xa14   :  { %v6791_v25 = vadd.f32 %v6790_v43, %v6579_v44  ;;  %v6832_v37 = vadd.f32 %v6831_v56, %v6587_v26 }
 0xa15   :  { %v6792_v28 = vpop.f32.mrf.mxu1  ;;  %v6833_v59 = vpop.f32.mrf.mxu0 }
 0xa16   :  { %v6793_v11 = vadd.f32 %v6792_v28, %v6583_v23  ;;  %v6834_v55 = vadd.f32 %v6833_v59, %v6591_v39  ;;  %v6838_v14 = vmax.f32 %v6791_v25, 0.0  ;;  %v6840_v48 = vmax.f32 %v6832_v37, 0.0 }
 0xa17   :  { %v6794_v19 = vpop.f32.mrf.mxu1  ;;  %v6835_v46 = vpop.f32.mrf.mxu0 }
 0xa18   :  { %v6839_v10 = vmax.f32 %v6793_v11, 0.0  ;;  %v6841_v31 = vmax.f32 %v6834_v55, 0.0  ;;  %v6842_v1 = vpack.c.bf16 %v6838_v14, %v6838_v14  ;;  %v6844_v3 = vpack.c.bf16 %v6840_v48, %v6840_v48 }
 0xa19   :  { %v6795_v45 = vpop.f32.mrf.mxu1  ;;  %v6836_v29 = vpop.f32.mrf.mxu0 }
 0xa1a   :  { %v6843_v13 = vpack.c.bf16 %v6839_v10, %v6839_v10  ;;  %v6845_v60 = vpack.c.bf16 %v6841_v31, %v6841_v31 }
 0xa1c   :  { %7141 = vmatprep.mubr.bf16.mxu1 %v6843_v13  ;;  %7181 = vmatprep.mubr.bf16.mxu0 %v6845_v60 }
 0xa1d   :  { %7142 = vmatmul.mubr.bf16.vlgmr.msra.gmra.mxu1 %v6842_v1  ;;  %7182 = vmatmul.mubr.bf16.vlgmr.msra.gmra.mxu0 %v6844_v3 }
 0xa1e   :  { %8522 = vmatpush3.bf16.msra.mxu1 %v9146_v63  ;;  %8529 = vmatprep.mubr.msk.bf16.mxu1 %vm9472_vm4, %v9471_v17 }
 0xa1f   :  { %8523 = vmatprep.subr.bf16.mxu1 %v9471_v17 }
 0xa22   :  { %8524 = vmatpush3.bf16.msra.mxu1 %v9147_v53 }
 0xa23   :  { %8525 = vmatprep.subr.bf16.mxu1 %v9471_v17 }
 0xa26   :  { %8526 = vmatpush3.bf16.msra.mxu1 %v9148_v42 }
 0xa27   :  { %8527 = vmatprep.subr.bf16.mxu1 %v9471_v17 }
 0xa2a   :  { %8528 = vmatpush3.bf16.msra.mxu1 %v9149_v57 }
 0xadd   :  { %v8064_v38 = vpop.f32.mrf.mxu1  ;;  %v8086_v47 = vpop.f32.mrf.mxu0 }
 0xadf   :  { %v8065_v21 = vpop.f32.mrf.mxu1  ;;  %v8087_v32 = vpop.f32.mrf.mxu0 }
 0xae0   :  { %v8066_v15 = vadd.f32 %v8065_v21, %v8064_v38  ;;  %v8088_v4 = vadd.f32 %v8087_v32, %v8086_v47 }
 0xae1   :  { %v8067_v8 = vpop.f32.mrf.mxu1  ;;  %v8089_v51 = vpop.f32.mrf.mxu0 }
 0xae2   :  { %v7144_v52 = vadd.f32 %v8066_v15, %v7812_v40 }
 0xae3   :  { %v8068_v6 = vpop.f32.mrf.mxu1  ;;  %v8090_v50 = vpop.f32.mrf.mxu0 }
 0xae4   :  { %v7184_v20 = vadd.f32 %v8088_v4, %v7144_v52 }
 0xae6   :  { %v7189_v33 = vmax.f32 %v7184_v20, 0.0 }
 0xae8   :  { %v7190_v17 = vpack.c.bf16 %v7189_v33, %v7189_v33 }
 0xaea   :  { %8530 = vmatmul.mubr.msk.bf16.vlgmr.msra.gmra.mxu1 %vm5825_vm5, %v7190_v17 }
 0xbaa   :  { %v7267_v5 = vpop.f32.mrf.mxu1 }
 0xbab   :  { %v7268_v61 = vadd.f32 %v7845_v27, %v7267_v5 }
 0xbac   :  { %v8531_v49 = vpop.f32.mrf.mxu1 }
 0xbad   :  { %v7274_v30 = vsel %vm7273_vm8, %v7268_v61, -inf }
 0xbae   :  { %7275 = vmax.xlane.f32.xlu0 %v7274_v30  ;;  %v7270_v35 = vpop.f32.mrf.mxu1 }
 0xbb0   :  { %v8532_v24 = vpop.f32.mrf.mxu1 }
 0xc37   :  { %v7276_v54 = vpop.xlane.xlu0 %7275 }
 0xc38   :  { %v7277_v12 = vsub.f32 %v7268_v61, %v7276_v54 }
 0xc3a   :  { %v7278_v2 = vmul.f32 1.442695, %v7277_v12 }
 0xc3c   :  { %9150 = vpow2.f32 %v7278_v2 }
 0xc49   :  { %v9151_v62 = vpop.eup %9150 }
 0xc4a   :  { %v7280_v0 = vsel %vm7273_vm8, %v9151_v62, 0.0 }
 0xc4b   :  { %7281 = vadd.xlane.f32.xlu0 %v7280_v0 }
 0xcd4   :  { %v7282_v18 = vpop.xlane.xlu0 %7281 }
 0xcd5   :  { %9152 = vrcp.f32 %v7282_v18 }
 0xce2   :  { %v9153_v58 = vpop.eup %9152 }
 0xce3   :  { %v7284_v22 = vmul.f32 %v9153_v58, %v9151_v62 }
 0xce5   :  { %7285 = vst.msk [vmem:[#allocation23] sm:$0x3] %vm7273_vm8, %v7284_v22 }
 0xce6   :  { %9425 = shalt.err (!%p9422_p13)
}
 0xce7   :  { %7295 = dma.vmem_to_hbm [thread:$0]  %s7293_s2, 32, %s10929_s17, [#allocation4]  }
 0xce8   :  { %9448 = dma.done.wait [#allocation4], 32  }
 0xce9   :  { %9449 = vsyncadd [#allocation4], 4294967264 }
 0xcea   :  { %7299 = vsyncpa [#allocation3], 1 }
 0xceb   :  { %7300 = vsyncpa [#allocation6], 1 }
 0xcec   :  { %7301 = vsyncpa [#allocation9], 1 }
 0xced   :  { %7302 = vsyncpa [#allocation12], 1 }
 0xcee   :  { %7303 = vsyncpa [#allocation15], 1 }
 0xcef   :  { %7304 = vsyncpa [#allocation18], 1 }
 0xcf0   :  { %7305 = vsyncpa [#allocation21], 1 }
 0xcf1   :  { %7306 = vsyncpa [#allocation4], 1 }

</bundles_post_ra>
